<compile_context>
chip_gen: v7x
topology: tpu7x:2x2x1
jax: 0.10.0
libtpu: 0.0.40
codegen_flags: <defaults>
</compile_context>

<pallas_src>
import functools

import jax
import jax.numpy as jnp
from jax.experimental import pallas as pl
from jax.experimental.pallas import tpu as pltpu


def _rvq_kernel(z_ref, cb_ref, cbt_ref, bias_ref, q_ref, idx_ref, sqerr_ref,
                *, n_levels, n_valid, tile_n, needs_mask, use_bf16_matmul):
    """One tile of tokens (lane axis), all RVQ levels.

    z_ref     : (C,  TN)      f32  input tokens for this tile (tokens on lanes)
    cb_ref    : (Kp, C)       f32  projected codebook (rows >= K are zero pad)
    cbt_ref   : (C,  Kp)      f32  codebook transpose
    bias_ref  : (Kp, 1)       f32  0.5*||e_k||^2 per codebook row (1e30 for pad)
    q_ref     : (C,  TN)      f32  sum of per-level quantized outputs
    idx_ref   : (L,  TN)      i32  per-level argmin indices (levels-major)
    sqerr_ref : (1, Lp, 128)  f32  per-tile per-level sum of (z_q - r)^2
                                   (value broadcast over lanes; wrapper reads
                                    lane 0 and sums over tiles)
    """
    i = pl.program_id(0)

    r = z_ref[...].astype(jnp.float32)                   # (C, TN) residual
    cb = cb_ref[...].astype(jnp.float32)                 # (Kp, C)
    cbt = cbt_ref[...].astype(jnp.float32)               # (C, Kp)
    bias = bias_ref[...].astype(jnp.float32)             # (Kp, 1)
    k_pad = cb.shape[0]
    l_pad = sqerr_ref.shape[1]

    mm_dtype = jnp.bfloat16 if use_bf16_matmul else jnp.float32
    cb_mm = cb.astype(mm_dtype)
    cbt_mm = cbt.astype(mm_dtype)

    # Iotas built once (outside the level loop) and reused.
    k_iota = jax.lax.broadcasted_iota(
        jnp.int32, (k_pad, tile_n), 0).astype(jnp.float32)          # (Kp, TN)
    lvl_iota_idx = jax.lax.broadcasted_iota(jnp.int32, (n_levels, tile_n), 0)
    lvl_iota_err = jax.lax.broadcasted_iota(jnp.int32, (l_pad, tile_n), 0)

    total = jnp.zeros_like(r)
    idx_mat = jnp.zeros((n_levels, tile_n), jnp.int32)
    err_mat = jnp.zeros((l_pad, tile_n), jnp.float32)

    # n_levels is small and static -> unrolled Python loop.
    for lvl in range(n_levels):
        # argmin_k ||r - e_k||^2 == argmin_k (0.5*||e_k||^2 - r . e_k)
        cross = jnp.dot(cb_mm, r.astype(mm_dtype),
                        preferred_element_type=jnp.float32)         # (Kp, TN)
        d = bias - cross                                            # (Kp, TN)
        min_d = jnp.min(d, axis=0, keepdims=True)                   # (1, TN)
        # first-occurrence argmin on ties (matches torch.argmin)
        idx_f = jnp.min(jnp.where(d == min_d, k_iota, float(k_pad)),
                        axis=0, keepdims=True)                      # (1, TN)

        # codebook lookup as one-hot matmul (MXU-friendly, no gather)
        onehot = (k_iota == idx_f).astype(mm_dtype)                 # (Kp, TN)
        zq = jnp.dot(cbt_mm, onehot,
                     preferred_element_type=jnp.float32)            # (C, TN)

        # per-level squared error, reduced over channels only; the lane
        # (token) reduction is deferred to a single post-loop reduce.
        err = zq - r
        err_row = jnp.sum(err * err, axis=0, keepdims=True)         # (1, TN)
        err_mat = jnp.where(lvl_iota_err == lvl, err_row, err_mat)
        idx_mat = jnp.where(lvl_iota_idx == lvl,
                            idx_f.astype(jnp.int32), idx_mat)

        total = total + zq
        r = r - zq                   # residual for the next level

    # straight-through estimator: z + (z_q - z).detach() == z_q numerically
    q_ref[...] = total.astype(q_ref.dtype)
    idx_ref[...] = idx_mat

    if needs_mask:
        lane_ids = i * tile_n + jax.lax.broadcasted_iota(
            jnp.int32, (1, tile_n), 1)
        err_mat = err_mat * (lane_ids < n_valid).astype(jnp.float32)

    lvl_sum = jnp.sum(err_mat, axis=1, keepdims=True)               # (Lp, 1)
    sqerr_ref[...] = jnp.broadcast_to(lvl_sum, (l_pad, 128))[None]


def residual_vq_forward(z, emb_weight, proj_weight, n_levels,
                        commitment_cost=0.25, tile_n=512,
                        use_bf16_matmul=False):
    """ResidualVQ.forward (use_l2_norm=False, the module default).

    z           : [B, C, H, W] float32 (C == token_size)
    emb_weight  : [K, C]  nn.Embedding weight
    proj_weight : [C, C]  nn.Linear(bias=False) weight (identity at init)
    """
    # TODO(synk): use_l2_norm=True branch not implemented (module default is False).
    # TODO(synk): forward-only; no custom_vjp, so gradients through this call do
    #   not reproduce the PyTorch straight-through / detach placement.
    B, C, H, W = z.shape
    assert tile_n % 128 == 0, "tile_n must be a multiple of 128 (lane width)"
    z = z.astype(jnp.float32)

    # Parameter glue: codebook = embedding_proj(embedding.weight) = W_e @ W_p^T
    codebook = jnp.dot(emb_weight.astype(jnp.float32),
                       proj_weight.astype(jnp.float32).T)            # (K, C)
    K = codebook.shape[0]
    K_pad = ((K + 7) // 8) * 8                                       # sublane align
    cb = jnp.pad(codebook, ((0, K_pad - K), (0, 0)))
    cb_t = jnp.transpose(cb)                                         # (C, K_pad)
    cb_bias = 0.5 * jnp.sum(cb * cb, axis=1, keepdims=True)          # (K_pad, 1)
    if K_pad > K:
        # padded codebook rows must never win the argmin
        cb_bias = cb_bias.at[K:].set(1e30)

    # NCHW -> (C, B*H*W): tokens on the (fast) lane axis, channels on sublanes.
    N = B * H * W
    num_tiles = (N + tile_n - 1) // tile_n
    N_pad = num_tiles * tile_n
    z_t = jnp.transpose(z, (1, 0, 2, 3)).reshape(C, N)
    if N_pad != N:
        z_t = jnp.pad(z_t, ((0, 0), (0, N_pad - N)))

    L_pad = ((n_levels + 7) // 8) * 8

    kernel = functools.partial(
        _rvq_kernel, n_levels=n_levels, n_valid=N, tile_n=tile_n,
        needs_mask=(N_pad != N), use_bf16_matmul=use_bf16_matmul)

    q_t, idx_t, sq_part = pl.pallas_call(
        kernel,
        out_shape=(
            jax.ShapeDtypeStruct((C, N_pad), jnp.float32),
            jax.ShapeDtypeStruct((n_levels, N_pad), jnp.int32),
            jax.ShapeDtypeStruct((num_tiles, L_pad, 128), jnp.float32),
        ),
        grid_spec=pltpu.PrefetchScalarGridSpec(
            num_scalar_prefetch=0,
            grid=(num_tiles,),
            in_specs=[
                pl.BlockSpec((C, tile_n), lambda i: (0, i)),      # tokens (tiled)
                pl.BlockSpec((K_pad, C), lambda i: (0, 0)),       # codebook (resident)
                pl.BlockSpec((C, K_pad), lambda i: (0, 0)),       # codebook^T (resident)
                pl.BlockSpec((K_pad, 1), lambda i: (0, 0)),       # 0.5*||e||^2 (resident)
            ],
            out_specs=(
                pl.BlockSpec((C, tile_n), lambda i: (0, i)),
                pl.BlockSpec((n_levels, tile_n), lambda i: (0, i)),
                pl.BlockSpec((1, L_pad, 128), lambda i: (i, 0, 0)),
            ),
        ),
        compiler_params=pltpu.CompilerParams(
            dimension_semantics=("parallel",),       # no cross-tile state
            vmem_limit_bytes=48 * 1024 * 1024),
    )(z_t, cb, cb_t, cb_bias)

    # back to PyTorch layouts
    total_quantized = jnp.transpose(q_t[:, :N].reshape(C, B, H, W), (1, 0, 2, 3))
    indices = jnp.transpose(idx_t[:, :N].reshape(n_levels, B, H, W), (1, 0, 2, 3))

    # losses: per level, commitment = cc * mean((zq - r)^2), codebook = mean((zq - r)^2)
    # (forward values coincide; in torch they differ only by detach placement)
    sqerr = jnp.sum(sq_part, axis=0)[:n_levels, 0]                   # (n_levels,)
    per_level_mse = sqerr / jnp.float32(N * C)
    commitment_loss = commitment_cost * jnp.sum(per_level_mse)
    codebook_loss = jnp.sum(per_level_mse)
    quantizer_loss = commitment_loss + codebook_loss

    result_dict = dict(
        quantizer_loss=quantizer_loss,
        commitment_loss=commitment_loss,
        codebook_loss=codebook_loss,
        min_encoding_indices=indices,          # [B, n_levels, H, W]
    )
    return total_quantized, result_dict


if __name__ == "__main__":
    key = jax.random.PRNGKey(0)
    k_z, k_emb = jax.random.split(key)

    # small shapes consistent with the module: C == token_size
    B, C, H, W = 2, 32, 16, 16
    n_levels = 3
    codebook_size = 64

    z = jax.random.normal(k_z, (B, C, H, W), dtype=jnp.float32)

    # deterministic parameter init, matching the PyTorch __init__:
    #   embedding.weight ~ U(-1/K, 1/K); embedding_proj.weight = I
    emb_weight = jax.random.uniform(
        k_emb, (codebook_size, C), dtype=jnp.float32,
        minval=-1.0 / codebook_size, maxval=1.0 / codebook_size)
    proj_weight = jnp.eye(C, dtype=jnp.float32)

    quantized, result = residual_vq_forward(
        z, emb_weight, proj_weight, n_levels, commitment_cost=0.25)

    jax.block_until_ready(quantized)
    jax.block_until_ready(result["quantizer_loss"])
    jax.block_until_ready(result["min_encoding_indices"])
    print("KERNEL_OK")
</pallas_src>

<mosaic_0001>
module attributes {stable_mosaic.version = 11 : i64} {
  func.func @_rvq_kernel(%arg0: i32, %arg1: memref<32x512xf32, #tpu.memory_space<vmem>>, %arg2: memref<64x32xf32, #tpu.memory_space<vmem>>, %arg3: memref<32x64xf32, #tpu.memory_space<vmem>>, %arg4: memref<64x1xf32, #tpu.memory_space<vmem>>, %arg5: memref<32x512xf32, #tpu.memory_space<vmem>>, %arg6: memref<3x512xi32, #tpu.memory_space<vmem>>, %arg7: memref<1x8x128xf32, #tpu.memory_space<vmem>>) attributes {dimension_semantics = [#tpu.dimension_semantics<parallel>], iteration_bounds = array<i64: 1>, scalar_prefetch = 0 : i64, scratch_operands = 0 : i64, tpu.core_type = #tpu.core_type<tc>, window_params = [{transform_indices = @transform_0, window_bounds = array<i64: 32, 512>}, {pipeline_mode = #tpu.pipeline_mode<synchronous>, transform_indices = @transform_1, window_bounds = array<i64: 64, 32>}, {pipeline_mode = #tpu.pipeline_mode<synchronous>, transform_indices = @transform_2, window_bounds = array<i64: 32, 64>}, {pipeline_mode = #tpu.pipeline_mode<synchronous>, transform_indices = @transform_3, window_bounds = array<i64: 64, 1>}, {transform_indices = @transform_4, window_bounds = array<i64: 32, 512>}, {transform_indices = @transform_5, window_bounds = array<i64: 3, 512>}, {transform_indices = @transform_6, window_bounds = array<i64: 1, 8, 128>}]} {
    %c0 = arith.constant 0 : index
    %c0_0 = arith.constant 0 : index
    %0 = vector.load %arg1[%c0, %c0_0] : memref<32x512xf32, #tpu.memory_space<vmem>>, vector<32x512xf32>
    %c0_1 = arith.constant 0 : index
    %c0_2 = arith.constant 0 : index
    %1 = vector.load %arg2[%c0_1, %c0_2] : memref<64x32xf32, #tpu.memory_space<vmem>>, vector<64x32xf32>
    %c0_3 = arith.constant 0 : index
    %c0_4 = arith.constant 0 : index
    %2 = vector.load %arg3[%c0_3, %c0_4] : memref<32x64xf32, #tpu.memory_space<vmem>>, vector<32x64xf32>
    %c0_5 = arith.constant 0 : index
    %c0_6 = arith.constant 0 : index
    %3 = vector.load %arg4[%c0_5, %c0_6] : memref<64x1xf32, #tpu.memory_space<vmem>>, vector<64x1xf32>
    %4 = tpu.iota {dimensions = array<i32: 0>} : vector<64x512xi32>
    %5 = arith.sitofp %4 : vector<64x512xi32> to vector<64x512xf32>
    %6 = tpu.iota {dimensions = array<i32: 0>} : vector<3x512xi32>
    %7 = tpu.iota {dimensions = array<i32: 0>} : vector<8x512xi32>
    %cst = arith.constant 0.000000e+00 : f32
    %8 = vector.broadcast %cst : f32 to vector<32x512xf32>
    %c0_i32 = arith.constant 0 : i32
    %9 = vector.broadcast %c0_i32 : i32 to vector<3x512xi32>
    %cst_7 = arith.constant 0.000000e+00 : f32
    %10 = vector.broadcast %cst_7 : f32 to vector<8x512xf32>
    %cst_8 = arith.constant dense<0.000000e+00> : vector<64x512xf32>
    %11 = tpu.matmul %1, %0, %cst_8 {dimension_numbers = #tpu.dot_dimension_numbers<[1], [0], [0], [1], [0, 0, 1, 1], [], []>} : vector<64x32xf32>, vector<32x512xf32>, vector<64x512xf32> -> vector<64x512xf32>
    %12 = vector.broadcast %3 : vector<64x1xf32> to vector<64x512xf32>
    %13 = arith.subf %12, %11 : vector<64x512xf32>
    %cst_9 = arith.constant dense<0x7F800000> : vector<512xf32>
    %14 = vector.multi_reduction <minimumf>, %13, %cst_9 [0] : vector<64x512xf32> to vector<512xf32>
    %15 = vector.shape_cast %14 : vector<512xf32> to vector<1x512xf32>
    %16 = vector.broadcast %15 : vector<1x512xf32> to vector<64x512xf32>
    %17 = arith.cmpf oeq, %13, %16 : vector<64x512xf32>
    %cst_10 = arith.constant 6.400000e+01 : f32
    %18 = vector.broadcast %cst_10 : f32 to vector<64x512xf32>
    %19 = arith.select %17, %5, %18 : vector<64x512xi1>, vector<64x512xf32>
    %cst_11 = arith.constant dense<0x7F800000> : vector<512xf32>
    %20 = vector.multi_reduction <minimumf>, %19, %cst_11 [0] : vector<64x512xf32> to vector<512xf32>
    %21 = vector.shape_cast %20 : vector<512xf32> to vector<1x512xf32>
    %22 = vector.broadcast %21 : vector<1x512xf32> to vector<64x512xf32>
    %23 = arith.cmpf oeq, %5, %22 : vector<64x512xf32>
    %24 = arith.extui %23 : vector<64x512xi1> to vector<64x512xi32>
    %25 = arith.sitofp %24 : vector<64x512xi32> to vector<64x512xf32>
    %cst_12 = arith.constant dense<0.000000e+00> : vector<32x512xf32>
    %26 = tpu.matmul %2, %25, %cst_12 {dimension_numbers = #tpu.dot_dimension_numbers<[1], [0], [0], [1], [0, 0, 1, 1], [], []>} : vector<32x64xf32>, vector<64x512xf32>, vector<32x512xf32> -> vector<32x512xf32>
    %27 = arith.subf %26, %0 : vector<32x512xf32>
    %28 = arith.mulf %27, %27 : vector<32x512xf32>
    %cst_13 = arith.constant dense<0.000000e+00> : vector<512xf32>
    %29 = vector.multi_reduction <add>, %28, %cst_13 [0] : vector<32x512xf32> to vector<512xf32>
    %30 = vector.shape_cast %29 : vector<512xf32> to vector<1x512xf32>
    %c0_i32_14 = arith.constant 0 : i32
    %31 = vector.broadcast %c0_i32_14 : i32 to vector<8x512xi32>
    %32 = arith.cmpi eq, %7, %31 : vector<8x512xi32>
    %33 = vector.shape_cast %30 : vector<1x512xf32> to vector<1x512xf32>
    %34 = vector.broadcast %33 : vector<1x512xf32> to vector<8x512xf32>
    %35 = arith.select %32, %34, %10 : vector<8x512xi1>, vector<8x512xf32>
    %c0_i32_15 = arith.constant 0 : i32
    %36 = vector.broadcast %c0_i32_15 : i32 to vector<3x512xi32>
    %37 = arith.cmpi eq, %6, %36 : vector<3x512xi32>
    %38 = arith.fptosi %21 : vector<1x512xf32> to vector<1x512xi32>
    %39 = vector.shape_cast %38 : vector<1x512xi32> to vector<1x512xi32>
    %40 = vector.broadcast %39 : vector<1x512xi32> to vector<3x512xi32>
    %41 = arith.select %37, %40, %9 : vector<3x512xi1>, vector<3x512xi32>
    %42 = arith.addf %8, %26 : vector<32x512xf32>
    %43 = arith.subf %0, %26 : vector<32x512xf32>
    %cst_16 = arith.constant dense<0.000000e+00> : vector<64x512xf32>
    %44 = tpu.matmul %1, %43, %cst_16 {dimension_numbers = #tpu.dot_dimension_numbers<[1], [0], [0], [1], [0, 0, 1, 1], [], []>} : vector<64x32xf32>, vector<32x512xf32>, vector<64x512xf32> -> vector<64x512xf32>
    %45 = vector.broadcast %3 : vector<64x1xf32> to vector<64x512xf32>
    %46 = arith.subf %45, %44 : vector<64x512xf32>
    %cst_17 = arith.constant dense<0x7F800000> : vector<512xf32>
    %47 = vector.multi_reduction <minimumf>, %46, %cst_17 [0] : vector<64x512xf32> to vector<512xf32>
    %48 = vector.shape_cast %47 : vector<512xf32> to vector<1x512xf32>
    %49 = vector.broadcast %48 : vector<1x512xf32> to vector<64x512xf32>
    %50 = arith.cmpf oeq, %46, %49 : vector<64x512xf32>
    %cst_18 = arith.constant 6.400000e+01 : f32
    %51 = vector.broadcast %cst_18 : f32 to vector<64x512xf32>
    %52 = arith.select %50, %5, %51 : vector<64x512xi1>, vector<64x512xf32>
    %cst_19 = arith.constant dense<0x7F800000> : vector<512xf32>
    %53 = vector.multi_reduction <minimumf>, %52, %cst_19 [0] : vector<64x512xf32> to vector<512xf32>
    %54 = vector.shape_cast %53 : vector<512xf32> to vector<1x512xf32>
    %55 = vector.broadcast %54 : vector<1x512xf32> to vector<64x512xf32>
    %56 = arith.cmpf oeq, %5, %55 : vector<64x512xf32>
    %57 = arith.extui %56 : vector<64x512xi1> to vector<64x512xi32>
    %58 = arith.sitofp %57 : vector<64x512xi32> to vector<64x512xf32>
    %cst_20 = arith.constant dense<0.000000e+00> : vector<32x512xf32>
    %59 = tpu.matmul %2, %58, %cst_20 {dimension_numbers = #tpu.dot_dimension_numbers<[1], [0], [0], [1], [0, 0, 1, 1], [], []>} : vector<32x64xf32>, vector<64x512xf32>, vector<32x512xf32> -> vector<32x512xf32>
    %60 = arith.subf %59, %43 : vector<32x512xf32>
    %61 = arith.mulf %60, %60 : vector<32x512xf32>
    %cst_21 = arith.constant dense<0.000000e+00> : vector<512xf32>
    %62 = vector.multi_reduction <add>, %61, %cst_21 [0] : vector<32x512xf32> to vector<512xf32>
    %63 = vector.shape_cast %62 : vector<512xf32> to vector<1x512xf32>
    %c1_i32 = arith.constant 1 : i32
    %64 = vector.broadcast %c1_i32 : i32 to vector<8x512xi32>
    %65 = arith.cmpi eq, %7, %64 : vector<8x512xi32>
    %66 = vector.shape_cast %63 : vector<1x512xf32> to vector<1x512xf32>
    %67 = vector.broadcast %66 : vector<1x512xf32> to vector<8x512xf32>
    %68 = arith.select %65, %67, %35 : vector<8x512xi1>, vector<8x512xf32>
    %c1_i32_22 = arith.constant 1 : i32
    %69 = vector.broadcast %c1_i32_22 : i32 to vector<3x512xi32>
    %70 = arith.cmpi eq, %6, %69 : vector<3x512xi32>
    %71 = arith.fptosi %54 : vector<1x512xf32> to vector<1x512xi32>
    %72 = vector.shape_cast %71 : vector<1x512xi32> to vector<1x512xi32>
    %73 = vector.broadcast %72 : vector<1x512xi32> to vector<3x512xi32>
    %74 = arith.select %70, %73, %41 : vector<3x512xi1>, vector<3x512xi32>
    %75 = arith.addf %42, %59 : vector<32x512xf32>
    %76 = arith.subf %43, %59 : vector<32x512xf32>
    %cst_23 = arith.constant dense<0.000000e+00> : vector<64x512xf32>
    %77 = tpu.matmul %1, %76, %cst_23 {dimension_numbers = #tpu.dot_dimension_numbers<[1], [0], [0], [1], [0, 0, 1, 1], [], []>} : vector<64x32xf32>, vector<32x512xf32>, vector<64x512xf32> -> vector<64x512xf32>
    %78 = vector.broadcast %3 : vector<64x1xf32> to vector<64x512xf32>
    %79 = arith.subf %78, %77 : vector<64x512xf32>
    %cst_24 = arith.constant dense<0x7F800000> : vector<512xf32>
    %80 = vector.multi_reduction <minimumf>, %79, %cst_24 [0] : vector<64x512xf32> to vector<512xf32>
    %81 = vector.shape_cast %80 : vector<512xf32> to vector<1x512xf32>
    %82 = vector.broadcast %81 : vector<1x512xf32> to vector<64x512xf32>
    %83 = arith.cmpf oeq, %79, %82 : vector<64x512xf32>
    %cst_25 = arith.constant 6.400000e+01 : f32
    %84 = vector.broadcast %cst_25 : f32 to vector<64x512xf32>
    %85 = arith.select %83, %5, %84 : vector<64x512xi1>, vector<64x512xf32>
    %cst_26 = arith.constant dense<0x7F800000> : vector<512xf32>
    %86 = vector.multi_reduction <minimumf>, %85, %cst_26 [0] : vector<64x512xf32> to vector<512xf32>
    %87 = vector.shape_cast %86 : vector<512xf32> to vector<1x512xf32>
    %88 = vector.broadcast %87 : vector<1x512xf32> to vector<64x512xf32>
    %89 = arith.cmpf oeq, %5, %88 : vector<64x512xf32>
    %90 = arith.extui %89 : vector<64x512xi1> to vector<64x512xi32>
    %91 = arith.sitofp %90 : vector<64x512xi32> to vector<64x512xf32>
    %cst_27 = arith.constant dense<0.000000e+00> : vector<32x512xf32>
    %92 = tpu.matmul %2, %91, %cst_27 {dimension_numbers = #tpu.dot_dimension_numbers<[1], [0], [0], [1], [0, 0, 1, 1], [], []>} : vector<32x64xf32>, vector<64x512xf32>, vector<32x512xf32> -> vector<32x512xf32>
    %93 = arith.subf %92, %76 : vector<32x512xf32>
    %94 = arith.mulf %93, %93 : vector<32x512xf32>
    %cst_28 = arith.constant dense<0.000000e+00> : vector<512xf32>
    %95 = vector.multi_reduction <add>, %94, %cst_28 [0] : vector<32x512xf32> to vector<512xf32>
    %96 = vector.shape_cast %95 : vector<512xf32> to vector<1x512xf32>
    %c2_i32 = arith.constant 2 : i32
    %97 = vector.broadcast %c2_i32 : i32 to vector<8x512xi32>
    %98 = arith.cmpi eq, %7, %97 : vector<8x512xi32>
    %99 = vector.shape_cast %96 : vector<1x512xf32> to vector<1x512xf32>
    %100 = vector.broadcast %99 : vector<1x512xf32> to vector<8x512xf32>
    %101 = arith.select %98, %100, %68 : vector<8x512xi1>, vector<8x512xf32>
    %c2_i32_29 = arith.constant 2 : i32
    %102 = vector.broadcast %c2_i32_29 : i32 to vector<3x512xi32>
    %103 = arith.cmpi eq, %6, %102 : vector<3x512xi32>
    %104 = arith.fptosi %87 : vector<1x512xf32> to vector<1x512xi32>
    %105 = vector.shape_cast %104 : vector<1x512xi32> to vector<1x512xi32>
    %106 = vector.broadcast %105 : vector<1x512xi32> to vector<3x512xi32>
    %107 = arith.select %103, %106, %74 : vector<3x512xi1>, vector<3x512xi32>
    %108 = arith.addf %75, %92 : vector<32x512xf32>
    %c0_30 = arith.constant 0 : index
    %c0_31 = arith.constant 0 : index
    %109 = vector.load %arg5[%c0_30, %c0_31] : memref<32x512xf32, #tpu.memory_space<vmem>>, vector<32x512xf32>
    tpu.vector_store %arg5[%c0_30, %c0_31], %108 {strides = array<i32>} : memref<32x512xf32, #tpu.memory_space<vmem>>, vector<32x512xf32>,
    %c0_32 = arith.constant 0 : index
    %c0_33 = arith.constant 0 : index
    %110 = vector.load %arg6[%c0_32, %c0_33] : memref<3x512xi32, #tpu.memory_space<vmem>>, vector<3x512xi32>
    tpu.vector_store %arg6[%c0_32, %c0_33], %107 {strides = array<i32>} : memref<3x512xi32, #tpu.memory_space<vmem>>, vector<3x512xi32>,
    %cst_34 = arith.constant dense<0.000000e+00> : vector<8xf32>
    %111 = vector.multi_reduction <add>, %101, %cst_34 [1] : vector<8x512xf32> to vector<8xf32>
    %112 = vector.shape_cast %111 : vector<8xf32> to vector<8x1xf32>
    %113 = vector.shape_cast %112 : vector<8x1xf32> to vector<8x1xf32>
    %114 = vector.broadcast %113 : vector<8x1xf32> to vector<8x128xf32>
    %115 = vector.shape_cast %114 : vector<8x128xf32> to vector<1x8x128xf32>
    %c0_35 = arith.constant 0 : index
    %c0_36 = arith.constant 0 : index
    %c0_37 = arith.constant 0 : index
    %116 = vector.load %arg7[%c0_35, %c0_36, %c0_37] : memref<1x8x128xf32, #tpu.memory_space<vmem>>, vector<1x8x128xf32>
    tpu.vector_store %arg7[%c0_35, %c0_36, %c0_37], %115 {strides = array<i32>} : memref<1x8x128xf32, #tpu.memory_space<vmem>>, vector<1x8x128xf32>,
    return
  }
  func.func @transform_0(%arg0: i32) -> (i32, i32) {
    %c0_i32 = arith.constant 0 : i32
    %c0_i32_0 = arith.constant 0 : i32
    return %c0_i32, %arg0 : i32, i32
  }
  func.func @transform_1(%arg0: i32) -> (i32, i32) {
    %c0_i32 = arith.constant 0 : i32
    %c0_i32_0 = arith.constant 0 : i32
    %c0_i32_1 = arith.constant 0 : i32
    return %c0_i32, %c0_i32_0 : i32, i32
  }
  func.func @transform_2(%arg0: i32) -> (i32, i32) {
    %c0_i32 = arith.constant 0 : i32
    %c0_i32_0 = arith.constant 0 : i32
    %c0_i32_1 = arith.constant 0 : i32
    return %c0_i32, %c0_i32_0 : i32, i32
  }
  func.func @transform_3(%arg0: i32) -> (i32, i32) {
    %c0_i32 = arith.constant 0 : i32
    %c0_i32_0 = arith.constant 0 : i32
    %c0_i32_1 = arith.constant 0 : i32
    return %c0_i32, %c0_i32_0 : i32, i32
  }
  func.func @transform_4(%arg0: i32) -> (i32, i32) {
    %c0_i32 = arith.constant 0 : i32
    %c0_i32_0 = arith.constant 0 : i32
    return %c0_i32, %arg0 : i32, i32
  }
  func.func @transform_5(%arg0: i32) -> (i32, i32) {
    %c0_i32 = arith.constant 0 : i32
    %c0_i32_0 = arith.constant 0 : i32
    return %c0_i32, %arg0 : i32, i32
  }
  func.func @transform_6(%arg0: i32) -> (i32, i32, i32) {
    %c0_i32 = arith.constant 0 : i32
    %c0_i32_0 = arith.constant 0 : i32
    %c0_i32_1 = arith.constant 0 : i32
    return %arg0, %c0_i32, %c0_i32_0 : i32, i32, i32
  }
}

</mosaic_0001>

<bundles_post_ra>
// kernel: tpu_custom_call.1
= control target key start
LH: loop header
LB: loop body
LE: loop exit
PB: predicated region body
PF: predicated region fallthrough
CT: control target
= control target key end

     0   :  { %12 = vsyncpa [#allocation3], 0  ;;  %v5127_v7 = vmov 0.0   ;;  %v3170_v13 = vmov 0   ;;  %vm5249_vm0 = vcmask 261120   ;;  %s5120_s0 = inlined_call_operand.vmem [shape: f32[32,512], index: 0, kind: input, shape index: {}]   ;;  %s5121_s1 = inlined_call_operand.vmem [shape: f32[64,32], index: 1, kind: input, shape index: {}]   ;;  %s5122_s2 = inlined_call_operand.vmem [shape: f32[32,64], index: 2, kind: input, shape index: {}]   ;;  %s5123_s3 = inlined_call_operand.vmem [shape: f32[64,1], index: 3, kind: input, shape index: {}]   ;;  %s5124_s4 = inlined_call_operand.hbm [shape: f32[32,512], index: 4, kind: output, shape index: {0}]   ;;  %s5125_s5 = inlined_call_operand.hbm [shape: s32[3,512], index: 5, kind: output, shape index: {1}]   ;;  %s5126_s6 = inlined_call_operand.hbm [shape: f32[1,8,128], index: 6, kind: output, shape index: {2}]  }
   0x1   :  { %v3215_v0 = vld [vmem:[%s5120_s0 + $0x8] sm:$0xff]  ;;  %v3225_v2 = vld [vmem:[%s5120_s0 + $0x18] sm:$0xff]  ;;  %v3237_v5 = vld [vmem:[%s5120_s0] sm:$0xff]  ;;  %164 = vmatprep.mubr.f32.mxu0 %v5127_v7  ;;  %277 = vmatprep.mubr.f32.mxu1 %v5127_v7 }
   0x2   :  { %v3220_v1 = vld [vmem:[%s5120_s0 + $0x28] sm:$0xff]  ;;  %5267 = vst [vmem:[#allocation9_spill] sm:$0xff] %v3225_v2  ;;  %v3232_v4 = vld [vmem:[%s5120_s0 + $0x38] sm:$0xff]  ;;  %v3242_v6 = vld [vmem:[%s5120_s0 + $0x20] sm:$0xff]  ;;  %3085 = vset.pattern.permute.xlu0 %v3170_v13  ;;  %3086 = vset.pattern.permute.xlu1 %v3170_v13 }
   0x3   :  { %v2909_v3 = vpack.c.bf16 %v3220_v1, %v3215_v0  ;;  %5268 = vst [vmem:[#allocation10_spill] sm:$0xff] %v3232_v4  ;;  %v2917_v8 = vpack.c.bf16 %v3232_v4, %v3225_v2  ;;  %v2911_v9 = vpack.c.bf16 %v3242_v6, %v3237_v5  ;;  %v3253_v10 = vld [vmem:[%s5120_s0 + $0x10] sm:$0xff]  ;;  %v3263_v12 = vld [vmem:[%s5120_s0 + $0x48] sm:$0xff]  ;;  %v3275_v16 = vld [vmem:[%s5120_s0 + $0x58] sm:$0xff] }
   0x4   :  { %v3258_v11 = vld [vmem:[%s5120_s0 + $0x30] sm:$0xff]  ;;  %v3270_v15 = vld [vmem:[%s5120_s0 + $0x68] sm:$0xff]  ;;  %5271 = vst [vmem:[#allocation13_spill] sm:$0xff] %v3275_v16  ;;  %v3280_v17 = vld [vmem:[%s5120_s0 + $0x78] sm:$0xff] }
   0x5   :  { %5269 = vst [vmem:[#allocation11_spill] sm:$0xff] %v3258_v11  ;;  %2910 = vmatprep.subr.bf16.mxu0 %v2909_v3  ;;  %v2919_v14 = vpack.c.bf16 %v3258_v11, %v3253_v10  ;;  %5270 = vst [vmem:[#allocation12_spill] sm:$0xff] %v3270_v15  ;;  %2918 = vmatprep.subr.bf16.mxu1 %v2917_v8  ;;  %v2913_v18 = vpack.c.bf16 %v3270_v15, %v3263_v12  ;;  %v3289_v20 = vld [vmem:[%s5120_s0 + $0x40] sm:$0xff]  ;;  %v3299_v22 = vld [vmem:[%s5120_s0 + $0x50] sm:$0xff] }
   0x6   :  { %5272 = vst [vmem:[#allocation14_spill] sm:$0xff] %v3280_v17  ;;  %2912 = vmatpush1.bf16.msra.mxu0 %v2911_v9  ;;  %v2921_v19 = vpack.c.bf16 %v3280_v17, %v3275_v16  ;;  %v3294_v21 = vld [vmem:[%s5120_s0 + $0x60] sm:$0xff]  ;;  %5274 = vst [vmem:[#allocation16_spill] sm:$0xff] %v3299_v22  ;;  %v3306_v24 = vld [vmem:[%s5120_s0 + $0x70] sm:$0xff] }
   0x7   :  { %5273 = vst [vmem:[#allocation15_spill] sm:$0xff] %v3294_v21  ;;  %2920 = vmatpush1.bf16.msra.mxu1 %v2919_v14  ;;  %v2915_v23 = vpack.c.bf16 %v3294_v21, %v3289_v20  ;;  %5275 = vst [vmem:[#allocation17_spill] sm:$0xff] %v3306_v24  ;;  %2914 = vmatprep.subr.bf16.mxu0 %v2913_v18  ;;  %v2923_v25 = vpack.c.bf16 %v3306_v24, %v3299_v22  ;;  %v3313_v26 = vld [vmem:[%s5121_s1] sm:$0xff]  ;;  %v52_v28 = vld [vmem:[%s5123_s3 + $0x10] sm:$0xff] }
   0x8   :  { %2922 = vmatprep.subr.bf16.mxu1 %v2921_v19  ;;  %5276 = vst [vmem:[#allocation18_spill] sm:$0xff] %v3313_v26  ;;  %v50_v27 = vld [vmem:[%s5123_s3] sm:$0xff]  ;;  %v51_v29 = vld [vmem:[%s5123_s3 + $0x8] sm:$0xff]  ;;  %338 = vperm.xlu1 %3086, %v52_v28  }
   0x9   :  { %328 = vperm.xlu0 %3085, %v50_v27  }
   0xa   :  { %2916 = vmatpush1.bf16.msra.mxu0 %v2915_v23 }
   0xb   :  { %2924 = vmatpush1.bf16.msra.mxu1 %v2923_v25 }
   0xc   :  { %13 = vsyncpa [#allocation5], 0  ;;  %v53_v30 = vld [vmem:[%s5123_s3 + $0x18] sm:$0xff]  ;;  %v3335_v31 = vld [vmem:[%s5121_s1 + $0x8] sm:$0xff]  ;;  %s3173_s16 = smov [#allocation2]  }
   0xd   :  { %2645 = vmatmul.mubr.msk.f32.vlgmr.msra.gmra.mrb[0].mxu0 %vm5249_vm0, %v3313_v26  ;;  %5277 = vst [vmem:[#allocation19_spill] sm:$0xff] %v3335_v31  ;;  %333 = vperm.xlu0 %3085, %v51_v29   ;;  %v54_v32 = vld [vmem:[%s5123_s3 + $0x20] sm:$0xff]  ;;  %v55_v33 = vld [vmem:[%s5123_s3 + $0x28] sm:$0xff]  ;;  %v3352_v34 = vld [vmem:[%s5121_s1 + $0x10] sm:$0xff]  ;;  %s2607_s17 = sshll.u32 %s3173_s16, 4  ;;  %s5077_s17 = int_to_ptr.vmem [resolvable:$true] %s2607_s17 }
   0xe   :  { %2653 = vmatmul.mubr.msk.f32.vlgmr.msra.gmra.mrb[0].mxu1 %vm5249_vm0, %v3313_v26  ;;  %170 = vmatprep.mubr.f32.mxu0 %v5127_v7  ;;  %5278 = vst [vmem:[#allocation20_spill] sm:$0xff] %v3352_v34  ;;  %v56_v35 = vld [vmem:[%s5123_s3 + $0x30] sm:$0xff]  ;;  %v57_v36 = vld [vmem:[%s5123_s3 + $0x38] sm:$0xff]  ;;  %v3380_v38 = vld [vmem:[%s5121_s1 + $0x20] sm:$0xff] }
   0xf   :  { %283 = vmatprep.mubr.f32.mxu1 %v5127_v7  ;;  %343 = vperm.xlu1 %3086, %v53_v30   ;;  %v3369_v37 = vld [vmem:[%s5121_s1 + $0x18] sm:$0xff]  ;;  %5280 = vst [vmem:[#allocation22_spill] sm:$0xff] %v3380_v38  ;;  %v3391_v39 = vld [vmem:[%s5121_s1 + $0x28] sm:$0xff]  ;;  %v3402_v40 = vld [vmem:[%s5121_s1 + $0x30] sm:$0xff] }
  0x10   :  { %5279 = vst [vmem:[#allocation21_spill] sm:$0xff] %v3369_v37  ;;  %5281 = vst [vmem:[#allocation23_spill] sm:$0xff] %v3391_v39  ;;  %v3413_v41 = vld [vmem:[%s5121_s1 + $0x38] sm:$0xff] }
  0x11   :  { %2646 = vmatmul.mubr.msk.f32.gmra.mrb[2].mxu0 %vm5249_vm0, %v3335_v31  ;;  %348 = vperm.xlu0 %3085, %v54_v32   ;;  %5282 = vst [vmem:[#allocation24_spill] sm:$0xff] %v3402_v40  ;;  %5283 = vst [vmem:[#allocation25_spill] sm:$0xff] %v3413_v41 }
  0x12   :  { %2654 = vmatmul.mubr.msk.f32.gmra.mrb[2].mxu1 %vm5249_vm0, %v3335_v31  ;;  %176 = vmatprep.mubr.f32.mxu0 %v5127_v7 }
  0x13   :  { %289 = vmatprep.mubr.f32.mxu1 %v5127_v7  ;;  %353 = vperm.xlu1 %3086, %v55_v33  }
  0x15   :  { %2647 = vmatmul.mubr.msk.f32.gmra.mrb[4].mxu0 %vm5249_vm0, %v3352_v34  ;;  %358 = vperm.xlu0 %3085, %v56_v35  }
  0x16   :  { %2655 = vmatmul.mubr.msk.f32.gmra.mrb[4].mxu1 %vm5249_vm0, %v3352_v34  ;;  %182 = vmatprep.mubr.f32.mxu0 %v5127_v7 }
  0x17   :  { %295 = vmatprep.mubr.f32.mxu1 %v5127_v7  ;;  %363 = vperm.xlu1 %3086, %v57_v36  }
  0x19   :  { %2648 = vmatmul.mubr.msk.f32.gmra.mrb[6].mxu0 %vm5249_vm0, %v3369_v37 }
  0x1a   :  { %2656 = vmatmul.mubr.msk.f32.gmra.mrb[6].mxu1 %vm5249_vm0, %v3369_v37  ;;  %188 = vmatprep.mubr.f32.mxu0 %v5127_v7 }
  0x1b   :  { %301 = vmatprep.mubr.f32.mxu1 %v5127_v7 }
  0x1d   :  { %2649 = vmatmul.mubr.msk.f32.gmra.mrb[8].mxu0 %vm5249_vm0, %v3380_v38 }
  0x1e   :  { %2657 = vmatmul.mubr.msk.f32.gmra.mrb[8].mxu1 %vm5249_vm0, %v3380_v38  ;;  %194 = vmatprep.mubr.f32.mxu0 %v5127_v7 }
  0x1f   :  { %307 = vmatprep.mubr.f32.mxu1 %v5127_v7 }
  0x21   :  { %2650 = vmatmul.mubr.msk.f32.gmra.mrb[10].mxu0 %vm5249_vm0, %v3391_v39 }
  0x22   :  { %2658 = vmatmul.mubr.msk.f32.gmra.mrb[10].mxu1 %vm5249_vm0, %v3391_v39  ;;  %200 = vmatprep.mubr.f32.mxu0 %v5127_v7 }
  0x23   :  { %313 = vmatprep.mubr.f32.mxu1 %v5127_v7 }
  0x25   :  { %2651 = vmatmul.mubr.msk.f32.gmra.mrb[12].mxu0 %vm5249_vm0, %v3402_v40 }
  0x26   :  { %2659 = vmatmul.mubr.msk.f32.gmra.mrb[12].mxu1 %vm5249_vm0, %v3402_v40  ;;  %206 = vmatprep.mubr.f32.mxu0 %v5127_v7 }
  0x27   :  { %319 = vmatprep.mubr.f32.mxu1 %v5127_v7 }
  0x29   :  { %2652 = vmatmul.mubr.msk.f32.gmra.mrb[14].mxu0 %vm5249_vm0, %v3413_v41 }
  0x2a   :  { %2660 = vmatmul.mubr.msk.f32.gmra.mrb[14].mxu1 %vm5249_vm0, %v3413_v41  ;;  %739 = vmatprep.mubr.f32.mxu0 %v5127_v7 }
  0x2b   :  { %828 = vmatprep.mubr.f32.mxu1 %v5127_v7 }
  0x87   :  { %v3441_v56 = vpop.permute.xlu1 %338 }
  0x88   :  { %v3422_v42 = vpop.permute.xlu0 %328  ;;  %5286 = vst [vmem:[#allocation28_spill] sm:$0xff] %v3441_v56 }
  0x89   :  { %5284 = vst [vmem:[#allocation26_spill] sm:$0xff] %v3422_v42 }
  0x8c   :  { %v3424_v47 = vpop.permute.xlu0 %333 }
  0x8d   :  { %5285 = vst [vmem:[#allocation27_spill] sm:$0xff] %v3424_v47 }
  0x8e   :  { %v3474_v29 = vpop.permute.xlu1 %343 }
  0x8f   :  { %5287 = vst [vmem:[#allocation29_spill] sm:$0xff] %v3474_v29 }
  0xe0   :  { %v166_v43 = vpop.f32.mrb[0].mxu0 }
  0xe1   :  { %v168_v44 = vpop.f32.mrb[1].mxu0  ;;  %v279_v45 = vpop.f32.mrb[0].mxu1  ;;  %v3430_v50 = vsub.f32 %v3422_v42, %v166_v43 }
  0xe2   :  { %v281_v46 = vpop.f32.mrb[1].mxu1  ;;  %v3427_v48 = vsub.f32 %v3422_v42, %v279_v45  ;;  %v3436_v54 = vsub.f32 %v3422_v42, %v168_v44 }
  0xe3   :  { %v3447_v59 = vsub.f32 %v3422_v42, %v281_v46 }
  0xe4   :  { %v172_v49 = vpop.f32.mrb[2].mxu0 }
  0xe5   :  { %v3433_v51 = vsub.f32 %v3424_v47, %v172_v49  ;;  %v285_v52 = vpop.f32.mrb[2].mxu1  ;;  %v174_v53 = vpop.f32.mrb[3].mxu0 }
  0xe6   :  { %v3439_v55 = vsub.f32 %v3424_v47, %v285_v52  ;;  %v3444_v57 = vsub.f32 %v3424_v47, %v174_v53  ;;  %v287_v58 = vpop.f32.mrb[3].mxu1  ;;  %v3491_v53 = vpop.permute.xlu0 %348 }
  0xe7   :  { %v398_v60 = vmin.f32 %v3430_v50, %v3433_v51  ;;  %v3452_v61 = vsub.f32 %v3424_v47, %v287_v58  ;;  %5288 = vst [vmem:[#allocation30_spill] sm:$0xff] %v3491_v53 }
  0xe8   :  { %v424_v62 = vmin.f32 %v3427_v48, %v3439_v55  ;;  %v411_v63 = vmin.f32 %v3436_v54, %v3444_v57  ;;  %v178_v3 = vpop.f32.mrb[4].mxu0 }
  0xe9   :  { %v437_v8 = vmin.f32 %v3447_v59, %v3452_v61  ;;  %v3461_v9 = vsub.f32 %v3441_v56, %v178_v3  ;;  %v291_v13 = vpop.f32.mrb[4].mxu1  ;;  %v180_v14 = vpop.f32.mrb[5].mxu0 }
  0xea   :  { %v3464_v18 = vsub.f32 %v3441_v56, %v291_v13  ;;  %v3467_v19 = vsub.f32 %v3441_v56, %v180_v14  ;;  %v293_v23 = vpop.f32.mrb[5].mxu1 }
  0xeb   :  { %v399_v25 = vmin.f32 %v398_v60, %v3461_v9  ;;  %v3471_v27 = vsub.f32 %v3441_v56, %v293_v23 }
  0xec   :  { %v425_v28 = vmin.f32 %v424_v62, %v3464_v18  ;;  %v412_v30 = vmin.f32 %v411_v63, %v3467_v19  ;;  %v184_v32 = vpop.f32.mrb[6].mxu0 }
  0xed   :  { %v438_v33 = vmin.f32 %v437_v8, %v3471_v27  ;;  %v3479_v35 = vsub.f32 %v3474_v29, %v184_v32  ;;  %v297_v36 = vpop.f32.mrb[6].mxu1  ;;  %v186_v43 = vpop.f32.mrb[7].mxu0 }
  0xee   :  { %v3482_v44 = vsub.f32 %v3474_v29, %v297_v36  ;;  %v3485_v45 = vsub.f32 %v3474_v29, %v186_v43  ;;  %v299_v46 = vpop.f32.mrb[7].mxu1 }
  0xef   :  { %v400_v49 = vmin.f32 %v399_v25, %v3479_v35  ;;  %v3489_v52 = vsub.f32 %v3474_v29, %v299_v46 }
  0xf0   :  { %v426_v58 = vmin.f32 %v425_v28, %v3482_v44  ;;  %v413_v60 = vmin.f32 %v412_v30, %v3485_v45  ;;  %v190_v62 = vpop.f32.mrb[8].mxu0  ;;  %v3509_v30 = vpop.permute.xlu1 %353 }
  0xf1   :  { %v439_v63 = vmin.f32 %v438_v33, %v3489_v52  ;;  %v3497_v3 = vsub.f32 %v3491_v53, %v190_v62  ;;  %v303_v8 = vpop.f32.mrb[8].mxu1  ;;  %v192_v13 = vpop.f32.mrb[9].mxu0  ;;  %5289 = vst [vmem:[#allocation31_spill] sm:$0xff] %v3509_v30 }
  0xf2   :  { %v3500_v14 = vsub.f32 %v3491_v53, %v303_v8  ;;  %v3503_v23 = vsub.f32 %v3491_v53, %v192_v13  ;;  %v305_v25 = vpop.f32.mrb[9].mxu1 }
  0xf3   :  { %v401_v32 = vmin.f32 %v400_v49, %v3497_v3  ;;  %v3507_v28 = vsub.f32 %v3491_v53, %v305_v25 }
  0xf4   :  { %v427_v33 = vmin.f32 %v426_v58, %v3500_v14  ;;  %v414_v36 = vmin.f32 %v413_v60, %v3503_v23  ;;  %v196_v43 = vpop.f32.mrb[10].mxu0  ;;  %v3527_v60 = vpop.permute.xlu0 %358 }
  0xf5   :  { %v440_v46 = vmin.f32 %v439_v63, %v3507_v28  ;;  %v3515_v62 = vsub.f32 %v3509_v30, %v196_v43  ;;  %v309_v8 = vpop.f32.mrb[10].mxu1  ;;  %v198_v13 = vpop.f32.mrb[11].mxu0  ;;  %5290 = vst [vmem:[#allocation32_spill] sm:$0xff] %v3527_v60 }
  0xf6   :  { %v3518_v7 = vsub.f32 %v3509_v30, %v309_v8  ;;  %v3521_v49 = vsub.f32 %v3509_v30, %v198_v13  ;;  %v311_v25 = vpop.f32.mrb[11].mxu1 }
  0xf7   :  { %v402_v53 = vmin.f32 %v401_v32, %v3515_v62  ;;  %v3525_v58 = vsub.f32 %v3509_v30, %v311_v25 }
  0xf8   :  { %v428_v63 = vmin.f32 %v427_v33, %v3518_v7  ;;  %v415_v43 = vmin.f32 %v414_v36, %v3521_v49  ;;  %v202_v29 = vpop.f32.mrb[12].mxu0  ;;  %v3545_v36 = vpop.permute.xlu1 %363 }
  0xf9   :  { %v441_v56 = vmin.f32 %v440_v46, %v3525_v58  ;;  %v3533_v8 = vsub.f32 %v3527_v60, %v202_v29  ;;  %v315_v13 = vpop.f32.mrb[12].mxu1  ;;  %v204_v47 = vpop.f32.mrb[13].mxu0  ;;  %5291 = vst [vmem:[#allocation33_spill] sm:$0xff] %v3545_v36 }
  0xfa   :  { %v3536_v42 = vsub.f32 %v3527_v60, %v315_v13  ;;  %v3539_v32 = vsub.f32 %v3527_v60, %v204_v47  ;;  %v317_v25 = vpop.f32.mrb[13].mxu1 }
  0xfb   :  { %v403_v30 = vmin.f32 %v402_v53, %v3533_v8  ;;  %v3543_v33 = vsub.f32 %v3527_v60, %v317_v25  ;;  %v58_v60 = vlaneseq }
  0xfc   :  { %v429_v46 = vmin.f32 %v428_v63, %v3536_v42  ;;  %v416_v29 = vmin.f32 %v415_v43, %v3539_v32  ;;  %v208_v41 = vpop.f32.mrb[14].mxu0 }
  0xfd   :  { %v442_v40 = vmin.f32 %v441_v56, %v3543_v33  ;;  %v3551_v13 = vsub.f32 %v3545_v36, %v208_v41  ;;  %v321_v47 = vpop.f32.mrb[14].mxu1  ;;  %v210_v39 = vpop.f32.mrb[15].mxu0  ;;  %v3566_v26 = vshrl.u32 %v58_v60, 7 }
  0xfe   :  { %v3554_v38 = vsub.f32 %v3545_v36, %v321_v47  ;;  %v3557_v53 = vsub.f32 %v3545_v36, %v210_v39  ;;  %v323_v25 = vpop.f32.mrb[15].mxu1 }
  0xff   :  { %v404_v63 = vmin.f32 %v403_v30, %v3551_v13  ;;  %v3561_v43 = vsub.f32 %v3545_v36, %v323_v25  ;;  %v60_v25 = vadd.s32 8, %v3566_v26 }
 0x100   :  { %v430_v56 = vmin.f32 %v429_v46, %v3554_v38  ;;  %v417_v41 = vmin.f32 %v416_v29, %v3557_v53  ;;  %v61_v46 = vadd.s32 16, %v3566_v26  ;;  %v62_v29 = vadd.s32 24, %v3566_v26 }
 0x101   :  { %v405_v37 = vrot.slane %v404_v63, 4  ;;  %v443_v34 = vmin.f32 %v442_v40, %v3561_v43  ;;  %v63_v40 = vadd.s32 32, %v3566_v26  ;;  %v3578_v21 = vcvt.s32.f32 %v60_v25 }
 0x102   :  { %v431_v31 = vrot.slane %v430_v56, 4  ;;  %v418_v47 = vrot.slane %v417_v41, 4  ;;  %v3580_v2 = vcvt.s32.f32 %v61_v46 }
 0x103   :  { %v406_v39 = vmin.f32 %v404_v63, %v405_v37  ;;  %v444_v16 = vrot.slane %v443_v34, 4  ;;  %v64_v37 = vadd.s32 40, %v3566_v26  ;;  %v65_v63 = vadd.s32 48, %v3566_v26 }
 0x104   :  { %v432_v17 = vmin.f32 %v430_v56, %v431_v31  ;;  %v419_v24 = vmin.f32 %v417_v41, %v418_v47  ;;  %v66_v56 = vadd.s32 56, %v3566_v26  ;;  %v3576_v41 = vcvt.s32.f32 %v3566_v26 }
 0x105   :  { %v407_v22 = vrot.slane %v406_v39, 2  ;;  %v445_v60 = vmin.f32 %v443_v34, %v444_v16 }
 0x106   :  { %v433_v30 = vrot.slane %v432_v17, 2  ;;  %v420_v4 = vrot.slane %v419_v24, 2 }
 0x107   :  { %v408_v36 = vmin.f32 %v406_v39, %v407_v22  ;;  %v3582_v22 = vcvt.s32.f32 %v62_v29  ;;  %v446_v34 = vrot.slane %v445_v60, 2  ;;  %v3602_v39 = vcvt.s32.f32 %v66_v56 }
 0x108   :  { %v434_v15 = vmin.f32 %v432_v17, %v433_v30  ;;  %v421_v11 = vmin.f32 %v419_v24, %v420_v4  ;;  %v3584_v4 = vcvt.s32.f32 %v63_v40 }
 0x109   :  { %v409_v31 = vrot.slane %v408_v36, 1  ;;  %v447_v25 = vmin.f32 %v445_v60, %v446_v34 }
 0x10a   :  { %v435_v47 = vrot.slane %v434_v15, 1  ;;  %v422_v24 = vrot.slane %v421_v11, 1 }
 0x10b   :  { %v410_v17 = vmin.f32 %v408_v36, %v409_v31  ;;  %v3598_v36 = vcvt.s32.f32 %v65_v63  ;;  %v448_v40 = vrot.slane %v447_v25, 1 }
 0x10c   :  { %v3586_v16 = vmin.f32 %v434_v15, %v435_v47  ;;  %v3596_v15 = vcvt.s32.f32 %v64_v37  ;;  %v3605_v30 = vmin.f32 %v421_v11, %v422_v24 }
 0x10d   :  { %vm450_vm1 = vcmp.eq.f32.partialorder %v3430_v50, %v410_v17  ;;  %vm454_vm2 = vcmp.eq.f32.partialorder %v3433_v51, %v410_v17  ;;  %vm458_vm3 = vcmp.eq.f32.partialorder %v3461_v9, %v410_v17  ;;  %vm462_vm4 = vcmp.eq.f32.partialorder %v3479_v35, %v410_v17 }
 0x10e   :  { %vm466_vm5 = vcmp.eq.f32.partialorder %v3497_v3, %v410_v17  ;;  %vm470_vm6 = vcmp.eq.f32.partialorder %v3515_v62, %v410_v17  ;;  %vm474_vm7 = vcmp.eq.f32.partialorder %v3533_v8, %v410_v17  ;;  %vm478_vm8 = vcmp.eq.f32.partialorder %v3551_v13, %v410_v17 }
 0x10f   :  { %v482_v50 = vsel %vm450_vm1, %v3576_v41, 64.0  ;;  %v486_v51 = vsel %vm454_vm2, %v3578_v21, 64.0  ;;  %v490_v9 = vsel %vm458_vm3, %v3580_v2, 64.0  ;;  %vm452_vm9 = vcmp.eq.f32.partialorder %v3427_v48, %v3586_v16 }
 0x110   :  { %v514_v46 = vmin.f32 %v482_v50, %v486_v51  ;;  %vm456_vm10 = vcmp.eq.f32.partialorder %v3439_v55, %v3586_v16  ;;  %vm460_vm11 = vcmp.eq.f32.partialorder %v3464_v18, %v3586_v16  ;;  %vm464_vm12 = vcmp.eq.f32.partialorder %v3482_v44, %v3586_v16 }
 0x111   :  { %vm468_vm13 = vcmp.eq.f32.partialorder %v3500_v14, %v3586_v16  ;;  %vm472_vm14 = vcmp.eq.f32.partialorder %v3518_v7, %v3586_v16  ;;  %vm476_vm15 = vcmp.eq.f32.partialorder %v3536_v42, %v3586_v16  ;;  %vm480_vm1 = vcmp.eq.f32.partialorder %v3554_v38, %v3586_v16 }
 0x112   :  { %v515_v11 = vmin.f32 %v514_v46, %v490_v9  ;;  %v484_v48 = vsel %vm452_vm9, %v3576_v41, 64.0  ;;  %v488_v55 = vsel %vm456_vm10, %v3578_v21, 64.0  ;;  %v494_v18 = vsel %vm462_vm4, %v3582_v22, 64.0 }
 0x113   :  { %v498_v44 = vsel %vm466_vm5, %v3584_v4, 64.0  ;;  %v502_v29 = vsel %vm470_vm6, %v3596_v15, 64.0  ;;  %v492_v37 = vsel %vm460_vm11, %v3580_v2, 64.0  ;;  %v496_v31 = vsel %vm464_vm12, %v3582_v22, 64.0 }
 0x114   :  { %v516_v60 = vmin.f32 %v515_v11, %v494_v18  ;;  %v540_v63 = vmin.f32 %v484_v48, %v488_v55  ;;  %vm451_vm2 = vcmp.eq.f32.partialorder %v3436_v54, %v3605_v30  ;;  %vm455_vm3 = vcmp.eq.f32.partialorder %v3444_v57, %v3605_v30 }
 0x115   :  { %vm459_vm4 = vcmp.eq.f32.partialorder %v3467_v19, %v3605_v30  ;;  %vm463_vm5 = vcmp.eq.f32.partialorder %v3485_v45, %v3605_v30  ;;  %vm467_vm6 = vcmp.eq.f32.partialorder %v3503_v23, %v3605_v30  ;;  %vm471_vm9 = vcmp.eq.f32.partialorder %v3521_v49, %v3605_v30 }
 0x116   :  { %v517_v35 = vmin.f32 %v516_v60, %v498_v44  ;;  %v541_v3 = vmin.f32 %v540_v63, %v492_v37  ;;  %vm475_vm10 = vcmp.eq.f32.partialorder %v3539_v32, %v3605_v30  ;;  %vm479_vm11 = vcmp.eq.f32.partialorder %v3557_v53, %v3605_v30 }
 0x117   :  { %v483_v54 = vsel %vm451_vm2, %v3576_v41, 64.0  ;;  %v487_v57 = vsel %vm455_vm3, %v3578_v21, 64.0  ;;  %v506_v47 = vsel %vm474_vm7, %v3598_v36, 64.0  ;;  %v510_v24 = vsel %vm478_vm8, %v3602_v39, 64.0 }
 0x118   :  { %v518_v62 = vmin.f32 %v517_v35, %v502_v29  ;;  %v542_v56 = vmin.f32 %v541_v3, %v496_v31  ;;  %v500_v34 = vsel %vm468_vm13, %v3584_v4, 64.0  ;;  %v504_v50 = vsel %vm472_vm14, %v3596_v15, 64.0 }
 0x119   :  { %v527_v46 = vmin.f32 %v483_v54, %v487_v57  ;;  %v449_v11 = vmin.f32 %v447_v25, %v448_v40  ;;  %v508_v8 = vsel %vm476_vm15, %v3598_v36, 64.0  ;;  %v512_v14 = vsel %vm480_vm1, %v3602_v39, 64.0 }
 0x11a   :  { %v519_v51 = vmin.f32 %v518_v62, %v506_v47  ;;  %v543_v9 = vmin.f32 %v542_v56, %v500_v34  ;;  %v491_v7 = vsel %vm459_vm4, %v3580_v2, 64.0  ;;  %v495_v13 = vsel %vm463_vm5, %v3582_v22, 64.0 }
 0x11b   :  { %v528_v48 = vmin.f32 %v527_v46, %v491_v7  ;;  %vm453_vm7 = vcmp.eq.f32.partialorder %v3447_v59, %v449_v11  ;;  %vm457_vm8 = vcmp.eq.f32.partialorder %v3452_v61, %v449_v11  ;;  %vm461_vm12 = vcmp.eq.f32.partialorder %v3471_v27, %v449_v11 }
 0x11c   :  { %v520_v17 = vmin.f32 %v519_v51, %v510_v24  ;;  %v544_v25 = vmin.f32 %v543_v9, %v504_v50  ;;  %vm465_vm13 = vcmp.eq.f32.partialorder %v3489_v52, %v449_v11  ;;  %vm469_vm14 = vcmp.eq.f32.partialorder %v3507_v28, %v449_v11 }
 0x11d   :  { %v529_v19 = vmin.f32 %v528_v48, %v495_v13  ;;  %vm473_vm15 = vcmp.eq.f32.partialorder %v3525_v58, %v449_v11  ;;  %v499_v45 = vsel %vm467_vm6, %v3584_v4, 64.0  ;;  %vm477_vm1 = vcmp.eq.f32.partialorder %v3543_v33, %v449_v11 }
 0x11e   :  { %v521_v38 = vrot.slane %v520_v17, 4  ;;  %v545_v42 = vmin.f32 %v544_v25, %v508_v8  ;;  %vm481_vm2 = vcmp.eq.f32.partialorder %v3561_v43, %v449_v11  ;;  %v485_v59 = vsel %vm453_vm7, %v3576_v41, 64.0 }
 0x11f   :  { %v530_v55 = vmin.f32 %v529_v19, %v499_v45  ;;  %v489_v18 = vsel %vm457_vm8, %v3578_v21, 64.0  ;;  %v503_v44 = vsel %vm471_vm9, %v3596_v15, 64.0  ;;  %v507_v60 = vsel %vm475_vm10, %v3598_v36, 64.0  ;;  %v3802_v45 = vld [vmem:[%s5122_s2] sm:$0xff] }
 0x120   :  { %v522_v61 = vmin.f32 %v520_v17, %v521_v38  ;;  %v546_v16 = vmin.f32 %v545_v42, %v512_v14  ;;  %v553_v37 = vmin.f32 %v485_v59, %v489_v18  ;;  %v493_v63 = vsel %vm461_vm12, %v3580_v2, 64.0  ;;  %5292 = vst [vmem:[#allocation34_spill] sm:$0xff] %v3802_v45 }
 0x121   :  { %v531_v40 = vmin.f32 %v530_v55, %v503_v44  ;;  %v511_v49 = vsel %vm479_vm11, %v3602_v39, 64.0  ;;  %v497_v57 = vsel %vm465_vm13, %v3582_v22, 64.0  ;;  %v501_v27 = vsel %vm469_vm14, %v3584_v4, 64.0  ;;  %v3845_v55 = vld [vmem:[%s5122_s2 + $0x18] sm:$0xff] }
 0x122   :  { %v547_v29 = vrot.slane %v546_v16, 4  ;;  %v523_v23 = vrot.slane %v522_v61, 2  ;;  %v554_v35 = vmin.f32 %v553_v37, %v493_v63  ;;  %v505_v53 = vsel %vm473_vm15, %v3596_v15, 64.0  ;;  %5296 = vst [vmem:[#allocation37_spill] sm:$0xff] %v3845_v55 }
 0x123   :  { %v532_v31 = vmin.f32 %v531_v40, %v507_v60  ;;  %v509_v52 = vsel %vm477_vm1, %v3598_v36, 64.0  ;;  %v513_v28 = vsel %vm481_vm2, %v3602_v39, 64.0  ;;  %v5179_v11 = vmov 1.0|1.0  }
 0x124   :  { %v548_v3 = vmin.f32 %v546_v16, %v547_v29  ;;  %v524_v32 = vmin.f32 %v522_v61, %v523_v23  ;;  %v555_v62 = vmin.f32 %v554_v35, %v497_v57  ;;  %v5293_v59 = vmov 0.0   ;;  %v3820_v61 = vld [vmem:[%s5122_s2 + $0x8] sm:$0xff]  ;;  %v3834_v16 = vld [vmem:[%s5122_s2 + $0x10] sm:$0xff] }
 0x125   :  { %v533_v54 = vmin.f32 %v532_v31, %v511_v49  ;;  %5294 = vst [vmem:[#allocation35_spill] sm:$0xff] %v3820_v61  ;;  %5295 = vst [vmem:[#allocation36_spill] sm:$0xff] %v3834_v16 }
 0x126   :  { %v556_v47 = vmin.f32 %v555_v62, %v501_v27  ;;  %v549_v24 = vrot.slane %v548_v3, 2  ;;  %v525_v30 = vrot.slane %v524_v32, 1 }
 0x127   :  { %v534_v56 = vrot.slane %v533_v54, 4 }
 0x128   :  { %v557_v50 = vmin.f32 %v556_v47, %v505_v53  ;;  %v550_v46 = vmin.f32 %v548_v3, %v549_v24  ;;  %v3728_v14 = vmin.f32 %v524_v32, %v525_v30 }
 0x129   :  { %v535_v34 = vmin.f32 %v533_v54, %v534_v56 }
 0x12a   :  { %v558_v9 = vmin.f32 %v557_v50, %v509_v52  ;;  %v551_v17 = vrot.slane %v550_v46, 1  ;;  %vm566_vm3 = vcmp.eq.f32.partialorder %v3576_v41, %v3728_v14  ;;  %vm570_vm4 = vcmp.eq.f32.partialorder %v3578_v21, %v3728_v14 }
 0x12b   :  { %v536_v51 = vrot.slane %v535_v34, 2  ;;  %vm2927_vm7 = vmpackc.low %vm570_vm4, %vm566_vm3  ;;  %vm574_vm12 = vcmp.eq.f32.partialorder %v3580_v2, %v3728_v14  ;;  %vm578_vm13 = vcmp.eq.f32.partialorder %v3582_v22, %v3728_v14  ;;  %vm582_vm1 = vcmp.eq.f32.partialorder %v3584_v4, %v3728_v14 }
 0x12c   :  { %v559_v7 = vmin.f32 %v558_v9, %v513_v28  ;;  %v3744_v43 = vmin.f32 %v550_v46, %v551_v17  ;;  %vm586_vm2 = vcmp.eq.f32.partialorder %v3596_v15, %v3728_v14  ;;  %v5311_v9 = vld [vmem:[#allocation9_spill] sm:$0xff]  ;;  %v5316_v17 = vld [vmem:[#allocation15_spill] sm:$0xff] }
 0x12d   :  { %v537_v8 = vmin.f32 %v535_v34, %v536_v51 }
 0x12e   :  { %v560_v58 = vrot.slane %v559_v7, 4  ;;  %vm568_vm3 = vcmp.eq.f32.partialorder %v3576_v41, %v3744_v43  ;;  %vm572_vm4 = vcmp.eq.f32.partialorder %v3578_v21, %v3744_v43 }
 0x12f   :  { %v538_v13 = vrot.slane %v537_v8, 1 }
 0x130   :  { %v561_v48 = vmin.f32 %v559_v7, %v560_v58 }
 0x131   :  { %v3730_v25 = vmin.f32 %v537_v8, %v538_v13 }
 0x132   :  { %v562_v33 = vrot.slane %v561_v48, 2 }
 0x133   :  { %vm567_vm5 = vcmp.eq.f32.partialorder %v3576_v41, %v3730_v25  ;;  %vm571_vm6 = vcmp.eq.f32.partialorder %v3578_v21, %v3730_v25  ;;  %vm575_vm9 = vcmp.eq.f32.partialorder %v3580_v2, %v3730_v25  ;;  %vm579_vm10 = vcmp.eq.f32.partialorder %v3582_v22, %v3730_v25 }
 0x134   :  { %vm2925_vm11 = vmpackc.low %vm571_vm6, %vm567_vm5  ;;  %v563_v38 = vmin.f32 %v561_v48, %v562_v33  ;;  %vm583_vm14 = vcmp.eq.f32.partialorder %v3584_v4, %v3730_v25  ;;  %vm587_vm15 = vcmp.eq.f32.partialorder %v3596_v15, %v3730_v25 }
 0x135   :  { %2926 = vmatprep.subr.msk.bf16.mxu0 %vm2925_vm11, %v5179_v11  ;;  %vm2929_vm8 = vmpackc.low %vm579_vm10, %vm575_vm9  ;;  %vm591_vm10 = vcmp.eq.f32.partialorder %v3598_v36, %v3730_v25  ;;  %vm595_vm11 = vcmp.eq.f32.partialorder %v3602_v39, %v3730_v25 }
 0x136   :  { %2928 = vmatpush1.bf16.msk.msra.mxu0 %vm2927_vm7, %v5179_v11  ;;  %v564_v42 = vrot.slane %v563_v38, 1  ;;  %vm2931_vm5 = vmpackc.low %vm578_vm13, %vm574_vm12 }
 0x137   :  { %2930 = vmatprep.subr.msk.bf16.mxu0 %vm2929_vm8, %v5179_v11  ;;  %vm2933_vm6 = vmpackc.low %vm587_vm15, %vm583_vm14 }
 0x138   :  { %v3765_v19 = vmin.f32 %v563_v38, %v564_v42  ;;  %vm2935_vm9 = vmpackc.low %vm586_vm2, %vm582_vm1  ;;  %vm590_vm2 = vcmp.eq.f32.partialorder %v3598_v36, %v3728_v14  ;;  %v5319_v42 = vld [vmem:[#allocation11_spill] sm:$0xff] }
 0x139   :  { %vm2943_vm12 = vmpackc.low %vm572_vm4, %vm568_vm3  ;;  %vm576_vm4 = vcmp.eq.f32.partialorder %v3580_v2, %v3744_v43 }
 0x13a   :  { %2932 = vmatpush1.bf16.msk.msra.mxu0 %vm2931_vm5, %v5179_v11  ;;  %vm569_vm7 = vcmp.eq.f32.partialorder %v3576_v41, %v3765_v19  ;;  %vm573_vm8 = vcmp.eq.f32.partialorder %v3578_v21, %v3765_v19  ;;  %vm577_vm13 = vcmp.eq.f32.partialorder %v3580_v2, %v3765_v19  ;;  %vm581_vm14 = vcmp.eq.f32.partialorder %v3582_v22, %v3765_v19  ;;  %vm2937_vm1 = vmpackc.low %vm595_vm11, %vm591_vm10 }
 0x13b   :  { %2934 = vmatprep.subr.msk.bf16.mxu0 %vm2933_vm6, %v5179_v11  ;;  %vm2941_vm15 = vmpackc.low %vm573_vm8, %vm569_vm7  ;;  %vm594_vm5 = vcmp.eq.f32.partialorder %v3602_v39, %v3728_v14  ;;  %vm580_vm6 = vcmp.eq.f32.partialorder %v3582_v22, %v3744_v43  ;;  %vm589_vm10 = vcmp.eq.f32.partialorder %v3596_v15, %v3765_v19  ;;  %vm662_vm8 = vcmask 523264  }
 0x13c   :  { %2942 = vmatprep.subr.msk.bf16.mxu1 %vm2941_vm15, %v5179_v11  ;;  %vm2945_vm3 = vmpackc.low %vm581_vm14, %vm577_vm13  ;;  %vm584_vm13 = vcmp.eq.f32.partialorder %v3584_v4, %v3744_v43  ;;  %vm588_vm14 = vcmp.eq.f32.partialorder %v3596_v15, %v3744_v43  ;;  %vm593_vm15 = vcmp.eq.f32.partialorder %v3598_v36, %v3765_v19 }
 0x13d   :  { %2944 = vmatpush1.bf16.msk.msra.mxu1 %vm2943_vm12, %v5179_v11  ;;  %vm2939_vm11 = vmpackc.low %vm594_vm5, %vm590_vm2 }
 0x13e   :  { %2936 = vmatpush1.bf16.msk.msra.mxu0 %vm2935_vm9, %v5179_v11  ;;  %2946 = vmatprep.subr.msk.bf16.mxu1 %vm2945_vm3, %v5179_v11  ;;  %vm585_vm9 = vcmp.eq.f32.partialorder %v3584_v4, %v3765_v19  ;;  %vm2947_vm7 = vmpackc.low %vm580_vm6, %vm576_vm4  ;;  %vm592_vm3 = vcmp.eq.f32.partialorder %v3598_v36, %v3744_v43  ;;  %vm596_vm4 = vcmp.eq.f32.partialorder %v3602_v39, %v3744_v43 }
 0x13f   :  { %2938 = vmatprep.subr.msk.bf16.mxu0 %vm2937_vm1, %v5179_v11  ;;  %vm2949_vm12 = vmpackc.low %vm589_vm10, %vm585_vm9  ;;  %vm597_vm1 = vcmp.eq.f32.partialorder %v3602_v39, %v3765_v19 }
 0x140   :  { %vm2951_vm2 = vmpackc.low %vm588_vm14, %vm584_vm13 }
 0x141   :  { %2948 = vmatpush1.bf16.msk.msra.mxu1 %vm2947_vm7, %v5179_v11  ;;  %vm2953_vm5 = vmpackc.low %vm597_vm1, %vm593_vm15 }
 0x142   :  { %2940 = vmatpush1.bf16.msk.msra.mxu0 %vm2939_vm11, %v5179_v11  ;;  %2950 = vmatprep.subr.msk.bf16.mxu1 %vm2949_vm12, %v5179_v11  ;;  %vm2955_vm6 = vmpackc.low %vm596_vm4, %vm592_vm3 }
 0x145   :  { %2709 = vmatmul.mubr.msk.f32.vlgmr.msra.gmra.mrb[16].mxu0 %vm662_vm8, %v3802_v45  ;;  %2952 = vmatpush1.bf16.msk.msra.mxu1 %vm2951_vm2, %v5179_v11 }
 0x146   :  { %745 = vmatprep.mubr.f32.mxu0 %v5293_v59  ;;  %2954 = vmatprep.subr.msk.bf16.mxu1 %vm2953_vm5, %v5179_v11 }
 0x149   :  { %2710 = vmatmul.mubr.msk.f32.gmra.mrb[18].mxu0 %vm662_vm8, %v3820_v61  ;;  %2956 = vmatpush1.bf16.msk.msra.mxu1 %vm2955_vm6, %v5179_v11 }
 0x14a   :  { %751 = vmatprep.mubr.f32.mxu0 %v5293_v59 }
 0x14c   :  { %2729 = vmatmul.mubr.msk.f32.vlgmr.msra.gmra.mrb[16].mxu1 %vm662_vm8, %v3802_v45 }
 0x14d   :  { %2711 = vmatmul.mubr.msk.f32.gmra.mrb[20].mxu0 %vm662_vm8, %v3834_v16  ;;  %834 = vmatprep.mubr.f32.mxu1 %v5293_v59 }
 0x14e   :  { %757 = vmatprep.mubr.f32.mxu0 %v5293_v59 }
 0x150   :  { %2730 = vmatmul.mubr.msk.f32.gmra.mrb[18].mxu1 %vm662_vm8, %v3820_v61 }
 0x151   :  { %2712 = vmatmul.mubr.msk.f32.gmra.mrb[22].mxu0 %vm662_vm8, %v3845_v55  ;;  %840 = vmatprep.mubr.f32.mxu1 %v5293_v59 }
 0x152   :  { %1030 = vmatprep.mubr.f32.mxu0 %v5293_v59 }
 0x154   :  { %2731 = vmatmul.mubr.msk.f32.gmra.mrb[20].mxu1 %vm662_vm8, %v3834_v16 }
 0x155   :  { %846 = vmatprep.mubr.f32.mxu1 %v5293_v59 }
 0x158   :  { %2732 = vmatmul.mubr.msk.f32.gmra.mrb[22].mxu1 %vm662_vm8, %v3845_v55 }
 0x159   :  { %1143 = vmatprep.mubr.f32.mxu1 %v5293_v59 }
 0x218   :  { %v3860_v18 = vpop.f32.mrb[16].mxu0 }
 0x219   :  { %5297 = vst [vmem:[#allocation38_spill] sm:$0xff] %v3860_v18  ;;  %v3862_v44 = vpop.f32.mrb[17].mxu0  ;;  %v853_v29 = vsub.f32 %v3860_v18, %v3237_v5  ;;  %v3890_v54 = vsub.f32 %v3237_v5, %v3860_v18 }
 0x21a   :  { %5298 = vst [vmem:[#allocation39_spill] sm:$0xff] %v3862_v44  ;;  %v854_v40 = vsub.f32 %v3862_v44, %v3215_v0  ;;  %v3880_v63 = vsub.f32 %v3215_v0, %v3862_v44 }
 0x21b   :  { %v869_v3 = vmul.f32 %v853_v29, %v853_v29  ;;  %5304 = vst [vmem:[#allocation45_spill] sm:$0xff] %v3890_v54 }
 0x21c   :  { %v3868_v23 = vpop.f32.mrb[18].mxu0  ;;  %5302 = vst [vmem:[#allocation43_spill] sm:$0xff] %v3880_v63  ;;  %v870_v57 = vmul.f32 %v854_v40, %v854_v40 }
 0x21d   :  { %5299 = vst [vmem:[#allocation40_spill] sm:$0xff] %v3868_v23  ;;  %v857_v60 = vsub.f32 %v3868_v23, %v3242_v6  ;;  %v3874_v37 = vsub.f32 %v3242_v6, %v3868_v23  ;;  %v3876_v31 = vpop.f32.mrb[19].mxu0 }
 0x21e   :  { %5301 = vst [vmem:[#allocation42_spill] sm:$0xff] %v3876_v31  ;;  %v858_v49 = vsub.f32 %v3876_v31, %v3220_v1  ;;  %v3886_v35 = vsub.f32 %v3220_v1, %v3876_v31 }
 0x21f   :  { %5300 = vst [vmem:[#allocation41_spill] sm:$0xff] %v3874_v37  ;;  %v873_v6 = vmul.f32 %v857_v60, %v857_v60  ;;  %v3896_v56 = vpop.f32.mrb[16].mxu1  ;;  %v2959_v5 = vpack.c.bf16 %v3874_v37, %v3890_v54  ;;  %v5357_v54 = vld [vmem:[#allocation33_spill] sm:$0xff] }
 0x220   :  { %5303 = vst [vmem:[#allocation44_spill] sm:$0xff] %v3886_v35  ;;  %v874_v32 = vmul.f32 %v858_v49, %v858_v49  ;;  %v3892_v62 = vpop.f32.mrb[20].mxu0  ;;  %v2957_v0 = vpack.c.bf16 %v3886_v35, %v3880_v63  ;;  %5306 = vst [vmem:[#allocation47_spill] sm:$0xff] %v3896_v56  ;;  %v855_v24 = vsub.f32 %v3896_v56, %v3253_v10  ;;  %v3906_v34 = vpop.f32.mrb[17].mxu1  ;;  %v5322_v49 = vld [vmem:[#allocation12_spill] sm:$0xff] }
 0x221   :  { %5305 = vst [vmem:[#allocation46_spill] sm:$0xff] %v3892_v62  ;;  %v885_v27 = vadd.f32 %v873_v6, %v869_v3  ;;  %v861_v1 = vsub.f32 %v3892_v62, %v3289_v20  ;;  %v3900_v47 = vpop.f32.mrb[21].mxu0  ;;  %5308 = vst [vmem:[#allocation49_spill] sm:$0xff] %v3906_v34  ;;  %v3912_v50 = vsub.f32 %v3253_v10, %v3896_v56  ;;  %v5323_v6 = vld [vmem:[#allocation10_spill] sm:$0xff]  ;;  %v5356_v35 = vld [vmem:[#allocation32_spill] sm:$0xff] }
 0x222   :  { %5307 = vst [vmem:[#allocation48_spill] sm:$0xff] %v3900_v47  ;;  %v894_v53 = vadd.f32 %v874_v32, %v870_v57  ;;  %v862_v30 = vsub.f32 %v3900_v47, %v3263_v12  ;;  %2958 = vmatprep.subr.bf16.mxu0 %v2957_v0  ;;  %v3916_v52 = vsub.f32 %v3289_v20, %v3892_v62 }
 0x223   :  { %5309 = vst [vmem:[#allocation50_spill] sm:$0xff] %v3912_v50  ;;  %v877_v51 = vmul.f32 %v861_v1, %v861_v1  ;;  %2960 = vmatpush1.bf16.msra.mxu0 %v2959_v5  ;;  %v856_v46 = vsub.f32 %v3906_v34, %v5311_v9  ;;  %v3922_v8 = vsub.f32 %v5311_v9, %v3906_v34  ;;  %v3930_v58 = vpop.f32.mrb[18].mxu1 }
 0x224   :  { %5310 = vst [vmem:[#allocation51_spill] sm:$0xff] %v3916_v52  ;;  %v878_v28 = vmul.f32 %v862_v30, %v862_v30  ;;  %v3926_v7 = vsub.f32 %v3263_v12, %v3900_v47  ;;  %v3928_v10 = vpop.f32.mrb[22].mxu0  ;;  %v871_v13 = vmul.f32 %v855_v24, %v855_v24  ;;  %5315 = vst [vmem:[#allocation54_spill] sm:$0xff] %v3930_v58  ;;  %v3946_v40 = vpop.f32.mrb[19].mxu1 }
 0x225   :  { %5312 = vst [vmem:[#allocation9_spill] sm:$0xff] %v3922_v8  ;;  %5314 = vst [vmem:[#allocation53_spill] sm:$0xff] %v3928_v10  ;;  %v886_v20 = vadd.f32 %v885_v27, %v877_v51  ;;  %v865_v48 = vsub.f32 %v3928_v10, %v5316_v17  ;;  %v3936_v33 = vsub.f32 %v5316_v17, %v3928_v10  ;;  %v3938_v38 = vpop.f32.mrb[23].mxu0 }
 0x226   :  { %5313 = vst [vmem:[#allocation52_spill] sm:$0xff] %v3926_v7  ;;  %5318 = vst [vmem:[#allocation55_spill] sm:$0xff] %v3938_v38  ;;  %v859_v29 = vsub.f32 %v3930_v58, %v5319_v42  ;;  %v3944_v12 = vsub.f32 %v5319_v42, %v3930_v58  ;;  %v895_v60 = vadd.f32 %v894_v53, %v878_v28  ;;  %v5328_v42 = vld [vmem:[#allocation16_spill] sm:$0xff] }
 0x227   :  { %5317 = vst [vmem:[#allocation15_spill] sm:$0xff] %v3936_v33  ;;  %5321 = vst [vmem:[#allocation56_spill] sm:$0xff] %v3946_v40  ;;  %v866_v3 = vsub.f32 %v3938_v38, %v5322_v49  ;;  %v860_v57 = vsub.f32 %v3946_v40, %v5323_v6  ;;  %v3954_v32 = vsub.f32 %v5323_v6, %v3946_v40  ;;  %v3962_v51 = vpop.f32.mrb[20].mxu1 }
 0x228   :  { %5320 = vst [vmem:[#allocation11_spill] sm:$0xff] %v3944_v12  ;;  %v881_v0 = vmul.f32 %v865_v48, %v865_v48  ;;  %v3958_v27 = vsub.f32 %v5322_v49, %v3938_v38  ;;  %v872_v1 = vmul.f32 %v856_v46, %v856_v46  ;;  %v875_v5 = vmul.f32 %v859_v29, %v859_v29  ;;  %v3972_v29 = vpop.f32.mrb[21].mxu1 }
 0x229   :  { %5324 = vst [vmem:[#allocation12_spill] sm:$0xff] %v3954_v32  ;;  %v2967_v24 = vpack.c.bf16 %v3944_v12, %v3912_v50  ;;  %v882_v53 = vmul.f32 %v866_v3, %v866_v3  ;;  %v876_v30 = vmul.f32 %v860_v57, %v860_v57  ;;  %5326 = vst [vmem:[#allocation57_spill] sm:$0xff] %v3962_v51  ;;  %v5331_v57 = vld [vmem:[#allocation13_spill] sm:$0xff] }
 0x22a   :  { %5325 = vst [vmem:[#allocation10_spill] sm:$0xff] %v3958_v27  ;;  %v2965_v9 = vpack.c.bf16 %v3954_v32, %v3922_v8  ;;  %v3966_v28 = vadd.f32 %v886_v20, %v881_v0  ;;  %v2961_v17 = vpack.c.bf16 %v3958_v27, %v3926_v7  ;;  %v903_v48 = vadd.f32 %v875_v5, %v871_v13  ;;  %v5353_v8 = vld [vmem:[#allocation29_spill] sm:$0xff]  ;;  %v5355_v7 = vld [vmem:[#allocation31_spill] sm:$0xff] }
 0x22b   :  { %v863_v46 = vsub.f32 %v3962_v51, %v5328_v42  ;;  %5329 = vst [vmem:[#allocation16_spill] sm:$0xff] %v3972_v29  ;;  %v3974_v49 = vadd.f32 %v895_v60, %v882_v53  ;;  %v2963_v3 = vpack.c.bf16 %v3936_v33, %v3916_v52  ;;  %v912_v6 = vadd.f32 %v876_v30, %v872_v1  ;;  %v3980_v0 = vpop.f32.mrb[22].mxu1  ;;  %v5334_v53 = vld [vmem:[#allocation17_spill] sm:$0xff] }
 0x22c   :  { %5327 = vst [vmem:[#allocation58_spill] sm:$0xff] %v3966_v28  ;;  %v864_v11 = vsub.f32 %v3972_v29, %v5331_v57  ;;  %2966 = vmatprep.subr.bf16.mxu1 %v2965_v9  ;;  %2962 = vmatprep.subr.bf16.mxu0 %v2961_v17  ;;  %5332 = vst [vmem:[#allocation13_spill] sm:$0xff] %v3980_v0  ;;  %v3984_v60 = vsub.f32 %v5328_v42, %v3962_v51  ;;  %v3992_v30 = vpop.f32.mrb[23].mxu1  ;;  %v5340_v42 = vld [vmem:[#allocation18_spill] sm:$0xff] }
 0x22d   :  { %5330 = vst [vmem:[#allocation59_spill] sm:$0xff] %v3974_v49  ;;  %v879_v20 = vmul.f32 %v863_v46, %v863_v46  ;;  %2968 = vmatpush1.bf16.msra.mxu1 %v2967_v24  ;;  %2964 = vmatpush1.bf16.msra.mxu0 %v2963_v3  ;;  %v867_v40 = vsub.f32 %v3980_v0, %v5334_v53  ;;  %5336 = vst [vmem:[#allocation61_spill] sm:$0xff] %v3992_v30  ;;  %v5338_v24 = vld [vmem:[#allocation14_spill] sm:$0xff] }
 0x22e   :  { %v880_v13 = vmul.f32 %v864_v11, %v864_v11  ;;  %5333 = vst [vmem:[#allocation60_spill] sm:$0xff] %v3984_v60  ;;  %v3990_v1 = vsub.f32 %v5334_v53, %v3980_v0  ;;  %v3996_v11 = vsub.f32 %v5331_v57, %v3972_v29  ;;  %v868_v17 = vsub.f32 %v3992_v30, %v5338_v24  ;;  %v5343_v53 = vld [vmem:[#allocation19_spill] sm:$0xff] }
 0x22f   :  { %v904_v5 = vadd.f32 %v903_v48, %v879_v20  ;;  %v4002_v48 = vsub.f32 %v5338_v24, %v3992_v30  ;;  %v883_v46 = vmul.f32 %v867_v40, %v867_v40  ;;  %v5344_v40 = vld [vmem:[#allocation20_spill] sm:$0xff]  ;;  %v5347_v24 = vld [vmem:[#allocation23_spill] sm:$0xff] }
 0x230   :  { %5335 = vst [vmem:[#allocation17_spill] sm:$0xff] %v3990_v1  ;;  %v913_v9 = vadd.f32 %v912_v6, %v880_v13  ;;  %5337 = vst [vmem:[#allocation62_spill] sm:$0xff] %v3996_v11  ;;  %2733 = vmatmul.mubr.msk.f32.vlgmr.msra.gmra.mrb[24].mxu0 %vm5249_vm0, %v5340_v42  ;;  %v884_v3 = vmul.f32 %v868_v17, %v868_v17  ;;  %v2971_v57 = vpack.c.bf16 %v3990_v1, %v3984_v60  ;;  %v5348_v17 = vld [vmem:[#allocation24_spill] sm:$0xff] }
 0x231   :  { %5339 = vst [vmem:[#allocation14_spill] sm:$0xff] %v4002_v48  ;;  %1036 = vmatprep.mubr.f32.mxu0 %v5293_v59  ;;  %v2969_v6 = vpack.c.bf16 %v4002_v48, %v3996_v11  ;;  %v4009_v20 = vadd.f32 %v904_v5, %v883_v46  ;;  %v5345_v5 = vld [vmem:[#allocation21_spill] sm:$0xff]  ;;  %v5352_v1 = vld [vmem:[#allocation28_spill] sm:$0xff] }
 0x232   :  { %v4013_v13 = vadd.f32 %v913_v9, %v884_v3  ;;  %v5346_v9 = vld [vmem:[#allocation22_spill] sm:$0xff] }
 0x233   :  { %5341 = vst [vmem:[#allocation18_spill] sm:$0xff] %v4009_v20  ;;  %2970 = vmatprep.subr.bf16.mxu1 %v2969_v6 }
 0x234   :  { %5342 = vst [vmem:[#allocation63_spill] sm:$0xff] %v4013_v13  ;;  %2734 = vmatmul.mubr.msk.f32.gmra.mrb[26].mxu0 %vm5249_vm0, %v5343_v53  ;;  %2972 = vmatpush1.bf16.msra.mxu1 %v2971_v57  ;;  %v5350_v57 = vld [vmem:[#allocation26_spill] sm:$0xff] }
 0x235   :  { %1042 = vmatprep.mubr.f32.mxu0 %v5293_v59 }
 0x237   :  { %2741 = vmatmul.mubr.msk.f32.vlgmr.msra.gmra.mrb[24].mxu1 %vm5249_vm0, %v5340_v42  ;;  %v5349_v42 = vld [vmem:[#allocation25_spill] sm:$0xff] }
 0x238   :  { %2735 = vmatmul.mubr.msk.f32.gmra.mrb[28].mxu0 %vm5249_vm0, %v5344_v40  ;;  %1149 = vmatprep.mubr.f32.mxu1 %v5293_v59 }
 0x239   :  { %1048 = vmatprep.mubr.f32.mxu0 %v5293_v59 }
 0x23b   :  { %2742 = vmatmul.mubr.msk.f32.gmra.mrb[26].mxu1 %vm5249_vm0, %v5343_v53 }
 0x23c   :  { %2736 = vmatmul.mubr.msk.f32.gmra.mrb[30].mxu0 %vm5249_vm0, %v5345_v5  ;;  %1155 = vmatprep.mubr.f32.mxu1 %v5293_v59 }
 0x23d   :  { %1054 = vmatprep.mubr.f32.mxu0 %v5293_v59 }
 0x23f   :  { %2743 = vmatmul.mubr.msk.f32.gmra.mrb[28].mxu1 %vm5249_vm0, %v5344_v40  ;;  %v5351_v40 = vld [vmem:[#allocation27_spill] sm:$0xff] }
 0x240   :  { %2737 = vmatmul.mubr.msk.f32.gmra.mrb[32].mxu0 %vm5249_vm0, %v5346_v9  ;;  %1161 = vmatprep.mubr.f32.mxu1 %v5293_v59 }
 0x241   :  { %1060 = vmatprep.mubr.f32.mxu0 %v5293_v59 }
 0x243   :  { %2744 = vmatmul.mubr.msk.f32.gmra.mrb[30].mxu1 %vm5249_vm0, %v5345_v5 }
 0x244   :  { %2738 = vmatmul.mubr.msk.f32.gmra.mrb[34].mxu0 %vm5249_vm0, %v5347_v24  ;;  %1167 = vmatprep.mubr.f32.mxu1 %v5293_v59 }
 0x245   :  { %1066 = vmatprep.mubr.f32.mxu0 %v5293_v59 }
 0x247   :  { %2745 = vmatmul.mubr.msk.f32.gmra.mrb[32].mxu1 %vm5249_vm0, %v5346_v9 }
 0x248   :  { %2739 = vmatmul.mubr.msk.f32.gmra.mrb[36].mxu0 %vm5249_vm0, %v5348_v17  ;;  %1173 = vmatprep.mubr.f32.mxu1 %v5293_v59 }
 0x249   :  { %1072 = vmatprep.mubr.f32.mxu0 %v5293_v59 }
 0x24b   :  { %2746 = vmatmul.mubr.msk.f32.gmra.mrb[34].mxu1 %vm5249_vm0, %v5347_v24 }
 0x24c   :  { %2740 = vmatmul.mubr.msk.f32.gmra.mrb[38].mxu0 %vm5249_vm0, %v5349_v42  ;;  %1179 = vmatprep.mubr.f32.mxu1 %v5293_v59 }
 0x24d   :  { %1552 = vmatprep.mubr.f32.mxu0 %v5293_v59 }
 0x24f   :  { %2747 = vmatmul.mubr.msk.f32.gmra.mrb[36].mxu1 %vm5249_vm0, %v5348_v17 }
 0x250   :  { %1185 = vmatprep.mubr.f32.mxu1 %v5293_v59 }
 0x253   :  { %2748 = vmatmul.mubr.msk.f32.gmra.mrb[38].mxu1 %vm5249_vm0, %v5349_v42 }
 0x254   :  { %1641 = vmatprep.mubr.f32.mxu1 %v5293_v59 }
 0x303   :  { %v1032_v46 = vpop.f32.mrb[24].mxu0 }
 0x304   :  { %v1034_v3 = vpop.f32.mrb[25].mxu0  ;;  %v4061_v53 = vsub.f32 %v5350_v57, %v1032_v46 }
 0x305   :  { %v4067_v24 = vsub.f32 %v5350_v57, %v1034_v3 }
 0x307   :  { %v1038_v6 = vpop.f32.mrb[26].mxu0 }
 0x308   :  { %v4064_v5 = vsub.f32 %v5351_v40, %v1038_v6  ;;  %v1040_v9 = vpop.f32.mrb[27].mxu0 }
 0x309   :  { %v4070_v17 = vsub.f32 %v5351_v40, %v1040_v9 }
 0x30a   :  { %v1224_v42 = vmin.f32 %v4061_v53, %v4064_v5  ;;  %v1145_v30 = vpop.f32.mrb[24].mxu1 }
 0x30b   :  { %v1237_v48 = vmin.f32 %v4067_v24, %v4070_v17  ;;  %v1044_v0 = vpop.f32.mrb[28].mxu0  ;;  %v1147_v46 = vpop.f32.mrb[25].mxu1  ;;  %v4085_v32 = vsub.f32 %v5350_v57, %v1145_v30 }
 0x30c   :  { %v4077_v29 = vsub.f32 %v5352_v1, %v1044_v0  ;;  %v1046_v6 = vpop.f32.mrb[29].mxu0 }
 0x30d   :  { %v4080_v11 = vsub.f32 %v5352_v1, %v1046_v6  ;;  %v4094_v6 = vsub.f32 %v5350_v57, %v1147_v46 }
 0x30e   :  { %v1225_v3 = vmin.f32 %v1224_v42, %v4077_v29  ;;  %v1151_v9 = vpop.f32.mrb[26].mxu1 }
 0x30f   :  { %v1238_v51 = vmin.f32 %v1237_v48, %v4080_v11  ;;  %v1050_v60 = vpop.f32.mrb[30].mxu0  ;;  %v4088_v58 = vsub.f32 %v5351_v40, %v1151_v9  ;;  %v1153_v12 = vpop.f32.mrb[27].mxu1 }
 0x310   :  { %v4091_v0 = vsub.f32 %v5353_v8, %v1050_v60  ;;  %v1052_v50 = vpop.f32.mrb[31].mxu0  ;;  %v4097_v42 = vsub.f32 %v5351_v40, %v1153_v12  ;;  %v5354_v40 = vld [vmem:[#allocation30_spill] sm:$0xff] }
 0x311   :  { %v4100_v48 = vsub.f32 %v5353_v8, %v1052_v50  ;;  %v1250_v30 = vmin.f32 %v4085_v32, %v4088_v58 }
 0x312   :  { %v1226_v9 = vmin.f32 %v1225_v3, %v4091_v0  ;;  %v1263_v34 = vmin.f32 %v4094_v6, %v4097_v42  ;;  %v1157_v60 = vpop.f32.mrb[28].mxu1 }
 0x313   :  { %v1239_v56 = vmin.f32 %v1238_v51, %v4100_v48  ;;  %v1056_v38 = vpop.f32.mrb[32].mxu0  ;;  %v4109_v46 = vsub.f32 %v5352_v1, %v1157_v60  ;;  %v1159_v12 = vpop.f32.mrb[29].mxu1 }
 0x314   :  { %v4112_v57 = vsub.f32 %v5354_v40, %v1056_v38  ;;  %v1058_v50 = vpop.f32.mrb[33].mxu0  ;;  %v4115_v27 = vsub.f32 %v5352_v1, %v1159_v12 }
 0x315   :  { %v4118_v3 = vsub.f32 %v5354_v40, %v1058_v50  ;;  %v1251_v10 = vmin.f32 %v1250_v30, %v4109_v46 }
 0x316   :  { %v1227_v33 = vmin.f32 %v1226_v9, %v4112_v57  ;;  %v1264_v51 = vmin.f32 %v1263_v34, %v4115_v27  ;;  %v1163_v13 = vpop.f32.mrb[30].mxu1 }
 0x317   :  { %v1240_v60 = vmin.f32 %v1239_v56, %v4118_v3  ;;  %v1062_v20 = vpop.f32.mrb[34].mxu0  ;;  %v4125_v38 = vsub.f32 %v5353_v8, %v1163_v13  ;;  %v1165_v47 = vpop.f32.mrb[31].mxu1 }
 0x318   :  { %v4128_v12 = vsub.f32 %v5355_v7, %v1062_v20  ;;  %v1064_v1 = vpop.f32.mrb[35].mxu0  ;;  %v4131_v50 = vsub.f32 %v5353_v8, %v1165_v47 }
 0x319   :  { %v4134_v30 = vsub.f32 %v5355_v7, %v1064_v1  ;;  %v1252_v34 = vmin.f32 %v1251_v10, %v4125_v38 }
 0x31a   :  { %v1228_v9 = vmin.f32 %v1227_v33, %v4128_v12  ;;  %v1265_v56 = vmin.f32 %v1264_v51, %v4131_v50  ;;  %v1169_v62 = vpop.f32.mrb[32].mxu1 }
 0x31b   :  { %v1241_v13 = vmin.f32 %v1240_v60, %v4134_v30  ;;  %v1068_v52 = vpop.f32.mrb[36].mxu0  ;;  %v4141_v20 = vsub.f32 %v5354_v40, %v1169_v62  ;;  %v1171_v31 = vpop.f32.mrb[33].mxu1 }
 0x31c   :  { %v4144_v47 = vsub.f32 %v5356_v35, %v1068_v52  ;;  %v1070_v8 = vpop.f32.mrb[37].mxu0  ;;  %v4147_v1 = vsub.f32 %v5354_v40, %v1171_v31 }
 0x31d   :  { %v4150_v10 = vsub.f32 %v5356_v35, %v1070_v8  ;;  %v1253_v33 = vmin.f32 %v1252_v34, %v4141_v20 }
 0x31e   :  { %v1229_v51 = vmin.f32 %v1228_v9, %v4144_v47  ;;  %v1266_v60 = vmin.f32 %v1265_v56, %v4147_v1  ;;  %v1175_v23 = vpop.f32.mrb[34].mxu1 }
 0x31f   :  { %v1242_v62 = vmin.f32 %v1241_v13, %v4150_v10  ;;  %v1074_v37 = vpop.f32.mrb[38].mxu0  ;;  %v4157_v52 = vsub.f32 %v5355_v7, %v1175_v23  ;;  %v1177_v63 = vpop.f32.mrb[35].mxu1 }
 0x320   :  { %v4160_v31 = vsub.f32 %v5357_v54, %v1074_v37  ;;  %v1076_v40 = vpop.f32.mrb[39].mxu0  ;;  %v4163_v8 = vsub.f32 %v5355_v7, %v1177_v63 }
 0x321   :  { %v4166_v34 = vsub.f32 %v5357_v54, %v1076_v40  ;;  %v1254_v9 = vmin.f32 %v1253_v33, %v4157_v52 }
 0x322   :  { %v1230_v56 = vmin.f32 %v1229_v51, %v4160_v31  ;;  %v1267_v13 = vmin.f32 %v1266_v60, %v4163_v8  ;;  %v1181_v49 = vpop.f32.mrb[36].mxu1 }
 0x323   :  { %v1243_v23 = vmin.f32 %v1242_v62, %v4166_v34  ;;  %v4173_v44 = vsub.f32 %v5356_v35, %v1181_v49  ;;  %v1183_v37 = vpop.f32.mrb[37].mxu1 }
 0x324   :  { %v1231_v18 = vrot.slane %v1230_v56, 4  ;;  %v4176_v63 = vsub.f32 %v5356_v35, %v1183_v37 }
 0x325   :  { %v1244_v7 = vrot.slane %v1243_v23, 4  ;;  %v1255_v40 = vmin.f32 %v1254_v9, %v4173_v44 }
 0x326   :  { %v1232_v28 = vmin.f32 %v1230_v56, %v1231_v18  ;;  %v1268_v33 = vmin.f32 %v1267_v13, %v4176_v63  ;;  %v1187_v51 = vpop.f32.mrb[38].mxu1 }
 0x327   :  { %v1245_v55 = vmin.f32 %v1243_v23, %v1244_v7  ;;  %v4181_v16 = vsub.f32 %v5357_v54, %v1187_v51  ;;  %v1189_v62 = vpop.f32.mrb[39].mxu1 }
 0x328   :  { %v1233_v60 = vrot.slane %v1232_v28, 2  ;;  %v4184_v61 = vsub.f32 %v5357_v54, %v1189_v62 }
 0x329   :  { %v1246_v49 = vrot.slane %v1245_v55, 2  ;;  %v1256_v37 = vmin.f32 %v1255_v40, %v4181_v16 }
 0x32a   :  { %v1234_v59 = vmin.f32 %v1232_v28, %v1233_v60  ;;  %v1269_v9 = vmin.f32 %v1268_v33, %v4184_v61 }
 0x32b   :  { %v1247_v35 = vmin.f32 %v1245_v55, %v1246_v49  ;;  %v1257_v56 = vrot.slane %v1256_v37, 4 }
 0x32c   :  { %v1235_v18 = vrot.slane %v1234_v59, 1  ;;  %v1270_v51 = vrot.slane %v1269_v9, 4 }
 0x32d   :  { %v1248_v13 = vrot.slane %v1247_v35, 1  ;;  %v1258_v7 = vmin.f32 %v1256_v37, %v1257_v56 }
 0x32e   :  { %v1236_v45 = vmin.f32 %v1234_v59, %v1235_v18  ;;  %v1271_v28 = vmin.f32 %v1269_v9, %v1270_v51 }
 0x32f   :  { %v4188_v23 = vmin.f32 %v1247_v35, %v1248_v13 }
 0x330   :  { %vm1276_vm9 = vcmp.eq.f32.partialorder %v4061_v53, %v1236_v45  ;;  %vm1280_vm10 = vcmp.eq.f32.partialorder %v4064_v5, %v1236_v45  ;;  %vm1284_vm11 = vcmp.eq.f32.partialorder %v4077_v29, %v1236_v45  ;;  %vm1288_vm7 = vcmp.eq.f32.partialorder %v4091_v0, %v1236_v45 }
 0x331   :  { %vm1292_vm12 = vcmp.eq.f32.partialorder %v4112_v57, %v1236_v45  ;;  %vm1296_vm13 = vcmp.eq.f32.partialorder %v4128_v12, %v1236_v45  ;;  %vm1300_vm14 = vcmp.eq.f32.partialorder %v4144_v47, %v1236_v45  ;;  %vm1304_vm15 = vcmp.eq.f32.partialorder %v4160_v31, %v1236_v45 }
 0x332   :  { %v1308_v59 = vsel %vm1276_vm9, %v3576_v41, 64.0  ;;  %v1312_v55 = vsel %vm1280_vm10, %v3578_v21, 64.0  ;;  %v1316_v35 = vsel %vm1284_vm11, %v3580_v2, 64.0  ;;  %v1259_v5 = vrot.slane %v1258_v7, 2 }
 0x333   :  { %v1340_v53 = vmin.f32 %v1308_v59, %v1312_v55  ;;  %vm1277_vm1 = vcmp.eq.f32.partialorder %v4067_v24, %v4188_v23  ;;  %vm1281_vm2 = vcmp.eq.f32.partialorder %v4070_v17, %v4188_v23  ;;  %vm1285_vm5 = vcmp.eq.f32.partialorder %v4080_v11, %v4188_v23 }
 0x334   :  { %vm1289_vm3 = vcmp.eq.f32.partialorder %v4100_v48, %v4188_v23  ;;  %vm1293_vm4 = vcmp.eq.f32.partialorder %v4118_v3, %v4188_v23  ;;  %vm1297_vm6 = vcmp.eq.f32.partialorder %v4134_v30, %v4188_v23  ;;  %v1260_v40 = vmin.f32 %v1258_v7, %v1259_v5 }
 0x335   :  { %v1341_v29 = vmin.f32 %v1340_v53, %v1316_v35  ;;  %vm1301_vm9 = vcmp.eq.f32.partialorder %v4150_v10, %v4188_v23  ;;  %vm1305_vm10 = vcmp.eq.f32.partialorder %v4166_v34, %v4188_v23  ;;  %v1320_v24 = vsel %vm1288_vm7, %v3582_v22, 64.0 }
 0x336   :  { %v1309_v17 = vsel %vm1277_vm1, %v3576_v41, 64.0  ;;  %v1313_v33 = vsel %vm1281_vm2, %v3578_v21, 64.0  ;;  %v1261_v62 = vrot.slane %v1260_v40, 1  ;;  %v1324_v49 = vsel %vm1292_vm12, %v3584_v4, 64.0 }
 0x337   :  { %v1342_v60 = vmin.f32 %v1341_v29, %v1320_v24  ;;  %v1353_v37 = vmin.f32 %v1309_v17, %v1313_v33  ;;  %v1272_v9 = vrot.slane %v1271_v28, 2  ;;  %v1317_v0 = vsel %vm1285_vm5, %v3580_v2, 64.0 }
 0x338   :  { %v1262_v56 = vmin.f32 %v1260_v40, %v1261_v62  ;;  %v1328_v13 = vsel %vm1296_vm13, %v3596_v15, 64.0  ;;  %v1332_v7 = vsel %vm1300_vm14, %v3598_v36, 64.0  ;;  %v1321_v55 = vsel %vm1289_vm3, %v3582_v22, 64.0 }
 0x339   :  { %v1343_v18 = vmin.f32 %v1342_v60, %v1324_v49  ;;  %v1354_v51 = vmin.f32 %v1353_v37, %v1317_v0  ;;  %v1273_v57 = vmin.f32 %v1271_v28, %v1272_v9  ;;  %v1325_v28 = vsel %vm1293_vm4, %v3584_v4, 64.0 }
 0x33a   :  { %vm1278_vm11 = vcmp.eq.f32.partialorder %v4085_v32, %v1262_v56  ;;  %vm1282_vm7 = vcmp.eq.f32.partialorder %v4088_v58, %v1262_v56  ;;  %vm1286_vm12 = vcmp.eq.f32.partialorder %v4109_v46, %v1262_v56  ;;  %vm1290_vm1 = vcmp.eq.f32.partialorder %v4125_v38, %v1262_v56 }
 0x33b   :  { %v1344_v59 = vmin.f32 %v1343_v18, %v1328_v13  ;;  %vm1294_vm2 = vcmp.eq.f32.partialorder %v4141_v20, %v1262_v56  ;;  %vm1298_vm5 = vcmp.eq.f32.partialorder %v4157_v52, %v1262_v56  ;;  %vm1302_vm13 = vcmp.eq.f32.partialorder %v4173_v44, %v1262_v56 }
 0x33c   :  { %vm1306_vm14 = vcmp.eq.f32.partialorder %v4181_v16, %v1262_v56  ;;  %v1310_v12 = vsel %vm1278_vm11, %v3576_v41, 64.0  ;;  %v1314_v47 = vsel %vm1282_vm7, %v3578_v21, 64.0  ;;  %v1336_v58 = vsel %vm1304_vm15, %v3602_v39, 64.0 }
 0x33d   :  { %v1345_v11 = vmin.f32 %v1344_v59, %v1332_v7  ;;  %v1366_v46 = vmin.f32 %v1310_v12, %v1314_v47  ;;  %v1318_v35 = vsel %vm1286_vm12, %v3580_v2, 64.0  ;;  %v1355_v53 = vmin.f32 %v1354_v51, %v1321_v55 }
 0x33e   :  { %v1274_v5 = vrot.slane %v1273_v57, 1  ;;  %v1329_v45 = vsel %vm1297_vm6, %v3596_v15, 64.0  ;;  %v1333_v48 = vsel %vm1301_vm9, %v3598_v36, 64.0  ;;  %v1322_v31 = vsel %vm1290_vm1, %v3582_v22, 64.0 }
 0x33f   :  { %v1346_v32 = vmin.f32 %v1345_v11, %v1336_v58  ;;  %v1367_v40 = vmin.f32 %v1366_v46, %v1318_v35  ;;  %v1337_v3 = vsel %vm1305_vm10, %v3602_v39, 64.0  ;;  %v1356_v24 = vmin.f32 %v1355_v53, %v1325_v28 }
 0x340   :  { %v1275_v17 = vmin.f32 %v1273_v57, %v1274_v5  ;;  %v1326_v30 = vsel %vm1294_vm2, %v3584_v4, 64.0  ;;  %v1330_v10 = vsel %vm1298_vm5, %v3596_v15, 64.0  ;;  %v1334_v49 = vsel %vm1302_vm13, %v3598_v36, 64.0 }
 0x341   :  { %v1347_v29 = vrot.slane %v1346_v32, 4  ;;  %v1368_v60 = vmin.f32 %v1367_v40, %v1322_v31  ;;  %v1357_v62 = vmin.f32 %v1356_v24, %v1329_v45  ;;  %v1338_v0 = vsel %vm1306_vm14, %v3602_v39, 64.0 }
 0x342   :  { %vm1279_vm15 = vcmp.eq.f32.partialorder %v4094_v6, %v1275_v17  ;;  %vm1283_vm3 = vcmp.eq.f32.partialorder %v4097_v42, %v1275_v17  ;;  %vm1287_vm4 = vcmp.eq.f32.partialorder %v4115_v27, %v1275_v17  ;;  %vm1291_vm6 = vcmp.eq.f32.partialorder %v4131_v50, %v1275_v17 }
 0x343   :  { %v1348_v33 = vmin.f32 %v1346_v32, %v1347_v29  ;;  %v1369_v34 = vmin.f32 %v1368_v60, %v1326_v30  ;;  %vm1295_vm9 = vcmp.eq.f32.partialorder %v4147_v1, %v1275_v17  ;;  %v1358_v20 = vmin.f32 %v1357_v62, %v1333_v48 }
 0x344   :  { %vm1299_vm10 = vcmp.eq.f32.partialorder %v4163_v8, %v1275_v17  ;;  %vm1303_vm11 = vcmp.eq.f32.partialorder %v4176_v63, %v1275_v17  ;;  %vm1307_vm7 = vcmp.eq.f32.partialorder %v4184_v61, %v1275_v17  ;;  %v1311_v6 = vsel %vm1279_vm15, %v3576_v41, 64.0 }
 0x345   :  { %v1349_v38 = vrot.slane %v1348_v33, 2  ;;  %v1370_v23 = vmin.f32 %v1369_v34, %v1330_v10  ;;  %v1315_v42 = vsel %vm1283_vm3, %v3578_v21, 64.0  ;;  %v1359_v37 = vmin.f32 %v1358_v20, %v1337_v3 }
 0x346   :  { %v1379_v7 = vmin.f32 %v1311_v6, %v1315_v42  ;;  %v1319_v57 = vsel %vm1287_vm4, %v3580_v2, 64.0  ;;  %v3053_v59 = vtrunc.f32 %v3728_v14  ;;  %v1323_v58 = vsel %vm1291_vm6, %v3582_v22, 64.0 }
 0x347   :  { %v1350_v52 = vmin.f32 %v1348_v33, %v1349_v38  ;;  %v1371_v18 = vmin.f32 %v1370_v23, %v1334_v49  ;;  %v1360_v13 = vrot.slane %v1359_v37, 4  ;;  %v1327_v46 = vsel %vm1295_vm9, %v3584_v4, 64.0 }
 0x348   :  { %v1380_v12 = vmin.f32 %v1379_v7, %v1319_v57  ;;  %v3054_v27 = vcvt.f32.s32 %v3053_v59  ;;  %vm921_vm12 = vcmp.eq.s32.totalorder %v3566_v26, 0  ;;  %v1331_v50 = vsel %vm1299_vm10, %v3596_v15, 64.0  ;;  %v5359_v7 = vld [vmem:[#allocation34_spill] sm:$0xff] }
 0x349   :  { %v1351_v9 = vrot.slane %v1350_v52, 1  ;;  %v1372_v51 = vmin.f32 %v1371_v18, %v1338_v0  ;;  %v1361_v44 = vmin.f32 %v1359_v37, %v1360_v13  ;;  %vm5250_vm1 = vcmp.eq.s32.totalorder %v3566_v26, 1 }
 0x34a   :  { %v1381_v56 = vmin.f32 %v1380_v12, %v1323_v58  ;;  %v1335_v1 = vsel %vm1303_vm11, %v3598_v36, 64.0  ;;  %v3057_v45 = vtrunc.f32 %v3744_v43  ;;  %v930_v48 = vsel %vm921_vm12, %v3054_v27, 0  ;;  %v5364_v12 = vld [vmem:[#allocation36_spill] sm:$0xff]  ;;  %v5366_v58 = vld [vmem:[#allocation58_spill] sm:$0xff] }
 0x34b   :  { %v4298_v11 = vmin.f32 %v1350_v52, %v1351_v9  ;;  %v1373_v47 = vrot.slane %v1372_v51, 4  ;;  %v1362_v16 = vrot.slane %v1361_v44, 2  ;;  %v3055_v8 = vtrunc.f32 %v3730_v25 }
 0x34c   :  { %v1382_v35 = vmin.f32 %v1381_v56, %v1327_v46  ;;  %v1339_v30 = vsel %vm1307_vm7, %v3602_v39, 64.0  ;;  %v5358_v63 = vmov 1.0|1.0   ;;  %v3058_v62 = vcvt.f32.s32 %v3057_v45  ;;  %v5374_v45 = vld [vmem:[#allocation41_spill] sm:$0xff] }
 0x34d   :  { %v1374_v32 = vmin.f32 %v1372_v51, %v1373_v47  ;;  %v1363_v55 = vmin.f32 %v1361_v44, %v1362_v16  ;;  %v3061_v14 = vtrunc.f32 %v4298_v11  ;;  %vm1392_vm2 = vcmp.eq.f32.partialorder %v3576_v41, %v4298_v11  ;;  %v5363_v44 = vld [vmem:[#allocation35_spill] sm:$0xff]  ;;  %v5365_v47 = vld [vmem:[#allocation37_spill] sm:$0xff] }
 0x34e   :  { %v1383_v5 = vmin.f32 %v1382_v35, %v1331_v50  ;;  %vm1396_vm5 = vcmp.eq.f32.partialorder %v3578_v21, %v4298_v11  ;;  %v3056_v17 = vcvt.f32.s32 %v3055_v8  ;;  %vm1400_vm10 = vcmp.eq.f32.partialorder %v3580_v2, %v4298_v11  ;;  %v5372_v50 = vld [vmem:[#allocation45_spill] sm:$0xff] }
 0x34f   :  { %v1375_v28 = vrot.slane %v1374_v32, 2  ;;  %v1364_v53 = vrot.slane %v1363_v55, 1  ;;  %v3062_v29 = vcvt.f32.s32 %v3061_v14  ;;  %vm2975_vm6 = vmpackc.low %vm1396_vm5, %vm1392_vm2  ;;  %vm1404_vm11 = vcmp.eq.f32.partialorder %v3582_v22, %v4298_v11  ;;  %v5371_v14 = vld [vmem:[#allocation59_spill] sm:$0xff] }
 0x350   :  { %v1384_v3 = vmin.f32 %v1383_v5, %v1335_v1  ;;  %vm2979_vm2 = vmpackc.low %vm1404_vm11, %vm1400_vm10  ;;  %v931_v52 = vsel %vm921_vm12, %v3056_v17, 0  ;;  %v932_v49 = vsel %vm921_vm12, %v3058_v62, 0  ;;  %vm1416_vm10 = vcmp.eq.f32.partialorder %v3598_v36, %v4298_v11 }
 0x351   :  { %v1376_v40 = vmin.f32 %v1374_v32, %v1375_v28  ;;  %v1365_v31 = vmin.f32 %v1363_v55, %v1364_v53  ;;  %v4321_v24 = vsel %vm5250_vm1, %v3062_v29, %v930_v48  ;;  %vm1420_vm11 = vcmp.eq.f32.partialorder %v3602_v39, %v4298_v11  ;;  %v5367_v32 = vld [vmem:[#allocation38_spill] sm:$0xff]  ;;  %v5369_v55 = vld [vmem:[#allocation39_spill] sm:$0xff] }
 0x352   :  { %v1385_v43 = vmin.f32 %v1384_v3, %v1339_v30  ;;  %v3059_v18 = vtrunc.f32 %v3765_v19  ;;  %v5360_v57 = vmov 0.0   ;;  %v888_v16 = vrot.slane %v5366_v58, 4  ;;  %v5373_v29 = vld [vmem:[#allocation43_spill] sm:$0xff] }
 0x353   :  { %v1377_v33 = vrot.slane %v1376_v40, 1  ;;  %vm1393_vm13 = vcmp.eq.f32.partialorder %v3576_v41, %v1365_v31  ;;  %vm1397_vm14 = vcmp.eq.f32.partialorder %v3578_v21, %v1365_v31  ;;  %vm1401_vm15 = vcmp.eq.f32.partialorder %v3580_v2, %v1365_v31 }
 0x354   :  { %vm2973_vm3 = vmpackc.low %vm1397_vm14, %vm1393_vm13  ;;  %vm1405_vm4 = vcmp.eq.f32.partialorder %v3582_v22, %v1365_v31  ;;  %v1386_v61 = vrot.slane %v1385_v43, 4  ;;  %v3063_v10 = vtrunc.f32 %v1365_v31  ;;  %vm1409_vm7 = vcmp.eq.f32.partialorder %v3584_v4, %v1365_v31 }
 0x355   :  { %v4333_v25 = vmin.f32 %v1376_v40, %v1377_v33  ;;  %2974 = vmatprep.subr.msk.bf16.mxu0 %vm2973_vm3, %v5358_v63  ;;  %vm2977_vm9 = vmpackc.low %vm1405_vm4, %vm1401_vm15  ;;  %vm1413_vm13 = vcmp.eq.f32.partialorder %v3596_v15, %v1365_v31  ;;  %vm1408_vm14 = vcmp.eq.f32.partialorder %v3584_v4, %v4298_v11  ;;  %vm1412_vm15 = vcmp.eq.f32.partialorder %v3596_v15, %v4298_v11 }
 0x356   :  { %2976 = vmatpush1.bf16.msk.msra.mxu0 %vm2975_vm6, %v5358_v63  ;;  %v1387_v60 = vmin.f32 %v1385_v43, %v1386_v61  ;;  %v3064_v38 = vcvt.f32.s32 %v3063_v10  ;;  %vm2981_vm5 = vmpackc.low %vm1413_vm13, %vm1409_vm7  ;;  %vm1417_vm3 = vcmp.eq.f32.partialorder %v3598_v36, %v1365_v31  ;;  %vm1421_vm4 = vcmp.eq.f32.partialorder %v3602_v39, %v1365_v31  ;;  %v5375_v31 = vld [vmem:[#allocation40_spill] sm:$0xff]  ;;  %v5380_v61 = vld [vmem:[#allocation42_spill] sm:$0xff] }
 0x357   :  { %2978 = vmatprep.subr.msk.bf16.mxu0 %vm2977_vm9, %v5358_v63  ;;  %v3065_v34 = vtrunc.f32 %v4333_v25  ;;  %vm2983_vm6 = vmpackc.low %vm1412_vm15, %vm1408_vm14  ;;  %vm1394_vm7 = vcmp.eq.f32.partialorder %v3576_v41, %v4333_v25  ;;  %vm1398_vm13 = vcmp.eq.f32.partialorder %v3578_v21, %v4333_v25  ;;  %v3060_v19 = vcvt.f32.s32 %v3059_v18  ;;  %v5379_v43 = vld [vmem:[#allocation44_spill] sm:$0xff] }
 0x358   :  { %v1388_v20 = vrot.slane %v1387_v60, 2  ;;  %v4355_v6 = vsel %vm5250_vm1, %v3064_v38, %v931_v52  ;;  %vm2985_vm9 = vmpackc.low %vm1421_vm4, %vm1417_vm3  ;;  %vm1402_vm0 = vcmp.eq.f32.partialorder %v3580_v2, %v4333_v25  ;;  %v897_v28 = vrot.slane %v5371_v14, 4 }
 0x359   :  { %v3066_v23 = vcvt.f32.s32 %v3065_v34  ;;  %vm2987_vm3 = vmpackc.low %vm1420_vm11, %vm1416_vm10  ;;  %v933_v59 = vsel %vm921_vm12, %v3060_v19, 0  ;;  %v889_v5 = vadd.f32 %v888_v16, %v5366_v58 }
 0x35a   :  { %2980 = vmatpush1.bf16.msk.msra.mxu0 %vm2979_vm2, %v5358_v63  ;;  %v1389_v42 = vmin.f32 %v1387_v60, %v1388_v20  ;;  %v898_v60 = vadd.f32 %v897_v28, %v5371_v14  ;;  %v5391_v14 = vld [vmem:[#allocation63_spill] sm:$0xff] }
 0x35b   :  { %2982 = vmatprep.subr.msk.bf16.mxu0 %vm2981_vm5, %v5358_v63  ;;  %v4364_v37 = vsel %vm5250_vm1, %v3066_v23, %v932_v49  ;;  %vm1406_vm1 = vcmp.eq.f32.partialorder %v3582_v22, %v4333_v25  ;;  %v890_v20 = vrot.slane %v889_v5, 2  ;;  %v915_v28 = vrot.slane %v5391_v14, 4 }
 0x35c   :  { %v1390_v9 = vrot.slane %v1389_v42, 1  ;;  %v899_v16 = vrot.slane %v898_v60, 2 }
 0x35e   :  { %2984 = vmatpush1.bf16.msk.msra.mxu0 %vm2983_vm6, %v5358_v63  ;;  %v1391_v0 = vmin.f32 %v1389_v42, %v1390_v9  ;;  %vm2991_vm6 = vmpackc.low %vm1398_vm13, %vm1394_vm7  ;;  %vm5361_vm13 = vcmp.eq.s32.totalorder %v3566_v26, 1 }
 0x35f   :  { %2986 = vmatprep.subr.msk.bf16.mxu0 %vm2985_vm9, %v5358_v63  ;;  %vm2995_vm7 = vmpackc.low %vm1406_vm1, %vm1402_vm0 }
 0x360   :  { %vm1395_vm2 = vcmp.eq.f32.partialorder %v3576_v41, %v1391_v0  ;;  %vm1399_vm5 = vcmp.eq.f32.partialorder %v3578_v21, %v1391_v0  ;;  %vm1403_vm14 = vcmp.eq.f32.partialorder %v3580_v2, %v1391_v0  ;;  %vm1407_vm15 = vcmp.eq.f32.partialorder %v3582_v22, %v1391_v0 }
 0x361   :  { %vm2989_vm4 = vmpackc.low %vm1399_vm5, %vm1395_vm2  ;;  %v3067_v13 = vtrunc.f32 %v1391_v0  ;;  %vm1411_vm10 = vcmp.eq.f32.partialorder %v3584_v4, %v1391_v0  ;;  %vm1415_vm11 = vcmp.eq.f32.partialorder %v3596_v15, %v1391_v0  ;;  %vm1410_vm5 = vcmp.eq.f32.partialorder %v3584_v4, %v4333_v25 }
 0x362   :  { %2988 = vmatpush1.bf16.msk.msra.mxu0 %vm2987_vm3, %v5358_v63  ;;  %2990 = vmatprep.subr.msk.bf16.mxu1 %vm2989_vm4, %v5358_v63  ;;  %vm2993_vm9 = vmpackc.low %vm1407_vm15, %vm1403_vm14  ;;  %vm1414_vm14 = vcmp.eq.f32.partialorder %v3596_v15, %v4333_v25  ;;  %vm1419_vm15 = vcmp.eq.f32.partialorder %v3598_v36, %v1391_v0  ;;  %vm1423_vm3 = vcmp.eq.f32.partialorder %v3602_v39, %v1391_v0  ;;  %v5384_v0 = vld [vmem:[#allocation51_spill] sm:$0xff] }
 0x363   :  { %2992 = vmatpush1.bf16.msk.msra.mxu1 %vm2991_vm6, %v5358_v63  ;;  %v3068_v51 = vcvt.f32.s32 %v3067_v13  ;;  %vm2997_vm2 = vmpackc.low %vm1415_vm11, %vm1411_vm10  ;;  %vm1418_vm4 = vcmp.eq.f32.partialorder %v3598_v36, %v4333_v25  ;;  %vm1422_vm6 = vcmp.eq.f32.partialorder %v3602_v39, %v4333_v25  ;;  %v5385_v13 = vld [vmem:[#allocation46_spill] sm:$0xff]  ;;  %vm5421_vm10 = vcmask 261120  }
 0x364   :  { %2994 = vmatprep.subr.msk.bf16.mxu1 %vm2993_vm9, %v5358_v63  ;;  %vm2999_vm0 = vmpackc.low %vm1414_vm14, %vm1410_vm5 }
 0x365   :  { %2797 = vmatmul.mubr.msk.f32.vlgmr.msra.gmra.mrb[40].mxu0 %vm662_vm8, %v5359_v7  ;;  %v4398_v11 = vsel %vm5361_vm13, %v3068_v51, %v933_v59  ;;  %vm3001_vm1 = vmpackc.low %vm1423_vm3, %vm1419_vm15 }
 0x366   :  { %1558 = vmatprep.mubr.f32.mxu0 %v5360_v57  ;;  %5362 = vst [vmem:[#allocation19_spill] sm:$0xff] %v4398_v11  ;;  %vm3003_vm9 = vmpackc.low %vm1422_vm6, %vm1418_vm4 }
 0x367   :  { %2996 = vmatpush1.bf16.msk.msra.mxu1 %vm2995_vm7, %v5358_v63  ;;  %vm5429_vm11 = vmmov %vm5421_vm10 }
 0x368   :  { %2998 = vmatprep.subr.msk.bf16.mxu1 %vm2997_vm2, %v5358_v63  ;;  %vm5436_vm7 = vmmov %vm5421_vm10 }
 0x369   :  { %2798 = vmatmul.mubr.msk.f32.gmra.mrb[42].mxu0 %vm662_vm8, %v5363_v44  ;;  %vm5438_vm2 = vmmov %vm5436_vm7 }
 0x36a   :  { %1564 = vmatprep.mubr.f32.mxu0 %v5360_v57  ;;  %vm5439_vm5 = vmmov %vm5361_vm13 }
 0x36b   :  { %3000 = vmatpush1.bf16.msk.msra.mxu1 %vm2999_vm0, %v5358_v63  ;;  %vm5441_vm14 = vmmov %vm5438_vm2 }
 0x36c   :  { %3002 = vmatprep.subr.msk.bf16.mxu1 %vm3001_vm1, %v5358_v63  ;;  %vm5442_vm15 = vmmov %vm5438_vm2 }
 0x36d   :  { %2799 = vmatmul.mubr.msk.f32.gmra.mrb[44].mxu0 %vm662_vm8, %v5364_v12  ;;  %vm5443_vm3 = vmmov %vm5438_vm2 }
 0x36e   :  { %1570 = vmatprep.mubr.f32.mxu0 %v5360_v57  ;;  %vm5444_vm0 = vmmov %vm5438_vm2 }
 0x36f   :  { %3004 = vmatpush1.bf16.msk.msra.mxu1 %vm3003_vm9, %v5358_v63  ;;  %vm5445_vm1 = vmmov %vm5444_vm0 }
 0x370   :  { %vm5446_vm4 = vmmov %vm5439_vm5 }
 0x371   :  { %2800 = vmatmul.mubr.msk.f32.gmra.mrb[46].mxu0 %vm662_vm8, %v5365_v47  ;;  %vm5448_vm6 = vmmov %vm5446_vm4 }
 0x372   :  { %1843 = vmatprep.mubr.f32.mxu0 %v5360_v57  ;;  %2817 = vmatmul.mubr.msk.f32.vlgmr.msra.gmra.mrb[40].mxu1 %vm662_vm8, %v5359_v7  ;;  %vm5450_vm9 = vmmov %vm5444_vm0 }
 0x373   :  { %1647 = vmatprep.mubr.f32.mxu1 %v5360_v57 }
 0x376   :  { %2818 = vmatmul.mubr.msk.f32.gmra.mrb[42].mxu1 %vm662_vm8, %v5363_v44  ;;  %v5387_v44 = vld [vmem:[#allocation52_spill] sm:$0xff] }
 0x377   :  { %1653 = vmatprep.mubr.f32.mxu1 %v5360_v57 }
 0x37a   :  { %2819 = vmatmul.mubr.msk.f32.gmra.mrb[44].mxu1 %vm662_vm8, %v5364_v12 }
 0x37b   :  { %1659 = vmatprep.mubr.f32.mxu1 %v5360_v57 }
 0x37e   :  { %2820 = vmatmul.mubr.msk.f32.gmra.mrb[46].mxu1 %vm662_vm8, %v5365_v47  ;;  %v5388_v47 = vld [vmem:[#allocation48_spill] sm:$0xff] }
 0x37f   :  { %1956 = vmatprep.mubr.f32.mxu1 %v5360_v57 }
 0x438   :  { %v1554_v56 = vpop.f32.mrb[40].mxu0 }
 0x439   :  { %v4438_v46 = vadd.f32 %v1554_v56, %v5367_v32  ;;  %v1556_v27 = vpop.f32.mrb[41].mxu0  ;;  %v1666_v53 = vsub.f32 %v1554_v56, %v5372_v50  ;;  %v4466_v38 = vsub.f32 %v5372_v50, %v1554_v56  ;;  %v4480_v32 = vadd.f32 %v890_v20, %v889_v5  ;;  %v5396_v5 = vld [vmem:[#allocation10_spill] sm:$0xff] }
 0x43a   :  { %v4441_v35 = vadd.f32 %v1556_v27, %v5369_v55  ;;  %v1667_v40 = vsub.f32 %v1556_v27, %v5373_v29  ;;  %v4455_v30 = vsub.f32 %v5373_v29, %v1556_v27  ;;  %v5390_v27 = vld [vmem:[#allocation18_spill] sm:$0xff] }
 0x43b   :  { %5368 = vst [vmem:[#allocation20_spill] sm:$0xff] %v4438_v46  ;;  %v1682_v62 = vmul.f32 %v1666_v53, %v1666_v53  ;;  %5383 = vst [vmem:[#allocation34_spill] sm:$0xff] %v4466_v38  ;;  %v906_v55 = vrot.slane %v5390_v27, 4 }
 0x43c   :  { %5370 = vst [vmem:[#allocation21_spill] sm:$0xff] %v4441_v35  ;;  %v1560_v1 = vpop.f32.mrb[42].mxu0  ;;  %5378 = vst [vmem:[#allocation24_spill] sm:$0xff] %v4455_v30  ;;  %v1683_v52 = vmul.f32 %v1667_v40, %v1667_v40  ;;  %v5392_v40 = vld [vmem:[#allocation15_spill] sm:$0xff] }
 0x43d   :  { %v1670_v48 = vsub.f32 %v1560_v1, %v5374_v45  ;;  %v4449_v3 = vadd.f32 %v1560_v1, %v5375_v31  ;;  %v4452_v8 = vsub.f32 %v5374_v45, %v1560_v1  ;;  %v1562_v33 = vpop.f32.mrb[43].mxu0  ;;  %v5393_v45 = vld [vmem:[#allocation53_spill] sm:$0xff] }
 0x43e   :  { %v1671_v25 = vsub.f32 %v1562_v33, %v5379_v43  ;;  %v4459_v17 = vadd.f32 %v1562_v33, %v5380_v61  ;;  %v4462_v10 = vsub.f32 %v5379_v43, %v1562_v33 }
 0x43f   :  { %5376 = vst [vmem:[#allocation22_spill] sm:$0xff] %v4449_v3  ;;  %5377 = vst [vmem:[#allocation23_spill] sm:$0xff] %v4452_v8  ;;  %v1686_v34 = vmul.f32 %v1670_v48, %v1670_v48  ;;  %v3007_v18 = vpack.c.bf16 %v4452_v8, %v4466_v38 }
 0x440   :  { %5381 = vst [vmem:[#allocation25_spill] sm:$0xff] %v4459_v17  ;;  %5382 = vst [vmem:[#allocation33_spill] sm:$0xff] %v4462_v10  ;;  %v1687_v23 = vmul.f32 %v1671_v25, %v1671_v25  ;;  %v1566_v42 = vpop.f32.mrb[44].mxu0  ;;  %v3005_v49 = vpack.c.bf16 %v4462_v10, %v4455_v30 }
 0x441   :  { %v1698_v9 = vadd.f32 %v1686_v34, %v1682_v62  ;;  %v1674_v19 = vsub.f32 %v1566_v42, %v5384_v0  ;;  %v4474_v7 = vadd.f32 %v1566_v42, %v5385_v13  ;;  %v1568_v51 = vpop.f32.mrb[45].mxu0  ;;  %v5398_v34 = vld [vmem:[#allocation55_spill] sm:$0xff]  ;;  %v892_v13 = vrot.slane %v4480_v32, 1 }
 0x442   :  { %v1707_v59 = vadd.f32 %v1687_v23, %v1683_v52  ;;  %v1675_v12 = vsub.f32 %v1568_v51, %v5387_v44  ;;  %v4478_v58 = vadd.f32 %v1568_v51, %v5388_v47  ;;  %3006 = vmatprep.subr.bf16.mxu0 %v3005_v49  ;;  %v4498_v52 = vadd.f32 %v899_v16, %v898_v60  ;;  %v5400_v23 = vld [vmem:[#allocation47_spill] sm:$0xff]  ;;  %v5406_v60 = vld [vmem:[#allocation50_spill] sm:$0xff] }
 0x443   :  { %5386 = vst [vmem:[#allocation35_spill] sm:$0xff] %v4474_v7  ;;  %v1690_v56 = vmul.f32 %v1674_v19, %v1674_v19  ;;  %3008 = vmatpush1.bf16.msra.mxu0 %v3007_v18  ;;  %v4504_v18 = vsub.f32 %v5387_v44, %v1568_v51  ;;  %v4520_v44 = vadd.f32 %v915_v28, %v5391_v14  ;;  %v5413_v28 = vld [vmem:[#allocation12_spill] sm:$0xff] }
 0x444   :  { %5389 = vst [vmem:[#allocation36_spill] sm:$0xff] %v4478_v58  ;;  %v1691_v50 = vmul.f32 %v1675_v12, %v1675_v12  ;;  %v1572_v53 = vpop.f32.mrb[46].mxu0  ;;  %v5403_v12 = vld [vmem:[#allocation49_spill] sm:$0xff] }
 0x445   :  { %v1699_v29 = vadd.f32 %v1698_v9, %v1690_v56  ;;  %v1678_v1 = vsub.f32 %v1572_v53, %v5392_v40  ;;  %v4486_v48 = vadd.f32 %v1572_v53, %v5393_v45  ;;  %v4489_v31 = vsub.f32 %v5392_v40, %v1572_v53  ;;  %v1574_v33 = vpop.f32.mrb[47].mxu0  ;;  %v1643_v43 = vpop.f32.mrb[40].mxu1  ;;  %5402 = vst [vmem:[#allocation45_spill] sm:$0xff] %v4504_v18  ;;  %v5407_v40 = vld [vmem:[#allocation9_spill] sm:$0xff] }
 0x446   :  { %v1708_v25 = vadd.f32 %v1707_v59, %v1691_v50  ;;  %v1679_v61 = vsub.f32 %v1574_v33, %v5396_v5  ;;  %v4493_v62 = vsub.f32 %v5396_v5, %v1574_v33  ;;  %v4496_v20 = vadd.f32 %v1574_v33, %v5398_v34  ;;  %v1645_v9 = vpop.f32.mrb[41].mxu1  ;;  %v5410_v33 = vld [vmem:[#allocation54_spill] sm:$0xff] }
 0x447   :  { %5394 = vst [vmem:[#allocation37_spill] sm:$0xff] %v4486_v48  ;;  %5395 = vst [vmem:[#allocation58_spill] sm:$0xff] %v4489_v31  ;;  %v4501_v49 = vadd.f32 %v1643_v43, %v5400_v23  ;;  %v1694_v19 = vmul.f32 %v1678_v1, %v1678_v1  ;;  %v4508_v59 = vadd.f32 %v906_v55, %v5390_v27  ;;  %v5414_v23 = vld [vmem:[#allocation56_spill] sm:$0xff] }
 0x448   :  { %5397 = vst [vmem:[#allocation38_spill] sm:$0xff] %v4493_v62  ;;  %5399 = vst [vmem:[#allocation39_spill] sm:$0xff] %v4496_v20  ;;  %v4511_v47 = vadd.f32 %v1645_v9, %v5403_v12  ;;  %v4514_v56 = vsub.f32 %v5384_v0, %v1566_v42  ;;  %v1668_v16 = vsub.f32 %v1643_v43, %v5406_v60  ;;  %v5409_v0 = vld [vmem:[#allocation11_spill] sm:$0xff] }
 0x449   :  { %5401 = vst [vmem:[#allocation59_spill] sm:$0xff] %v4501_v49  ;;  %v1700_v50 = vadd.f32 %v1699_v29, %v1694_v19  ;;  %v1695_v53 = vmul.f32 %v1679_v61, %v1679_v61  ;;  %v3009_v51 = vpack.c.bf16 %v4493_v62, %v4504_v18  ;;  %v1669_v1 = vsub.f32 %v1645_v9, %v5407_v40  ;;  %v1649_v55 = vpop.f32.mrb[42].mxu1 }
 0x44a   :  { %5404 = vst [vmem:[#allocation43_spill] sm:$0xff] %v4511_v47  ;;  %5405 = vst [vmem:[#allocation41_spill] sm:$0xff] %v4514_v56  ;;  %v4524_v27 = vsub.f32 %v5407_v40, %v1645_v9  ;;  %v3011_v42 = vpack.c.bf16 %v4489_v31, %v4514_v56  ;;  %v1672_v45 = vsub.f32 %v1649_v55, %v5409_v0  ;;  %v1651_v61 = vpop.f32.mrb[43].mxu1 }
 0x44b   :  { %v4530_v29 = vadd.f32 %v1649_v55, %v5410_v33  ;;  %v4533_v5 = vsub.f32 %v5409_v0, %v1649_v55  ;;  %v1701_v14 = vrot.slane %v1700_v50, 4  ;;  %3010 = vmatprep.subr.bf16.mxu0 %v3009_v51  ;;  %v1673_v34 = vsub.f32 %v1651_v61, %v5413_v28 }
 0x44c   :  { %5408 = vst [vmem:[#allocation40_spill] sm:$0xff] %v4524_v27  ;;  %v4537_v9 = vadd.f32 %v1651_v61, %v5414_v23  ;;  %v4540_v19 = vsub.f32 %v5413_v28, %v1651_v61  ;;  %v1709_v12 = vadd.f32 %v1708_v25, %v1695_v53  ;;  %3012 = vmatpush1.bf16.msra.mxu0 %v3011_v42  ;;  %v5418_v28 = vld [vmem:[#allocation60_spill] sm:$0xff]  ;;  %v5419_v53 = vld [vmem:[#allocation57_spill] sm:$0xff]  ;;  %v5422_v42 = vld [vmem:[#allocation62_spill] sm:$0xff] }
 0x44d   :  { %5411 = vst [vmem:[#allocation44_spill] sm:$0xff] %v4530_v29  ;;  %5412 = vst [vmem:[#allocation42_spill] sm:$0xff] %v4533_v5  ;;  %v1684_v40 = vmul.f32 %v1668_v16, %v1668_v16  ;;  %v4543_v33 = vsub.f32 %v5406_v60, %v1643_v43  ;;  %v1688_v29 = vmul.f32 %v1672_v45, %v1672_v45  ;;  %v1655_v49 = vpop.f32.mrb[44].mxu1  ;;  %v4556_v60 = vld [vmem:[%s5121_s1] sm:$0xff] }
 0x44e   :  { %5415 = vst [vmem:[#allocation51_spill] sm:$0xff] %v4537_v9  ;;  %5416 = vst [vmem:[#allocation46_spill] sm:$0xff] %v4540_v19  ;;  %v1702_v55 = vadd.f32 %v1701_v14, %v1700_v50  ;;  %v1685_v0 = vmul.f32 %v1669_v1, %v1669_v1  ;;  %v1689_v47 = vmul.f32 %v1673_v34, %v1673_v34  ;;  %v1710_v20 = vrot.slane %v1709_v12, 4  ;;  %v1657_v43 = vpop.f32.mrb[45].mxu1 }
 0x44f   :  { %5417 = vst [vmem:[#allocation52_spill] sm:$0xff] %v4543_v33  ;;  %v3013_v51 = vpack.c.bf16 %v4540_v19, %v4524_v27  ;;  %v1716_v23 = vadd.f32 %v1688_v29, %v1684_v40  ;;  %v3015_v61 = vpack.c.bf16 %v4533_v5, %v4543_v33  ;;  %v1676_v25 = vsub.f32 %v1655_v49, %v5418_v28  ;;  %v5423_v29 = vld [vmem:[#allocation16_spill] sm:$0xff] }
 0x450   :  { %v4551_v16 = vadd.f32 %v1655_v49, %v5419_v53  ;;  %2821 = vmatmul.mubr.msk.f32.vlgmr.msra.gmra.mrb[48].mxu0 %vm5421_vm10, %v4556_v60  ;;  %v901_v50 = vrot.slane %v4498_v52, 1  ;;  %v1725_v1 = vadd.f32 %v1689_v47, %v1685_v0  ;;  %v1677_v45 = vsub.f32 %v1657_v43, %v5422_v42  ;;  %vm5451_vm10 = vmmov %vm5444_vm0 }
 0x451   :  { %v4563_v14 = vadd.f32 %v1657_v43, %v5423_v29  ;;  %3014 = vmatprep.subr.bf16.mxu1 %v3013_v51  ;;  %v893_v34 = vadd.f32 %v892_v13, %v4480_v32  ;;  %v1692_v40 = vmul.f32 %v1676_v25, %v1676_v25  ;;  %v1703_v53 = vrot.slane %v1702_v55, 2  ;;  %1849 = vmatprep.mubr.f32.mxu0 %v5360_v57  ;;  %v1661_v0 = vpop.f32.mrb[46].mxu1  ;;  %v5426_v51 = vld [vmem:[#allocation17_spill] sm:$0xff] }
 0x452   :  { %5420 = vst [vmem:[#allocation48_spill] sm:$0xff] %v4551_v16  ;;  %3016 = vmatpush1.bf16.msra.mxu1 %v3015_v61  ;;  %v1711_v16 = vadd.f32 %v1710_v20, %v1709_v12  ;;  %v908_v9 = vrot.slane %v4508_v59, 2  ;;  %v917_v19 = vrot.slane %v4520_v44, 2  ;;  %v1693_v5 = vmul.f32 %v1677_v45, %v1677_v45  ;;  %v5427_v32 = vld [vmem:[#allocation13_spill] sm:$0xff]  ;;  %v1663_v61 = vpop.f32.mrb[47].mxu1  ;;  %v3088_v20 = vld [vmem:[%s5121_s1 + $0x8] sm:$0xff] }
 0x453   :  { %5424 = vst [vmem:[#allocation18_spill] sm:$0xff] %v4563_v14  ;;  %v4570_v47 = vsub.f32 %v5422_v42, %v1657_v43  ;;  %v1717_v29 = vadd.f32 %v1716_v23, %v1692_v40  ;;  %v1704_v14 = vadd.f32 %v1703_v53, %v1702_v55  ;;  %v1680_v27 = vsub.f32 %v1661_v0, %v5426_v51  ;;  %v5431_v42 = vld [vmem:[#allocation14_spill] sm:$0xff]  ;;  %v5433_v53 = vld [vmem:[#allocation61_spill] sm:$0xff] }
 0x454   :  { %v4574_v13 = vadd.f32 %v1661_v0, %v5427_v32  ;;  %2822 = vmatmul.mubr.msk.f32.gmra.mrb[50].mxu0 %vm5429_vm11, %v3088_v20  ;;  %v1726_v12 = vadd.f32 %v1725_v1, %v1693_v5  ;;  %v4581_v25 = vsub.f32 %v5426_v51, %v1661_v0  ;;  %v1712_v43 = vrot.slane %v1711_v16, 2  ;;  %vm5453_vm11 = vmmov %vm5444_vm0 }
 0x455   :  { %5425 = vst [vmem:[#allocation63_spill] sm:$0xff] %v4570_v47  ;;  %v1681_v23 = vsub.f32 %v1663_v61, %v5431_v42  ;;  %1855 = vmatprep.mubr.f32.mxu0 %v5360_v57  ;;  %v1705_v55 = vrot.slane %v1704_v14, 1  ;;  %v1696_v45 = vmul.f32 %v1680_v27, %v1680_v27  ;;  %v4586_v40 = vsub.f32 %v5431_v42, %v1663_v61  ;;  %v3089_v27 = vld [vmem:[%s5121_s1 + $0x10] sm:$0xff] }
 0x456   :  { %5428 = vst [vmem:[#allocation15_spill] sm:$0xff] %v4574_v13  ;;  %5430 = vst [vmem:[#allocation53_spill] sm:$0xff] %v4581_v25  ;;  %v4589_v32 = vadd.f32 %v1663_v61, %v5433_v53  ;;  %v902_v13 = vadd.f32 %v901_v50, %v4498_v52  ;;  %v4593_v5 = vsub.f32 %v5418_v28, %v1655_v49  ;;  %v922_v61 = vsel %vm921_vm12, %v893_v34, 0.0 }
 0x457   :  { %5432 = vst [vmem:[#allocation10_spill] sm:$0xff] %v4586_v40  ;;  %v1713_v1 = vadd.f32 %v1712_v43, %v1711_v16  ;;  %v1697_v0 = vmul.f32 %v1681_v23, %v1681_v23  ;;  %v1706_v51 = vadd.f32 %v1705_v55, %v1704_v14  ;;  %v1718_v33 = vadd.f32 %v1717_v29, %v1696_v45 }
 0x458   :  { %5434 = vst [vmem:[#allocation55_spill] sm:$0xff] %v4589_v32  ;;  %5435 = vst [vmem:[#allocation47_spill] sm:$0xff] %v4593_v5  ;;  %v3017_v62 = vpack.c.bf16 %v4586_v40, %v4570_v47  ;;  %2823 = vmatmul.mubr.msk.f32.gmra.mrb[52].mxu0 %vm5436_vm7, %v3089_v27  ;;  %v909_v52 = vadd.f32 %v908_v9, %v4508_v59  ;;  %v3019_v49 = vpack.c.bf16 %v4581_v25, %v4593_v5  ;;  %v3090_v59 = vld [vmem:[%s5121_s1 + $0x18] sm:$0xff]  ;;  %v5463_v5 = vld [vmem:[#allocation32_spill] sm:$0xff] }
 0x459   :  { %v1714_v28 = vrot.slane %v1713_v1, 1  ;;  %v1727_v16 = vadd.f32 %v1726_v12, %v1697_v0  ;;  %1861 = vmatprep.mubr.f32.mxu0 %v5360_v57  ;;  %v918_v50 = vadd.f32 %v917_v19, %v4520_v44  ;;  %v1719_v14 = vrot.slane %v1718_v33, 4  ;;  %vm5454_vm7 = vmmov %vm5444_vm0 }
 0x45a   :  { %3018 = vmatprep.subr.bf16.mxu1 %v3017_v62  ;;  %v4610_v29 = vsel %vm5361_vm13, %v1706_v51, %v922_v61  ;;  %v923_v9 = vsel %vm921_vm12, %v902_v13, 0.0  ;;  %v910_v44 = vrot.slane %v909_v52, 1  ;;  %v3091_v13 = vld [vmem:[%s5121_s1 + $0x20] sm:$0xff]  ;;  %v3092_v51 = vld [vmem:[%s5121_s1 + $0x28] sm:$0xff]  ;;  %vm5455_vm13 = vmmov %vm5444_vm0 }
 0x45b   :  { %5437 = vst [vmem:[#allocation49_spill] sm:$0xff] %v4610_v29  ;;  %v1715_v43 = vadd.f32 %v1714_v28, %v1713_v1  ;;  %v1728_v42 = vrot.slane %v1727_v16, 4  ;;  %3020 = vmatpush1.bf16.msra.mxu1 %v3019_v49  ;;  %v1720_v34 = vadd.f32 %v1719_v14, %v1718_v33  ;;  %v919_v33 = vrot.slane %v918_v50, 1 }
 0x45c   :  { %2824 = vmatmul.mubr.msk.f32.gmra.mrb[54].mxu0 %vm5438_vm2, %v3090_v59  ;;  %v911_v53 = vadd.f32 %v910_v44, %v909_v52  ;;  %vm5456_vm2 = vmmov %vm5444_vm0 }
 0x45d   :  { %v1729_v19 = vadd.f32 %v1728_v42, %v1727_v16  ;;  %1867 = vmatprep.mubr.f32.mxu0 %v5360_v57  ;;  %v4621_v62 = vsel %vm5439_vm5, %v1715_v43, %v923_v9  ;;  %v1721_v12 = vrot.slane %v1720_v34, 2  ;;  %v920_v0 = vadd.f32 %v919_v33, %v918_v50  ;;  %v3093_v50 = vld [vmem:[%s5121_s1 + $0x30] sm:$0xff]  ;;  %v5458_v9 = vld [vmem:[#allocation27_spill] sm:$0xff] }
 0x45e   :  { %5440 = vst [vmem:[#allocation50_spill] sm:$0xff] %v4621_v62  ;;  %2829 = vmatmul.mubr.msk.f32.vlgmr.msra.gmra.mrb[48].mxu1 %vm5441_vm14, %v4556_v60  ;;  %v924_v49 = vsel %vm921_vm12, %v911_v53, 0.0 }
 0x45f   :  { %v1730_v23 = vrot.slane %v1729_v19, 2  ;;  %1962 = vmatprep.mubr.f32.mxu1 %v5360_v57  ;;  %v1722_v55 = vadd.f32 %v1721_v12, %v1720_v34  ;;  %v5457_v34 = vld [vmem:[#allocation26_spill] sm:$0xff] }
 0x460   :  { %2825 = vmatmul.mubr.msk.f32.gmra.mrb[56].mxu0 %vm5442_vm15, %v3091_v13 }
 0x461   :  { %v1731_v45 = vadd.f32 %v1730_v23, %v1729_v19  ;;  %1873 = vmatprep.mubr.f32.mxu0 %v5360_v57  ;;  %v1723_v1 = vrot.slane %v1722_v55, 1 }
 0x462   :  { %2830 = vmatmul.mubr.msk.f32.gmra.mrb[50].mxu1 %vm5443_vm3, %v3088_v20  ;;  %v925_v20 = vsel %vm921_vm12, %v920_v0, 0.0  ;;  %vm5452_vm12 = vmmov %vm5444_vm0 }
 0x463   :  { %1968 = vmatprep.mubr.f32.mxu1 %v5360_v57  ;;  %v1732_v60 = vrot.slane %v1731_v45, 1  ;;  %v1724_v61 = vadd.f32 %v1723_v1, %v1722_v55 }
 0x464   :  { %2826 = vmatmul.mubr.msk.f32.gmra.mrb[58].mxu0 %vm5444_vm0, %v3092_v51 }
 0x465   :  { %1879 = vmatprep.mubr.f32.mxu0 %v5360_v57  ;;  %v1733_v52 = vadd.f32 %v1732_v60, %v1731_v45  ;;  %v4645_v28 = vsel %vm5446_vm4, %v1724_v61, %v924_v49  ;;  %v5459_v45 = vld [vmem:[#allocation28_spill] sm:$0xff]  ;;  %v5460_v49 = vld [vmem:[#allocation29_spill] sm:$0xff] }
 0x466   :  { %2831 = vmatmul.mubr.msk.f32.gmra.mrb[52].mxu1 %vm5445_vm1, %v3089_v27  ;;  %5447 = vst [vmem:[#allocation9_spill] sm:$0xff] %v4645_v28  ;;  %v3094_v27 = vld [vmem:[%s5121_s1 + $0x38] sm:$0xff] }
 0x467   :  { %1974 = vmatprep.mubr.f32.mxu1 %v5360_v57  ;;  %v4650_v16 = vsel %vm5448_vm6, %v1733_v52, %v925_v20 }
 0x468   :  { %5449 = vst [vmem:[#allocation11_spill] sm:$0xff] %v4650_v16  ;;  %2827 = vmatmul.mubr.msk.f32.gmra.mrb[60].mxu0 %vm5450_vm9, %v3093_v50 }
 0x469   :  { %1885 = vmatprep.mubr.f32.mxu0 %v5360_v57 }
 0x46a   :  { %2832 = vmatmul.mubr.msk.f32.gmra.mrb[54].mxu1 %vm5451_vm10, %v3090_v59 }
 0x46b   :  { %1980 = vmatprep.mubr.f32.mxu1 %v5360_v57 }
 0x46c   :  { %2828 = vmatmul.mubr.msk.f32.gmra.mrb[62].mxu0 %vm5452_vm12, %v3094_v27 }
 0x46d   :  { %2365 = vmatprep.mubr.f32.mxu0 %v5360_v57 }
 0x46e   :  { %2833 = vmatmul.mubr.msk.f32.gmra.mrb[56].mxu1 %vm5453_vm11, %v3091_v13 }
 0x46f   :  { %1986 = vmatprep.mubr.f32.mxu1 %v5360_v57 }
 0x472   :  { %2834 = vmatmul.mubr.msk.f32.gmra.mrb[58].mxu1 %vm5454_vm7, %v3092_v51 }
 0x473   :  { %1992 = vmatprep.mubr.f32.mxu1 %v5360_v57 }
 0x476   :  { %2835 = vmatmul.mubr.msk.f32.gmra.mrb[60].mxu1 %vm5455_vm13, %v3093_v50 }
 0x477   :  { %1998 = vmatprep.mubr.f32.mxu1 %v5360_v57 }
 0x47a   :  { %2836 = vmatmul.mubr.msk.f32.gmra.mrb[62].mxu1 %vm5456_vm2, %v3094_v27 }
 0x47b   :  { %2454 = vmatprep.mubr.f32.mxu1 %v5360_v57 }
 0x523   :  { %v1845_v14 = vpop.f32.mrb[48].mxu0 }
 0x524   :  { %v1847_v43 = vpop.f32.mrb[49].mxu0  ;;  %v4673_v59 = vsub.f32 %v5457_v34, %v1845_v14 }
 0x525   :  { %v4679_v12 = vsub.f32 %v5457_v34, %v1847_v43 }
 0x527   :  { %v1851_v42 = vpop.f32.mrb[50].mxu0 }
 0x528   :  { %v4676_v44 = vsub.f32 %v5458_v9, %v1851_v42  ;;  %v1853_v19 = vpop.f32.mrb[51].mxu0 }
 0x529   :  { %v4682_v33 = vsub.f32 %v5458_v9, %v1853_v19 }
 0x52a   :  { %v2037_v23 = vmin.f32 %v4673_v59, %v4676_v44 }
 0x52b   :  { %v2050_v55 = vmin.f32 %v4679_v12, %v4682_v33  ;;  %v1857_v13 = vpop.f32.mrb[52].mxu0 }
 0x52c   :  { %v4689_v53 = vsub.f32 %v5459_v45, %v1857_v13  ;;  %v1859_v1 = vpop.f32.mrb[53].mxu0  ;;  %v5461_v13 = vld [vmem:[#allocation30_spill] sm:$0xff] }
 0x52d   :  { %v4692_v0 = vsub.f32 %v5459_v45, %v1859_v1 }
 0x52e   :  { %v2038_v60 = vmin.f32 %v2037_v23, %v4689_v53 }
 0x52f   :  { %v2051_v51 = vmin.f32 %v2050_v55, %v4692_v0  ;;  %v1863_v61 = vpop.f32.mrb[54].mxu0 }
 0x530   :  { %v4697_v52 = vsub.f32 %v5460_v49, %v1863_v61  ;;  %v1865_v20 = vpop.f32.mrb[55].mxu0 }
 0x531   :  { %v1958_v50 = vpop.f32.mrb[48].mxu1  ;;  %v4700_v27 = vsub.f32 %v5460_v49, %v1865_v20 }
 0x532   :  { %v1960_v14 = vpop.f32.mrb[49].mxu1  ;;  %v2039_v43 = vmin.f32 %v2038_v60, %v4697_v52  ;;  %v4711_v61 = vsub.f32 %v5457_v34, %v1958_v50  ;;  %v5462_v50 = vld [vmem:[#allocation31_spill] sm:$0xff] }
 0x533   :  { %v2052_v42 = vmin.f32 %v2051_v51, %v4700_v27  ;;  %v1869_v19 = vpop.f32.mrb[56].mxu0  ;;  %v4718_v51 = vsub.f32 %v5457_v34, %v1960_v14 }
 0x534   :  { %v4705_v1 = vsub.f32 %v5461_v13, %v1869_v19  ;;  %v1871_v23 = vpop.f32.mrb[57].mxu0 }
 0x535   :  { %v1964_v55 = vpop.f32.mrb[50].mxu1  ;;  %v4708_v16 = vsub.f32 %v5461_v13, %v1871_v23 }
 0x536   :  { %v4714_v20 = vsub.f32 %v5458_v9, %v1964_v55  ;;  %v1966_v28 = vpop.f32.mrb[51].mxu1  ;;  %v2040_v60 = vmin.f32 %v2039_v43, %v4705_v1 }
 0x537   :  { %v4721_v19 = vsub.f32 %v5458_v9, %v1966_v28  ;;  %v2053_v32 = vmin.f32 %v2052_v42, %v4708_v16  ;;  %v1875_v40 = vpop.f32.mrb[58].mxu0 }
 0x538   :  { %v2063_v23 = vmin.f32 %v4711_v61, %v4714_v20  ;;  %v4727_v62 = vsub.f32 %v5462_v50, %v1875_v40  ;;  %v1877_v55 = vpop.f32.mrb[59].mxu0 }
 0x539   :  { %v2076_v25 = vmin.f32 %v4718_v51, %v4721_v19  ;;  %v1970_v43 = vpop.f32.mrb[52].mxu1  ;;  %v4732_v34 = vsub.f32 %v5462_v50, %v1877_v55 }
 0x53a   :  { %v4735_v28 = vsub.f32 %v5459_v45, %v1970_v43  ;;  %v1972_v9 = vpop.f32.mrb[53].mxu1  ;;  %v2041_v14 = vmin.f32 %v2040_v60, %v4727_v62 }
 0x53b   :  { %v4739_v42 = vsub.f32 %v5459_v45, %v1972_v9  ;;  %v2054_v40 = vmin.f32 %v2053_v32, %v4732_v34  ;;  %v1881_v29 = vpop.f32.mrb[60].mxu0 }
 0x53c   :  { %v2064_v47 = vmin.f32 %v2063_v23, %v4735_v28  ;;  %v4744_v48 = vsub.f32 %v5463_v5, %v1881_v29  ;;  %v1883_v31 = vpop.f32.mrb[61].mxu0 }
 0x53d   :  { %v2077_v55 = vmin.f32 %v2076_v25, %v4739_v42  ;;  %v1976_v58 = vpop.f32.mrb[54].mxu1  ;;  %v4748_v43 = vsub.f32 %v5463_v5, %v1883_v31 }
 0x53e   :  { %v4751_v60 = vsub.f32 %v5460_v49, %v1976_v58  ;;  %v1978_v45 = vpop.f32.mrb[55].mxu1  ;;  %v2042_v9 = vmin.f32 %v2041_v14, %v4744_v48 }
 0x53f   :  { %v4755_v32 = vsub.f32 %v5460_v49, %v1978_v45  ;;  %v2055_v23 = vmin.f32 %v2054_v40, %v4748_v43  ;;  %v1887_v29 = vpop.f32.mrb[62].mxu0 }
 0x540   :  { %v2065_v18 = vmin.f32 %v2064_v47, %v4751_v60  ;;  %v4760_v25 = vsub.f32 %v5357_v54, %v1887_v29  ;;  %v1889_v7 = vpop.f32.mrb[63].mxu0 }
 0x541   :  { %v2078_v31 = vmin.f32 %v2077_v55, %v4755_v32  ;;  %v1982_v56 = vpop.f32.mrb[56].mxu1  ;;  %v4764_v58 = vsub.f32 %v5357_v54, %v1889_v7 }
 0x542   :  { %v4767_v14 = vsub.f32 %v5461_v13, %v1982_v56  ;;  %v1984_v49 = vpop.f32.mrb[57].mxu1  ;;  %v2043_v45 = vmin.f32 %v2042_v9, %v4760_v25 }
 0x543   :  { %v4771_v40 = vsub.f32 %v5461_v13, %v1984_v49  ;;  %v2056_v47 = vmin.f32 %v2055_v23, %v4764_v58 }
 0x544   :  { %v2066_v29 = vmin.f32 %v2065_v18, %v4767_v14  ;;  %v2044_v17 = vrot.slane %v2043_v45, 4 }
 0x545   :  { %v2079_v55 = vmin.f32 %v2078_v31, %v4771_v40  ;;  %v1988_v10 = vpop.f32.mrb[58].mxu1  ;;  %v2057_v3 = vrot.slane %v2056_v47, 4 }
 0x546   :  { %v4777_v7 = vsub.f32 %v5462_v50, %v1988_v10  ;;  %v1990_v56 = vpop.f32.mrb[59].mxu1  ;;  %v2045_v8 = vmin.f32 %v2043_v45, %v2044_v17 }
 0x547   :  { %v4780_v30 = vsub.f32 %v5462_v50, %v1990_v56  ;;  %v2058_v9 = vmin.f32 %v2056_v47, %v2057_v3 }
 0x548   :  { %v2067_v13 = vmin.f32 %v2066_v29, %v4777_v7  ;;  %v2046_v49 = vrot.slane %v2045_v8, 2 }
 0x549   :  { %v2080_v23 = vmin.f32 %v2079_v55, %v4780_v30  ;;  %v1994_v18 = vpop.f32.mrb[60].mxu1  ;;  %v2059_v38 = vrot.slane %v2058_v9, 2 }
 0x54a   :  { %v4785_v31 = vsub.f32 %v5463_v5, %v1994_v18  ;;  %v1996_v35 = vpop.f32.mrb[61].mxu1  ;;  %v2047_v46 = vmin.f32 %v2045_v8, %v2046_v49 }
 0x54b   :  { %v4788_v10 = vsub.f32 %v5463_v5, %v1996_v35  ;;  %v2060_v17 = vmin.f32 %v2058_v9, %v2059_v38 }
 0x54c   :  { %v2068_v50 = vmin.f32 %v2067_v13, %v4785_v31  ;;  %v2048_v45 = vrot.slane %v2047_v46, 1 }
 0x54d   :  { %v2081_v3 = vmin.f32 %v2080_v23, %v4788_v10  ;;  %v2000_v47 = vpop.f32.mrb[62].mxu1  ;;  %v2061_v29 = vrot.slane %v2060_v17, 1 }
 0x54e   :  { %v2049_v56 = vmin.f32 %v2047_v46, %v2048_v45  ;;  %v2002_v55 = vpop.f32.mrb[63].mxu1  ;;  %v4793_v11 = vsub.f32 %v5357_v54, %v2000_v47 }
 0x54f   :  { %v4795_v18 = vmin.f32 %v2060_v17, %v2061_v29  ;;  %v4809_v38 = vsub.f32 %v5357_v54, %v2002_v55 }
 0x550   :  { %vm2089_vm5 = vcmp.eq.f32.partialorder %v4673_v59, %v2049_v56  ;;  %vm2093_vm14 = vcmp.eq.f32.partialorder %v4676_v44, %v2049_v56  ;;  %vm2097_vm15 = vcmp.eq.f32.partialorder %v4689_v53, %v2049_v56  ;;  %vm2101_vm3 = vcmp.eq.f32.partialorder %v4697_v52, %v2049_v56 }
 0x551   :  { %vm2105_vm0 = vcmp.eq.f32.partialorder %v4705_v1, %v2049_v56  ;;  %vm2109_vm1 = vcmp.eq.f32.partialorder %v4727_v62, %v2049_v56  ;;  %vm2113_vm4 = vcmp.eq.f32.partialorder %v4744_v48, %v2049_v56  ;;  %vm2117_vm6 = vcmp.eq.f32.partialorder %v4760_v25, %v2049_v56 }
 0x552   :  { %v2121_v46 = vsel %vm2089_vm5, %v3576_v41, 64.0  ;;  %v2125_v35 = vsel %vm2093_vm14, %v3578_v21, 64.0  ;;  %v2129_v8 = vsel %vm2097_vm15, %v3580_v2, 64.0  ;;  %v2069_v59 = vmin.f32 %v2068_v50, %v4793_v11 }
 0x553   :  { %v2153_v5 = vmin.f32 %v2121_v46, %v2125_v35  ;;  %vm2090_vm9 = vcmp.eq.f32.partialorder %v4679_v12, %v4795_v18  ;;  %vm2094_vm10 = vcmp.eq.f32.partialorder %v4682_v33, %v4795_v18  ;;  %vm2098_vm12 = vcmp.eq.f32.partialorder %v4692_v0, %v4795_v18 }
 0x554   :  { %vm2102_vm11 = vcmp.eq.f32.partialorder %v4700_v27, %v4795_v18  ;;  %vm2106_vm7 = vcmp.eq.f32.partialorder %v4708_v16, %v4795_v18  ;;  %vm2110_vm13 = vcmp.eq.f32.partialorder %v4732_v34, %v4795_v18  ;;  %v2070_v44 = vrot.slane %v2069_v59, 4 }
 0x555   :  { %v2154_v54 = vmin.f32 %v2153_v5, %v2129_v8  ;;  %vm2114_vm2 = vcmp.eq.f32.partialorder %v4748_v43, %v4795_v18  ;;  %vm2118_vm5 = vcmp.eq.f32.partialorder %v4764_v58, %v4795_v18  ;;  %v2133_v12 = vsel %vm2101_vm3, %v3582_v22, 64.0 }
 0x556   :  { %v2122_v33 = vsel %vm2090_vm9, %v3576_v41, 64.0  ;;  %v2126_v53 = vsel %vm2094_vm10, %v3578_v21, 64.0  ;;  %v2071_v13 = vmin.f32 %v2069_v59, %v2070_v44  ;;  %v2137_v49 = vsel %vm2105_vm0, %v3584_v4, 64.0 }
 0x557   :  { %v2155_v9 = vmin.f32 %v2154_v54, %v2133_v12  ;;  %v2166_v23 = vmin.f32 %v2122_v33, %v2126_v53  ;;  %v2082_v17 = vmin.f32 %v2081_v3, %v4809_v38  ;;  %v2130_v52 = vsel %vm2098_vm12, %v3580_v2, 64.0 }
 0x558   :  { %v2072_v45 = vrot.slane %v2071_v13, 2  ;;  %v2141_v47 = vsel %vm2109_vm1, %v3596_v15, 64.0  ;;  %v2134_v1 = vsel %vm2102_vm11, %v3582_v22, 64.0  ;;  %v2145_v3 = vsel %vm2113_vm4, %v3598_v36, 64.0 }
 0x559   :  { %v2156_v50 = vmin.f32 %v2155_v9, %v2137_v49  ;;  %v2167_v29 = vmin.f32 %v2166_v23, %v2130_v52  ;;  %v2083_v55 = vrot.slane %v2082_v17, 4  ;;  %v2138_v62 = vsel %vm2106_vm7, %v3584_v4, 64.0 }
 0x55a   :  { %v2073_v35 = vmin.f32 %v2071_v13, %v2072_v45  ;;  %v2149_v54 = vsel %vm2117_vm6, %v3602_v39, 64.0  ;;  %v2142_v48 = vsel %vm2110_vm13, %v3596_v15, 64.0  ;;  %v2150_v45 = vsel %vm2118_vm5, %v3602_v39, 64.0 }
 0x55b   :  { %v2157_v46 = vmin.f32 %v2156_v50, %v2141_v47  ;;  %v2168_v8 = vmin.f32 %v2167_v29, %v2134_v1  ;;  %v2084_v0 = vmin.f32 %v2082_v17, %v2083_v55 }
 0x55c   :  { %v2074_v59 = vrot.slane %v2073_v35, 1 }
 0x55d   :  { %v2158_v5 = vmin.f32 %v2157_v46, %v2145_v3  ;;  %v2169_v44 = vmin.f32 %v2168_v8, %v2138_v62  ;;  %v2085_v27 = vrot.slane %v2084_v0, 2 }
 0x55e   :  { %v2075_v33 = vmin.f32 %v2073_v35, %v2074_v59 }
 0x55f   :  { %v2159_v12 = vmin.f32 %v2158_v5, %v2149_v54  ;;  %v2170_v53 = vmin.f32 %v2169_v44, %v2142_v48  ;;  %v2086_v9 = vmin.f32 %v2084_v0, %v2085_v27 }
 0x560   :  { %vm2091_vm14 = vcmp.eq.f32.partialorder %v4711_v61, %v2075_v33  ;;  %vm2095_vm15 = vcmp.eq.f32.partialorder %v4714_v20, %v2075_v33  ;;  %vm2099_vm3 = vcmp.eq.f32.partialorder %v4735_v28, %v2075_v33  ;;  %vm2103_vm0 = vcmp.eq.f32.partialorder %v4751_v60, %v2075_v33 }
 0x561   :  { %v2160_v13 = vrot.slane %v2159_v12, 4  ;;  %vm2107_vm1 = vcmp.eq.f32.partialorder %v4767_v14, %v2075_v33  ;;  %vm2111_vm4 = vcmp.eq.f32.partialorder %v4777_v7, %v2075_v33  ;;  %vm2115_vm6 = vcmp.eq.f32.partialorder %v4785_v31, %v2075_v33 }
 0x562   :  { %vm2119_vm9 = vcmp.eq.f32.partialorder %v4793_v11, %v2075_v33  ;;  %v2123_v34 = vsel %vm2091_vm14, %v3576_v41, 64.0  ;;  %v2127_v25 = vsel %vm2095_vm15, %v3578_v21, 64.0  ;;  %v2146_v20 = vsel %vm2114_vm2, %v3598_v36, 64.0 }
 0x563   :  { %v2161_v16 = vmin.f32 %v2159_v12, %v2160_v13  ;;  %v2179_v56 = vmin.f32 %v2123_v34, %v2127_v25  ;;  %v2131_v28 = vsel %vm2099_vm3, %v3580_v2, 64.0  ;;  %v2171_v49 = vmin.f32 %v2170_v53, %v2146_v20 }
 0x564   :  { %v2087_v23 = vrot.slane %v2086_v9, 1  ;;  %v2135_v52 = vsel %vm2103_vm0, %v3582_v22, 64.0  ;;  %v2139_v43 = vsel %vm2107_vm1, %v3584_v4, 64.0  ;;  %v2143_v55 = vsel %vm2111_vm4, %v3596_v15, 64.0 }
 0x565   :  { %v2162_v61 = vrot.slane %v2161_v16, 2  ;;  %v2180_v50 = vmin.f32 %v2179_v56, %v2131_v28  ;;  %v2172_v47 = vmin.f32 %v2171_v49, %v2150_v45  ;;  %v2147_v18 = vsel %vm2115_vm6, %v3598_v36, 64.0 }
 0x566   :  { %v2088_v29 = vmin.f32 %v2086_v9, %v2087_v23  ;;  %v2151_v5 = vsel %vm2119_vm9, %v3602_v39, 64.0  ;;  %vm2547_vm15 = vcmp.eq.s32.totalorder %v3566_v26, 2 }
 0x567   :  { %v2163_v17 = vmin.f32 %v2161_v16, %v2162_v61  ;;  %v2181_v46 = vmin.f32 %v2180_v50, %v2135_v52  ;;  %v2173_v35 = vrot.slane %v2172_v47, 4 }
 0x568   :  { %vm2092_vm10 = vcmp.eq.f32.partialorder %v4718_v51, %v2088_v29  ;;  %vm2096_vm12 = vcmp.eq.f32.partialorder %v4721_v19, %v2088_v29  ;;  %vm2100_vm11 = vcmp.eq.f32.partialorder %v4739_v42, %v2088_v29  ;;  %vm2104_vm7 = vcmp.eq.f32.partialorder %v4755_v32, %v2088_v29 }
 0x569   :  { %v2164_v60 = vrot.slane %v2163_v17, 1  ;;  %v2182_v58 = vmin.f32 %v2181_v46, %v2139_v43  ;;  %vm2108_vm13 = vcmp.eq.f32.partialorder %v4771_v40, %v2088_v29  ;;  %v2174_v14 = vmin.f32 %v2172_v47, %v2173_v35  ;;  %v3095_v46 = vld [vmem:[%s5122_s2] sm:$0xff]  ;;  %v3097_v35 = vld [vmem:[%s5122_s2 + $0x10] sm:$0xff] }
 0x56a   :  { %vm2112_vm2 = vcmp.eq.f32.partialorder %v4780_v30, %v2088_v29  ;;  %vm2116_vm5 = vcmp.eq.f32.partialorder %v4788_v10, %v2088_v29  ;;  %vm2120_vm14 = vcmp.eq.f32.partialorder %v4809_v38, %v2088_v29  ;;  %v2124_v51 = vsel %vm2092_vm10, %v3576_v41, 64.0 }
 0x56b   :  { %v2183_v7 = vmin.f32 %v2182_v58, %v2143_v55  ;;  %v2128_v19 = vsel %vm2096_vm12, %v3578_v21, 64.0  ;;  %v2175_v1 = vrot.slane %v2174_v14, 2  ;;  %v4903_v3 = vmin.f32 %v2163_v17, %v2164_v60 }
 0x56c   :  { %v2192_v0 = vmin.f32 %v2124_v51, %v2128_v19  ;;  %v2132_v62 = vsel %vm2100_vm11, %v3580_v2, 64.0  ;;  %v2136_v31 = vsel %vm2104_vm7, %v3582_v22, 64.0  ;;  %v2140_v33 = vsel %vm2108_vm13, %v3584_v4, 64.0  ;;  %v5468_v19 = vld [vmem:[#allocation24_spill] sm:$0xff] }
 0x56d   :  { %v2184_v8 = vmin.f32 %v2183_v7, %v2147_v18  ;;  %v2176_v59 = vmin.f32 %v2174_v14, %v2175_v1  ;;  %v3069_v53 = vtrunc.f32 %v4903_v3  ;;  %v2144_v42 = vsel %vm2112_vm2, %v3596_v15, 64.0  ;;  %v5466_v14 = vld [vmem:[#allocation21_spill] sm:$0xff]  ;;  %v5467_v7 = vld [vmem:[#allocation34_spill] sm:$0xff] }
 0x56e   :  { %v2193_v44 = vmin.f32 %v2192_v0, %v2132_v62  ;;  %vm2205_vm3 = vcmp.eq.f32.partialorder %v3576_v41, %v4903_v3  ;;  %vm2209_vm0 = vcmp.eq.f32.partialorder %v3578_v21, %v4903_v3  ;;  %v2148_v16 = vsel %vm2116_vm5, %v3598_v36, 64.0  ;;  %v5470_v0 = vld [vmem:[#allocation22_spill] sm:$0xff] }
 0x56f   :  { %v2185_v54 = vmin.f32 %v2184_v8, %v2151_v5  ;;  %v2177_v27 = vrot.slane %v2176_v59, 1  ;;  %v3070_v13 = vcvt.f32.s32 %v3069_v53  ;;  %vm3023_vm12 = vmpackc.low %vm2209_vm0, %vm2205_vm3  ;;  %vm2213_vm7 = vcmp.eq.f32.partialorder %v3580_v2, %v4903_v3 }
 0x570   :  { %v2194_v48 = vmin.f32 %v2193_v44, %v2136_v31  ;;  %vm2217_vm13 = vcmp.eq.f32.partialorder %v3582_v22, %v4903_v3  ;;  %v2152_v10 = vsel %vm2120_vm14, %v3602_v39, 64.0  ;;  %vm2221_vm0 = vcmp.eq.f32.partialorder %v3584_v4, %v4903_v3 }
 0x571   :  { %v2186_v12 = vrot.slane %v2185_v54, 4  ;;  %v2178_v11 = vmin.f32 %v2176_v59, %v2177_v27  ;;  %v2556_v25 = vsel %vm2547_vm15, %v3070_v13, %v4321_v24  ;;  %vm3027_vm3 = vmpackc.low %vm2217_vm13, %vm2213_vm7  ;;  %v5471_v59 = vld [vmem:[#allocation33_spill] sm:$0xff] }
 0x572   :  { %v2195_v9 = vmin.f32 %v2194_v48, %v2140_v33  ;;  %v5473_v33 = vld [vmem:[#allocation41_spill] sm:$0xff] }
 0x573   :  { %v2187_v32 = vmin.f32 %v2185_v54, %v2186_v12  ;;  %vm2206_vm1 = vcmp.eq.f32.partialorder %v3576_v41, %v2178_v11  ;;  %vm2210_vm4 = vcmp.eq.f32.partialorder %v3578_v21, %v2178_v11  ;;  %vm2214_vm6 = vcmp.eq.f32.partialorder %v3580_v2, %v2178_v11  ;;  %v5472_v54 = vld [vmem:[#allocation25_spill] sm:$0xff] }
 0x574   :  { %vm2218_vm9 = vcmp.eq.f32.partialorder %v3582_v22, %v2178_v11  ;;  %v2196_v30 = vmin.f32 %v2195_v9, %v2144_v42  ;;  %vm3021_vm10 = vmpackc.low %vm2210_vm4, %vm2206_vm1  ;;  %v3071_v34 = vtrunc.f32 %v2178_v11  ;;  %vm2222_vm2 = vcmp.eq.f32.partialorder %v3584_v4, %v2178_v11 }
 0x575   :  { %v2188_v40 = vrot.slane %v2187_v32, 2  ;;  %3022 = vmatprep.subr.msk.bf16.mxu0 %vm3021_vm10, %v5358_v63  ;;  %vm3025_vm11 = vmpackc.low %vm2218_vm9, %vm2214_vm6  ;;  %vm2226_vm5 = vcmp.eq.f32.partialorder %v3596_v15, %v2178_v11  ;;  %vm2225_vm1 = vcmp.eq.f32.partialorder %v3596_v15, %v4903_v3  ;;  %vm2230_vm4 = vcmp.eq.f32.partialorder %v3598_v36, %v2178_v11 }
 0x576   :  { %v2197_v56 = vmin.f32 %v2196_v30, %v2148_v16  ;;  %3024 = vmatpush1.bf16.msk.msra.mxu0 %vm3023_vm12, %v5358_v63  ;;  %v3072_v24 = vcvt.f32.s32 %v3071_v34  ;;  %vm3029_vm14 = vmpackc.low %vm2226_vm5, %vm2222_vm2  ;;  %vm2234_vm6 = vcmp.eq.f32.partialorder %v3602_v39, %v2178_v11  ;;  %vm2229_vm12 = vcmp.eq.f32.partialorder %v3598_v36, %v4903_v3  ;;  %v5475_v30 = vld [vmem:[#allocation45_spill] sm:$0xff]  ;;  %v5476_v34 = vld [vmem:[#allocation36_spill] sm:$0xff] }
 0x577   :  { %v2189_v61 = vmin.f32 %v2187_v32, %v2188_v40  ;;  %3026 = vmatprep.subr.msk.bf16.mxu0 %vm3025_vm11, %v5358_v63  ;;  %vm3031_vm9 = vmpackc.low %vm2225_vm1, %vm2221_vm0  ;;  %vm2233_vm11 = vcmp.eq.f32.partialorder %v3602_v39, %v4903_v3  ;;  %v5469_v3 = vld [vmem:[#allocation23_spill] sm:$0xff] }
 0x578   :  { %v2198_v28 = vmin.f32 %v2197_v56, %v2152_v10  ;;  %v2557_v49 = vsel %vm2547_vm15, %v3072_v24, %v4355_v6  ;;  %vm3033_vm10 = vmpackc.low %vm2234_vm6, %vm2230_vm4  ;;  %v5474_v32 = vld [vmem:[#allocation35_spill] sm:$0xff] }
 0x579   :  { %v2190_v20 = vrot.slane %v2189_v61, 1  ;;  %v2592_v17 = vcombine.low %v2556_v25, %v2557_v49  ;;  %vm3035_vm7 = vmpackc.low %vm2233_vm11, %vm2229_vm12  ;;  %v5478_v49 = vld [vmem:[#allocation37_spill] sm:$0xff] }
 0x57a   :  { %v2199_v38 = vrot.slane %v2198_v28, 4  ;;  %3028 = vmatpush1.bf16.msk.msra.mxu0 %vm3027_vm3, %v5358_v63 }
 0x57b   :  { %v4953_v23 = vmin.f32 %v2189_v61, %v2190_v20  ;;  %3030 = vmatprep.subr.msk.bf16.mxu0 %vm3029_vm14, %v5358_v63  ;;  %2594 = vst [vmem:[#allocation4] sm:$0x77] %v2592_v17  ;;  %v5477_v20 = vld [vmem:[#allocation58_spill] sm:$0xff] }
 0x57c   :  { %v2200_v50 = vmin.f32 %v2198_v28, %v2199_v38 }
 0x57d   :  { %v3073_v45 = vtrunc.f32 %v4953_v23  ;;  %vm2207_vm13 = vcmp.eq.f32.partialorder %v3576_v41, %v4953_v23  ;;  %vm2211_vm2 = vcmp.eq.f32.partialorder %v3578_v21, %v4953_v23 }
 0x57e   :  { %v2201_v6 = vrot.slane %v2200_v50, 2  ;;  %3032 = vmatpush1.bf16.msk.msra.mxu0 %vm3031_vm9, %v5358_v63  ;;  %vm3039_vm4 = vmpackc.low %vm2211_vm2, %vm2207_vm13  ;;  %vm2215_vm9 = vcmp.eq.f32.partialorder %v3580_v2, %v4953_v23  ;;  %vm2223_vm2 = vcmp.eq.f32.partialorder %v3584_v4, %v4953_v23 }
 0x57f   :  { %3034 = vmatprep.subr.msk.bf16.mxu0 %vm3033_vm10, %v5358_v63  ;;  %v3074_v47 = vcvt.f32.s32 %v3073_v45  ;;  %vm2219_vm10 = vcmp.eq.f32.partialorder %v3582_v22, %v4953_v23  ;;  %v5480_v45 = vld [vmem:[#allocation39_spill] sm:$0xff] }
 0x580   :  { %v2202_v52 = vmin.f32 %v2200_v50, %v2201_v6  ;;  %v5479_v50 = vld [vmem:[#allocation38_spill] sm:$0xff] }
 0x581   :  { %v2558_v43 = vsel %vm2547_vm15, %v3074_v47, %v4364_v37 }
 0x582   :  { %v2203_v29 = vrot.slane %v2202_v52, 1  ;;  %3036 = vmatpush1.bf16.msk.msra.mxu0 %vm3035_vm7, %v5358_v63  ;;  %vm3043_vm7 = vmpackc.low %vm2219_vm10, %vm2215_vm9 }
 0x584   :  { %v2204_v55 = vmin.f32 %v2202_v52, %v2203_v29 }
 0x585   :  { %2885 = vmatmul.mubr.msk.f32.vlgmr.msra.gmra.mrb[64].mxu0 %vm662_vm8, %v3095_v46 }
 0x586   :  { %vm2208_vm5 = vcmp.eq.f32.partialorder %v3576_v41, %v2204_v55  ;;  %vm2212_vm3 = vcmp.eq.f32.partialorder %v3578_v21, %v2204_v55  ;;  %vm2216_vm0 = vcmp.eq.f32.partialorder %v3580_v2, %v2204_v55  ;;  %vm2220_vm14 = vcmp.eq.f32.partialorder %v3582_v22, %v2204_v55  ;;  %2371 = vmatprep.mubr.f32.mxu0 %v5360_v57  ;;  %v3096_v21 = vld [vmem:[%s5122_s2 + $0x8] sm:$0xff] }
 0x587   :  { %vm3037_vm1 = vmpackc.low %vm2212_vm3, %vm2208_vm5  ;;  %v3075_v37 = vtrunc.f32 %v2204_v55  ;;  %vm2224_vm12 = vcmp.eq.f32.partialorder %v3584_v4, %v2204_v55  ;;  %vm2228_vm11 = vcmp.eq.f32.partialorder %v3596_v15, %v2204_v55  ;;  %v5464_v2 = vld [vmem:[#allocation19_spill] sm:$0xff]  ;;  %vm2227_vm5 = vcmp.eq.f32.partialorder %v3596_v15, %v4953_v23  ;;  %v3098_v4 = vld [vmem:[%s5122_s2 + $0x18] sm:$0xff]  ;;  %s3172_s2 = smov [#allocation4]  }
 0x588   :  { %3038 = vmatprep.subr.msk.bf16.mxu1 %vm3037_vm1, %v5358_v63  ;;  %vm3041_vm6 = vmpackc.low %vm2220_vm14, %vm2216_vm0  ;;  %vm2232_vm3 = vcmp.eq.f32.partialorder %v3598_v36, %v2204_v55  ;;  %vm2236_vm0 = vcmp.eq.f32.partialorder %v3602_v39, %v2204_v55  ;;  %s2620_s15 = sshll.u32 %s3172_s2, 4  ;;  %s2621_s15 = int_to_ptr.vmem [resolvable:$true] %s2620_s15 }
 0x589   :  { %3040 = vmatpush1.bf16.msk.msra.mxu1 %vm3039_vm4, %v5358_v63  ;;  %2886 = vmatmul.mubr.msk.f32.gmra.mrb[66].mxu0 %vm662_vm8, %v3096_v21  ;;  %v3076_v41 = vcvt.f32.s32 %v3075_v37  ;;  %vm3045_vm13 = vmpackc.low %vm2228_vm11, %vm2224_vm12  ;;  %vm2231_vm4 = vcmp.eq.f32.partialorder %v3598_v36, %v4953_v23  ;;  %v5465_v36 = vld [vmem:[#allocation20_spill] sm:$0xff]  ;;  %s3099_s18 = scalar_lea.vmem %s2621_s15, 256  ;;  %p3104_p1 = scmp.lt.s32.totalorder %s2621_s15, %s2621_s15 }
 0x58a   :  { %3042 = vmatprep.subr.msk.bf16.mxu1 %vm3041_vm6, %v5358_v63  ;;  %2377 = vmatprep.mubr.f32.mxu0 %v5360_v57  ;;  %vm3047_vm14 = vmpackc.low %vm2227_vm5, %vm2223_vm2  ;;  %vm2235_vm6 = vcmp.eq.f32.partialorder %v3602_v39, %v4953_v23  ;;  %p3100_p0 = scmp.ne.s32.totalorder %s2621_s15, %s3099_s18  ;;  %p3105_p2 = scmp.lt.s32.totalorder %s3099_s18, %s3099_s18 }
 0x58b   :  { %v2559_v22 = vsel %vm2547_vm15, %v3076_v41, %v5464_v2  ;;  %vm3049_vm1 = vmpackc.low %vm2236_vm0, %vm2232_vm3 }
 0x58c   :  { %v2593_v60 = vcombine.low %v2558_v43, %v2559_v22  ;;  %vm3051_vm9 = vmpackc.low %vm2235_vm6, %vm2231_vm4  ;;  %p3106_p3 = por %p3105_p2, %p3104_p1 }
 0x58d   :  { %3044 = vmatpush1.bf16.msk.msra.mxu1 %vm3043_vm7, %v5358_v63  ;;  %2887 = vmatmul.mubr.msk.f32.gmra.mrb[68].mxu0 %vm662_vm8, %v3097_v35 }
 0x58e   :  { %3046 = vmatprep.subr.msk.bf16.mxu1 %vm3045_vm13, %v5358_v63  ;;  %2383 = vmatprep.mubr.f32.mxu0 %v5360_v57  ;;  %2595 = vst [vmem:[#allocation4 + $0x8] sm:$0x77] %v2593_v60  ;;  %p3107_p4 = pnand %p3106_p3, %p3100_p0 }
 0x591   :  { %3048 = vmatpush1.bf16.msk.msra.mxu1 %vm3047_vm14, %v5358_v63  ;;  %2888 = vmatmul.mubr.msk.f32.gmra.mrb[70].mxu0 %vm662_vm8, %v3098_v4 }
 0x592   :  { %3050 = vmatprep.subr.msk.bf16.mxu1 %vm3049_vm1, %v5358_v63 }
 0x595   :  { %3052 = vmatpush1.bf16.msk.msra.mxu1 %vm3051_vm9, %v5358_v63 }
 0x598   :  { %2905 = vmatmul.mubr.msk.f32.vlgmr.msra.gmra.mrb[64].mxu1 %vm662_vm8, %v3095_v46 }
 0x599   :  { %2460 = vmatprep.mubr.f32.mxu1 %v5360_v57 }
 0x59c   :  { %2906 = vmatmul.mubr.msk.f32.gmra.mrb[66].mxu1 %vm662_vm8, %v3096_v21  ;;  %v5481_v21 = vld [vmem:[#allocation59_spill] sm:$0xff] }
 0x59d   :  { %2466 = vmatprep.mubr.f32.mxu1 %v5360_v57 }
 0x5a0   :  { %2907 = vmatmul.mubr.msk.f32.gmra.mrb[68].mxu1 %vm662_vm8, %v3097_v35  ;;  %v5482_v35 = vld [vmem:[#allocation43_spill] sm:$0xff] }
 0x5a1   :  { %2472 = vmatprep.mubr.f32.mxu1 %v5360_v57 }
 0x5a4   :  { %2908 = vmatmul.mubr.msk.f32.gmra.mrb[70].mxu1 %vm662_vm8, %v3098_v4 }
 0x658   :  { %v2367_v15 = vpop.f32.mrb[64].mxu0 }
 0x659   :  { %v2560_v39 = vadd.f32 %v2367_v15, %v5465_v36  ;;  %v2369_v58 = vpop.f32.mrb[65].mxu0  ;;  %v2479_v51 = vsub.f32 %v2367_v15, %v5467_v7  ;;  %v5483_v15 = vld [vmem:[#allocation52_spill] sm:$0xff] }
 0x65a   :  { %v2561_v63 = vadd.f32 %v2369_v58, %v5466_v14  ;;  %v2480_v18 = vsub.f32 %v2369_v58, %v5468_v19  ;;  %v5484_v58 = vld [vmem:[#allocation40_spill] sm:$0xff] }
 0x65b   :  { %2576 = vst [vmem:[#allocation2] sm:$0xff] %v2560_v39  ;;  %v2495_v27 = vmul.f32 %v2479_v51, %v2479_v51  ;;  %v5485_v51 = vld [vmem:[#allocation42_spill] sm:$0xff] }
 0x65c   :  { %2577 = vst [vmem:[#allocation2 + $0x8] sm:$0xff] %v2561_v63  ;;  %v2373_v1 = vpop.f32.mrb[66].mxu0  ;;  %v2496_v12 = vmul.f32 %v2480_v18, %v2480_v18  ;;  %v5486_v18 = vld [vmem:[#allocation44_spill] sm:$0xff] }
 0x65d   :  { %v2483_v8 = vsub.f32 %v2373_v1, %v5469_v3  ;;  %v2564_v5 = vadd.f32 %v2373_v1, %v5470_v0  ;;  %v2375_v57 = vpop.f32.mrb[67].mxu0  ;;  %v5487_v0 = vld [vmem:[#allocation46_spill] sm:$0xff] }
 0x65e   :  { %v2484_v62 = vsub.f32 %v2375_v57, %v5471_v59  ;;  %v2565_v44 = vadd.f32 %v2375_v57, %v5472_v54  ;;  %v5488_v57 = vld [vmem:[#allocation51_spill] sm:$0xff] }
 0x65f   :  { %v2499_v31 = vmul.f32 %v2483_v8, %v2483_v8  ;;  %2580 = vst [vmem:[#allocation2 + $0x20] sm:$0xff] %v2564_v5 }
 0x660   :  { %v2500_v48 = vmul.f32 %v2484_v62, %v2484_v62  ;;  %2581 = vst [vmem:[#allocation2 + $0x28] sm:$0xff] %v2565_v44  ;;  %v2379_v53 = vpop.f32.mrb[68].mxu0 }
 0x661   :  { %v2511_v11 = vadd.f32 %v2499_v31, %v2495_v27  ;;  %v2487_v42 = vsub.f32 %v2379_v53, %v5473_v33  ;;  %v2568_v9 = vadd.f32 %v2379_v53, %v5474_v32  ;;  %v2381_v13 = vpop.f32.mrb[69].mxu0  ;;  %v5489_v33 = vld [vmem:[#allocation47_spill] sm:$0xff]  ;;  %v5490_v32 = vld [vmem:[#allocation48_spill] sm:$0xff] }
 0x662   :  { %v2520_v40 = vadd.f32 %v2500_v48, %v2496_v12  ;;  %v2488_v16 = vsub.f32 %v2381_v13, %v5475_v30  ;;  %v2569_v25 = vadd.f32 %v2381_v13, %v5476_v34 }
 0x663   :  { %v2503_v61 = vmul.f32 %v2487_v42, %v2487_v42  ;;  %2584 = vst [vmem:[#allocation2 + $0x40] sm:$0xff] %v2568_v9 }
 0x664   :  { %v2504_v56 = vmul.f32 %v2488_v16, %v2488_v16  ;;  %2585 = vst [vmem:[#allocation2 + $0x48] sm:$0xff] %v2569_v25  ;;  %v2385_v10 = vpop.f32.mrb[70].mxu0  ;;  %v5491_v16 = vld [vmem:[#allocation63_spill] sm:$0xff]  ;;  %v5492_v25 = vld [vmem:[#allocation18_spill] sm:$0xff] }
 0x665   :  { %v2512_v24 = vadd.f32 %v2511_v11, %v2503_v61  ;;  %v2491_v28 = vsub.f32 %v2385_v10, %v5477_v20  ;;  %v2572_v23 = vadd.f32 %v2385_v10, %v5478_v49  ;;  %v2387_v38 = vpop.f32.mrb[71].mxu0  ;;  %v5493_v49 = vld [vmem:[#allocation49_spill] sm:$0xff] }
 0x666   :  { %v2521_v17 = vadd.f32 %v2520_v40, %v2504_v56  ;;  %v2492_v6 = vsub.f32 %v2387_v38, %v5479_v50  ;;  %v2573_v52 = vadd.f32 %v2387_v38, %v5480_v45 }
 0x667   :  { %v2507_v47 = vmul.f32 %v2491_v28, %v2491_v28  ;;  %2588 = vst [vmem:[#allocation2 + $0x60] sm:$0xff] %v2572_v23 }
 0x668   :  { %v2508_v29 = vmul.f32 %v2492_v6, %v2492_v6  ;;  %2589 = vst [vmem:[#allocation2 + $0x68] sm:$0xff] %v2573_v52  ;;  %v5495_v6 = vld [vmem:[#allocation15_spill] sm:$0xff] }
 0x669   :  { %v2513_v43 = vadd.f32 %v2512_v24, %v2507_v47  ;;  %v5496_v47 = vld [vmem:[#allocation50_spill] sm:$0xff] }
 0x66a   :  { %v2522_v55 = vadd.f32 %v2521_v17, %v2508_v29  ;;  %v5494_v17 = vld [vmem:[#allocation53_spill] sm:$0xff] }
 0x66b   :  { %v2456_v46 = vpop.f32.mrb[64].mxu1  ;;  %v2514_v37 = vrot.slane %v2513_v43, 4 }
 0x66c   :  { %v2562_v41 = vadd.f32 %v2456_v46, %v5481_v21  ;;  %v2458_v2 = vpop.f32.mrb[65].mxu1  ;;  %v2523_v22 = vrot.slane %v2522_v55, 4  ;;  %v2481_v36 = vsub.f32 %v2456_v46, %v5483_v15 }
 0x66d   :  { %v2563_v60 = vadd.f32 %v2458_v2, %v5482_v35  ;;  %v2515_v4 = vadd.f32 %v2514_v37, %v2513_v43  ;;  %v2482_v14 = vsub.f32 %v2458_v2, %v5484_v58  ;;  %v5498_v37 = vld [vmem:[#allocation55_spill] sm:$0xff] }
 0x66e   :  { %2578 = vst [vmem:[#allocation2 + $0x10] sm:$0xff] %v2562_v41  ;;  %v2524_v39 = vadd.f32 %v2523_v22, %v2522_v55  ;;  %v2497_v54 = vmul.f32 %v2481_v36, %v2481_v36  ;;  %v5497_v55 = vld [vmem:[#allocation10_spill] sm:$0xff] }
 0x66f   :  { %2579 = vst [vmem:[#allocation2 + $0x18] sm:$0xff] %v2563_v60  ;;  %v2462_v63 = vpop.f32.mrb[66].mxu1  ;;  %v2516_v7 = vrot.slane %v2515_v4, 2  ;;  %v2498_v31 = vmul.f32 %v2482_v14, %v2482_v14 }
 0x670   :  { %v2485_v19 = vsub.f32 %v2462_v63, %v5485_v51  ;;  %v2566_v1 = vadd.f32 %v2462_v63, %v5486_v18  ;;  %v2464_v3 = vpop.f32.mrb[67].mxu1  ;;  %v2525_v8 = vrot.slane %v2524_v39, 2 }
 0x671   :  { %v2486_v5 = vsub.f32 %v2464_v3, %v5487_v0  ;;  %v2567_v59 = vadd.f32 %v2464_v3, %v5488_v57  ;;  %v2517_v62 = vadd.f32 %v2516_v7, %v2515_v4  ;;  %v5499_v3 = vld [vmem:[#allocation9_spill] sm:$0xff]  ;;  %v5500_v0 = vld [vmem:[#allocation11_spill] sm:$0xff] }
 0x672   :  { %v2501_v44 = vmul.f32 %v2485_v19, %v2485_v19  ;;  %2582 = vst [vmem:[#allocation2 + $0x30] sm:$0xff] %v2566_v1  ;;  %v2526_v27 = vadd.f32 %v2525_v8, %v2524_v39 }
 0x673   :  { %v2502_v12 = vmul.f32 %v2486_v5, %v2486_v5  ;;  %2583 = vst [vmem:[#allocation2 + $0x38] sm:$0xff] %v2567_v59  ;;  %v2468_v48 = vpop.f32.mrb[68].mxu1  ;;  %v2518_v53 = vrot.slane %v2517_v62, 1 }
 0x674   :  { %v2529_v11 = vadd.f32 %v2501_v44, %v2497_v54  ;;  %v2489_v42 = vsub.f32 %v2468_v48, %v5489_v33  ;;  %v2570_v9 = vadd.f32 %v2468_v48, %v5490_v32  ;;  %v2470_v13 = vpop.f32.mrb[69].mxu1  ;;  %v2527_v40 = vrot.slane %v2526_v27, 1 }
 0x675   :  { %v2538_v30 = vadd.f32 %v2502_v12, %v2498_v31  ;;  %v2490_v34 = vsub.f32 %v2470_v13, %v5491_v16  ;;  %v2571_v61 = vadd.f32 %v2470_v13, %v5492_v25  ;;  %v2519_v56 = vadd.f32 %v2518_v53, %v2517_v62 }
 0x676   :  { %v2505_v10 = vmul.f32 %v2489_v42, %v2489_v42  ;;  %2586 = vst [vmem:[#allocation2 + $0x50] sm:$0xff] %v2570_v9  ;;  %v2528_v24 = vadd.f32 %v2527_v40, %v2526_v27 }
 0x677   :  { %v2506_v20 = vmul.f32 %v2490_v34, %v2490_v34  ;;  %2587 = vst [vmem:[#allocation2 + $0x58] sm:$0xff] %v2571_v61  ;;  %v2474_v28 = vpop.f32.mrb[70].mxu1  ;;  %v2548_v23 = vsel %vm2547_vm15, %v2519_v56, %v5493_v49 }
 0x678   :  { %v2530_v38 = vadd.f32 %v2529_v11, %v2505_v10  ;;  %v2493_v50 = vsub.f32 %v2474_v28, %v5494_v17  ;;  %v2574_v45 = vadd.f32 %v2474_v28, %v5495_v6  ;;  %v2476_v52 = vpop.f32.mrb[71].mxu1  ;;  %v2549_v29 = vsel %vm2547_vm15, %v2528_v24, %v5496_v47 }
 0x679   :  { %v2539_v43 = vadd.f32 %v2538_v30, %v2506_v20  ;;  %v2494_v46 = vsub.f32 %v2476_v52, %v5497_v55  ;;  %v2575_v21 = vadd.f32 %v2476_v52, %v5498_v37  ;;  %v2596_v41 = vadd.f32 %v2549_v29, %v2548_v23 }
 0x67a   :  { %v2509_v2 = vmul.f32 %v2493_v50, %v2493_v50  ;;  %2590 = vst [vmem:[#allocation2 + $0x70] sm:$0xff] %v2574_v45 }
 0x67b   :  { %v2510_v22 = vmul.f32 %v2494_v46, %v2494_v46  ;;  %2591 = vst [vmem:[#allocation2 + $0x78] sm:$0xff] %v2575_v21 }
 0x67c   :  { %v2531_v35 = vadd.f32 %v2530_v38, %v2509_v2 }
 0x67d   :  { %v2540_v60 = vadd.f32 %v2539_v43, %v2510_v22 }
 0x67e   :  { %v2532_v4 = vrot.slane %v2531_v35, 4 }
 0x67f   :  { %v2541_v15 = vrot.slane %v2540_v60, 4 }
 0x680   :  { %v2533_v36 = vadd.f32 %v2532_v4, %v2531_v35 }
 0x681   :  { %v2542_v39 = vadd.f32 %v2541_v15, %v2540_v60 }
 0x682   :  { %v2534_v58 = vrot.slane %v2533_v36, 2 }
 0x683   :  { %v2543_v14 = vrot.slane %v2542_v39, 2 }
 0x684   :  { %v2535_v63 = vadd.f32 %v2534_v58, %v2533_v36 }
 0x685   :  { %v2544_v7 = vadd.f32 %v2543_v14, %v2542_v39 }
 0x686   :  { %v2536_v51 = vrot.slane %v2535_v63, 1 }
 0x687   :  { %v2545_v19 = vrot.slane %v2544_v7, 1 }
 0x688   :  { %v2537_v18 = vadd.f32 %v2536_v51, %v2535_v63 }
 0x689   :  { %v2546_v1 = vadd.f32 %v2545_v19, %v2544_v7 }
 0x68a   :  { %v2550_v8 = vsel %vm2547_vm15, %v2537_v18, %v5499_v3 }
 0x68b   :  { %v2551_v5 = vsel %vm2547_vm15, %v2546_v1, %v5500_v0  ;;  %v2597_v57 = vadd.f32 %v2596_v41, %v2550_v8 }
 0x68d   :  { %v2598_v59 = vadd.f32 %v2597_v57, %v2551_v5 }
 0x68f   :  { %2599 = vadd.xlane.f32.xlu0 %v2598_v59 }
 0x690   :  { %3110 = shalt.err (!%p3107_p4)
}
 0x691   :  { %s3111_s21 = scalar_lea.hbm %s5125_s5, 256 }
 0x692   :  { %p3112_p5 = scmp.ne.s32.totalorder %s5125_s5, %s3111_s21  ;;  %p3115_p6 = scmp.lt.u32.totalorder %s3111_s21, %s5125_s5 }
 0x694   :  { %p3117_p7 = pnand %p3115_p6, %p3112_p5 }
 0x696   :  { %3120 = shalt.err (!%p3117_p7)
}
 0x697   :  { %2623 = dma.vmem_to_hbm [thread:$0]  %s2621_s15, 256, %s5125_s5, [#allocation5]  }
 0x698   :  { %s3121_s3 = scalar_lea.vmem %s5077_s17, 2048  ;;  %p3126_p9 = scmp.lt.s32.totalorder %s5077_s17, %s5077_s17 }
 0x699   :  { %p3122_p8 = scmp.ne.s32.totalorder %s5077_s17, %s3121_s3  ;;  %p3127_p10 = scmp.lt.s32.totalorder %s3121_s3, %s3121_s3 }
 0x69b   :  { %p3128_p11 = por %p3127_p10, %p3126_p9 }
 0x69d   :  { %p3129_p12 = pnand %p3128_p11, %p3122_p8 }
 0x69f   :  { %3132 = shalt.err (!%p3129_p12)
}
 0x6a0   :  { %s3133_s30 = scalar_lea.hbm %s5124_s4, 2048 }
 0x6a1   :  { %p3134_p13 = scmp.ne.s32.totalorder %s5124_s4, %s3133_s30  ;;  %p3137_p0 = scmp.lt.u32.totalorder %s3133_s30, %s5124_s4 }
 0x6a3   :  { %p3139_p1 = pnand %p3137_p0, %p3134_p13 }
 0x6a5   :  { %3142 = shalt.err (!%p3139_p1)
}
 0x6a6   :  { %s3174_s5 = smov 512   ;;  %s3175_s10 = smov 32  }
 0x6a7   :  { %2613 = dma.vmem_to_hbm [thread:$0]  %s5077_s17, 2048, %s5124_s4, [#allocation3], %s3174_s5, %s3174_s5, %s3175_s10  }
 0x6a8   :  { %s3176_s12 = smov [#allocation6]  }
 0x6a9   :  { %s2630_s13 = sshll.u32 %s3176_s12, 4  ;;  %s2631_s13 = int_to_ptr.vmem [resolvable:$true] %s2630_s13 }
 0x6aa   :  { %s3143_s14 = scalar_lea.vmem %s2631_s13, 128  ;;  %p3148_p3 = scmp.lt.s32.totalorder %s2631_s13, %s2631_s13 }
 0x6ab   :  { %p3144_p2 = scmp.ne.s32.totalorder %s2631_s13, %s3143_s14  ;;  %p3149_p4 = scmp.lt.s32.totalorder %s3143_s14, %s3143_s14 }
 0x6ad   :  { %p3150_p5 = por %p3149_p4, %p3148_p3 }
 0x6af   :  { %p3151_p6 = pnand %p3150_p5, %p3144_p2 }
 0x71c   :  { %v2600_v26 = vpop.xlane.xlu0 %2599 }
 0x71d   :  { %2601 = vst [vmem:[#allocation6] sm:$0xff] %v2600_v26 }
 0x71e   :  { %3154 = shalt.err (!%p3151_p6)
}
 0x71f   :  { %s3155_s16 = scalar_lea.hbm %s5126_s6, 128 }
 0x720   :  { %p3156_p7 = scmp.ne.s32.totalorder %s5126_s6, %s3155_s16  ;;  %p3159_p8 = scmp.lt.u32.totalorder %s3155_s16, %s5126_s6 }
 0x722   :  { %p3161_p9 = pnand %p3159_p8, %p3156_p7 }
 0x724   :  { %3164 = shalt.err (!%p3161_p9)
}
 0x725   :  { %2633 = dma.vmem_to_hbm [thread:$0]  %s2631_s13, 128, %s5126_s6, [#allocation5]  }
 0x726   :  { %3165 = dma.done.wait [#allocation3], 2048  }
 0x727   :  { %3166 = vsyncadd [#allocation3], 4294965248 }
 0x728   :  { %3167 = dma.done.wait [#allocation5], 384  }
 0x729   :  { %3168 = vsyncadd [#allocation5], 4294966912 }
 0x72a   :  { %2643 = vsyncpa [#allocation3], 1 }
 0x72b   :  { %2644 = vsyncpa [#allocation5], 1 }

</bundles_post_ra>
